<compile_context>
chip_gen: v6e
topology: v6e:2x2x1
jax: 0.10.0
libtpu: 0.0.40
codegen_flags: <defaults>
</compile_context>

<pallas_src>
import functools

import jax
import jax.numpy as jnp
from jax import lax
from jax.experimental import pallas as pl
from jax.experimental.pallas import tpu as pltpu

VMEM = pltpu.MemorySpace.VMEM


def _vmem_specs(n):
    return [pl.BlockSpec(memory_space=VMEM) for _ in range(n)]


def positional_encoding(M, H):
    # encoding[j, d] = 1 - j/M - d/H * (1 - 2j/M), shaped (M, H).
    j = jnp.arange(M, dtype=jnp.float32)[:, None]
    d = jnp.arange(H, dtype=jnp.float32)[None, :]
    return 1.0 - j / M - (d / H) * (1.0 - 2.0 * j / M)


# ----------------------------------------------------------------------------
# Single fused kernel: embedding -> fact GRU (fw+bw, PE-sum) -> question GRU ->
# episodic memory (reduced) -> answer decoder (GRUCell + Linear + log_softmax).
# All weights stay resident in VMEM for the whole forward.
# ----------------------------------------------------------------------------
def _dmn_kernel(T, Tq, N, B, RQ, episodes, num_decode,
                ftok_ref, qtok_ref, emb_ref, pe_ref,
                f_wih_ref, f_whh_ref, f_bih_ref, f_bhh_ref,
                q_wih_ref, q_whh_ref, q_bih_ref, q_bhh_ref,
                ml_w0_ref, ml_w2_ref, ml_b_ref,
                a_wy_ref, a_wq_ref, a_whh_ref, a_bih_ref, a_bhh_ref,
                fc_w_ref, fc_b_ref,
                out_ref, fenc_ref):
    f32 = jnp.float32
    H = emb_ref.shape[0]
    NB = N * B                 # rows per fact stream (facts x batch)
    R2 = 2 * NB                # fw + bw streams stacked on sublanes
    emb = emb_ref[...]

    def embed(tok_col_ref, rows):
        # One-hot (rows, H) @ (H, H) embedding lookup, entirely on the MXU.
        ids = tok_col_ref[...]                                     # (rows, 1) int32
        oh = (lax.broadcasted_iota(jnp.int32, (rows, H), 1) == ids).astype(f32)
        return jnp.dot(oh, emb, preferred_element_type=f32)

    def gru_step(h, gi, whh, bhh):
        # Fused-gate GRU cell: ONE (rows, H) @ (H, 3H) matmul per serial step;
        # gate sub-ranges extracted with lane slices (gate order r | z | n).
        gh = jnp.dot(h, whh, preferred_element_type=f32) + bhh
        r = jax.nn.sigmoid(gi[:, 0:H] + gh[:, 0:H])
        z = jax.nn.sigmoid(gi[:, H:2 * H] + gh[:, H:2 * H])
        n = jnp.tanh(gi[:, 2 * H:3 * H] + r * gh[:, 2 * H:3 * H])
        return (1.0 - z) * n + z * h

    # ---- fact encoder: fw & bw streams stacked on sublanes, shared weights ----
    # Input-side matmul hoisted out of the recurrence and batched over all
    # T x (fw+bw) x facts x batch rows in one (T*R2, H) @ (H, 3H) call.
    x_f = embed(ftok_ref, T * R2)
    gi_f = jnp.dot(x_f, f_wih_ref[...], preferred_element_type=f32) + f_bih_ref[...]
    whh_f, bhh_f = f_whh_ref[...], f_bhh_ref[...]
    pe = pe_ref[...]
    h_fb = jnp.zeros((R2, H), f32)
    acc = jnp.zeros((R2, H), f32)
    for t in range(T):                                   # static unroll (T small)
        h_fb = gru_step(h_fb, gi_f[t * R2:(t + 1) * R2], whh_f, bhh_f)
        acc = acc + pe[t:t + 1, :] * h_fb                # sum_t pe[t] * h_t
    # bw rows were fed batch-flipped tokens on the host, so
    # factsEncoded = cat(c_fw) + flip(cat(c_bw), dims=[1]) == acc_fw + acc_bw.
    fenc_ref[...] = acc[:NB] + acc[NB:]

    # ---- question encoder (batch zero-padded to RQ rows; eval = final hidden) --
    x_q = embed(qtok_ref, Tq * RQ)
    gi_q = jnp.dot(x_q, q_wih_ref[...], preferred_element_type=f32) + q_bih_ref[...]
    whh_q, bhh_q = q_whh_ref[...], q_bhh_ref[...]
    q = jnp.zeros((RQ, H), f32)
    for t in range(Tq):                                  # static unroll
        q = gru_step(q, gi_q[t * RQ:(t + 1) * RQ], whh_q, bhh_q)

    # ---- episodic memory phase ----
    # g == 1.0 exactly => AttnGRU hidden stays 0 => e == 0, so the per-episode
    # update is bit-identically  m = relu(m @ W0 + (q @ W2 + b)).
    qw = jnp.dot(q, ml_w2_ref[...], preferred_element_type=f32) + ml_b_ref[...]
    ml_w0 = ml_w0_ref[...]

    def ep_body(_i, m):
        return jnp.maximum(jnp.dot(m, ml_w0, preferred_element_type=f32) + qw, 0.0)

    m = lax.fori_loop(0, episodes, ep_body, q)           # memory starts at q

    # ---- answer decoder: GRUCell(cat[y_<s>, q], h) + Linear + log_softmax ----
    # y_t_1 is the <s> embedding for every row and never updated (as in the
    # reference), so the whole input-side contribution is loop-invariant.
    gi_d = (jnp.dot(emb[2:3, :], a_wy_ref[...], preferred_element_type=f32)
            + jnp.dot(q, a_wq_ref[...], preferred_element_type=f32)
            + a_bih_ref[...])
    whh_a, bhh_a = a_whh_ref[...], a_bhh_ref[...]
    fcw, fcb = fc_w_ref[...], fc_b_ref[...]
    h = m
    for t in range(num_decode):                          # static unroll
        h = gru_step(h, gi_d, whh_a, bhh_a)
        logits = jnp.dot(h, fcw, preferred_element_type=f32) + fcb
        s = logits - jnp.max(logits, axis=1, keepdims=True)
        out_ref[:, t * H:(t + 1) * H] = s - jnp.log(
            jnp.sum(jnp.exp(s), axis=1, keepdims=True))


# ----------------------------------------------------------------------------
# Parameter initialization (deterministic, synthetic).  GRU weights are stored
# pre-transposed with the 3 gates fused along the lane axis (H, 3H), PyTorch
# gate order [r | z | n].  Provably-dead modules (attention MLP, AttnGRU,
# memory_grucell, e-block of memory_linear) are not materialized.
# ----------------------------------------------------------------------------
def init_params(key, H):
    keys = iter(jax.random.split(key, 40))

    def nrm(shape, scale=0.1):
        return scale * jax.random.normal(next(keys), shape, dtype=jnp.float32)

    p = {}
    p['embedding'] = nrm((H, H))                      # nn.Embedding(H, H)
    p['fact_gru'] = dict(wih=nrm((H, 3 * H)), whh=nrm((H, 3 * H)),
                         bih=nrm((1, 3 * H)), bhh=nrm((1, 3 * H)))
    p['ques_gru'] = dict(wih=nrm((H, 3 * H)), whh=nrm((H, 3 * H)),
                         bih=nrm((1, 3 * H)), bhh=nrm((1, 3 * H)))
    # memory_linear = Linear(3H -> H): blocks for [prev_mem | e | q]; the e-block
    # multiplies an exact zero and is elided.
    p['mem_lin_w0'] = nrm((H, H))
    p['mem_lin_w2'] = nrm((H, H))
    p['mem_lin_b'] = nrm((1, H))
    p['ans_gru'] = dict(wy=nrm((H, 3 * H)), wq=nrm((H, 3 * H)),   # 2H input split
                        whh=nrm((H, 3 * H)),
                        bih=nrm((1, 3 * H)), bhh=nrm((1, 3 * H)))
    p['ans_fc_w'] = nrm((H, H))
    p['ans_fc_b'] = nrm((1, H))
    return p


# ----------------------------------------------------------------------------
# DMN forward: ONE pallas_call.  The only host glue is tiny int32 token-layout
# prep (transpose / flip / pad) and the final (B, num_decode*H) slice+reshape.
# ----------------------------------------------------------------------------
def dmn_forward(params, facts, question, num_decode, episodes=3):
    # facts: (N, B, T) int32 token ids; question: (B, Tq) int32 token ids.
    emb = params['embedding']
    H = emb.shape[1]
    N, B, T = facts.shape
    Tq = question.shape[1]
    assert N == B, "reference broadcasting requires num_facts == batch"
    NB = N * B
    RQ = max(8, -(-B // 8) * 8)              # question rows padded to sublane tile

    # Token layouts.  Per time step t the fact block holds [fw rows | bw rows];
    # bw tokens are time-reversed AND batch-flipped so that factsEncoded is a
    # plain row-wise add inside the kernel (no in-kernel flip / permutation).
    tok_tm = jnp.transpose(facts, (2, 0, 1))                     # (T, N, B)
    tok_fw = tok_tm.reshape(T, NB)
    tok_bw = tok_tm[::-1, :, ::-1].reshape(T, NB)
    ftok = jnp.concatenate([tok_fw, tok_bw], axis=1).reshape(T * 2 * NB, 1)
    qtok = jnp.pad(jnp.transpose(question, (1, 0)),
                   ((0, 0), (0, RQ - B))).reshape(Tq * RQ, 1)    # pad with <PAD>=0

    pe_f = positional_encoding(T, H)

    fg, qg, ag = params['fact_gru'], params['ques_gru'], params['ans_gru']
    out, _facts_encoded = pl.pallas_call(
        functools.partial(_dmn_kernel, T, Tq, N, B, RQ, episodes, num_decode),
        out_shape=(jax.ShapeDtypeStruct((RQ, num_decode * H), jnp.float32),
                   jax.ShapeDtypeStruct((NB, H), jnp.float32)),
        in_specs=_vmem_specs(22),
        out_specs=tuple(_vmem_specs(2)),
    )(ftok, qtok, emb, pe_f,
      fg['wih'], fg['whh'], fg['bih'], fg['bhh'],
      qg['wih'], qg['whh'], qg['bih'], qg['bhh'],
      params['mem_lin_w0'], params['mem_lin_w2'], params['mem_lin_b'],
      ag['wy'], ag['wq'], ag['whh'], ag['bih'], ag['bhh'],
      params['ans_fc_w'], params['ans_fc_b'])

    # torch.cat(decodes, 1).view(B * num_decode, -1): out row b holds
    # [dec_0(b) | dec_1(b) | ...] along lanes -> slice off padding + reshape.
    return out[:B].reshape(B * num_decode, H)


if __name__ == "__main__":
    H = 32            # size_of_hidden (also vocab size, since nn.Embedding(H, H))
    B = 4             # batch
    N_FACTS = 4       # must equal B for the reference broadcasting to be valid
    T = 8             # fact sequence length
    TQ = 8            # question sequence length
    NUM_DECODE = 3
    EPISODES = 3

    key = jax.random.PRNGKey(0)
    pkey, fkey, qkey = jax.random.split(key, 3)
    params = init_params(pkey, H)
    facts = jax.random.randint(fkey, (N_FACTS, B, T), 0, H, dtype=jnp.int32)
    question = jax.random.randint(qkey, (B, TQ), 0, H, dtype=jnp.int32)

    fwd = jax.jit(functools.partial(dmn_forward, num_decode=NUM_DECODE,
                                    episodes=EPISODES))
    out = jax.block_until_ready(fwd(params, facts, question))

    assert out.shape == (N_FACTS * NUM_DECODE, H), out.shape
    assert bool(jnp.all(jnp.isfinite(out)))
    print("KERNEL_OK")
</pallas_src>

<mosaic_0001>
module attributes {stable_mosaic.version = 11 : i64} {
  func.func @_dmn_kernel(%arg0: memref<256x1xi32, #tpu.memory_space<vmem>>, %arg1: memref<64x1xi32, #tpu.memory_space<vmem>>, %arg2: memref<32x32xf32, #tpu.memory_space<vmem>>, %arg3: memref<8x32xf32, #tpu.memory_space<vmem>>, %arg4: memref<32x96xf32, #tpu.memory_space<vmem>>, %arg5: memref<32x96xf32, #tpu.memory_space<vmem>>, %arg6: memref<1x96xf32, #tpu.memory_space<vmem>>, %arg7: memref<1x96xf32, #tpu.memory_space<vmem>>, %arg8: memref<32x96xf32, #tpu.memory_space<vmem>>, %arg9: memref<32x96xf32, #tpu.memory_space<vmem>>, %arg10: memref<1x96xf32, #tpu.memory_space<vmem>>, %arg11: memref<1x96xf32, #tpu.memory_space<vmem>>, %arg12: memref<32x32xf32, #tpu.memory_space<vmem>>, %arg13: memref<32x32xf32, #tpu.memory_space<vmem>>, %arg14: memref<1x32xf32, #tpu.memory_space<vmem>>, %arg15: memref<32x96xf32, #tpu.memory_space<vmem>>, %arg16: memref<32x96xf32, #tpu.memory_space<vmem>>, %arg17: memref<32x96xf32, #tpu.memory_space<vmem>>, %arg18: memref<1x96xf32, #tpu.memory_space<vmem>>, %arg19: memref<1x96xf32, #tpu.memory_space<vmem>>, %arg20: memref<32x32xf32, #tpu.memory_space<vmem>>, %arg21: memref<1x32xf32, #tpu.memory_space<vmem>>, %arg22: memref<8x96xf32, #tpu.memory_space<vmem>>, %arg23: memref<16x32xf32, #tpu.memory_space<vmem>>) attributes {dimension_semantics = [], scalar_prefetch = 0 : i64, scratch_operands = 0 : i64, tpu.core_type = #tpu.core_type<tc>} {
    %c0 = arith.constant 0 : index
    %c0_0 = arith.constant 0 : index
    %0 = vector.load %arg2[%c0, %c0_0] : memref<32x32xf32, #tpu.memory_space<vmem>>, vector<32x32xf32>
    %c0_1 = arith.constant 0 : index
    %c0_2 = arith.constant 0 : index
    %1 = vector.load %arg0[%c0_1, %c0_2] : memref<256x1xi32, #tpu.memory_space<vmem>>, vector<256x1xi32>
    %2 = tpu.iota {dimensions = array<i32: 1>} : vector<256x32xi32>
    %3 = vector.broadcast %1 : vector<256x1xi32> to vector<256x32xi32>
    %4 = arith.cmpi eq, %2, %3 : vector<256x32xi32>
    %5 = arith.extui %4 : vector<256x32xi1> to vector<256x32xi32>
    %6 = arith.sitofp %5 : vector<256x32xi32> to vector<256x32xf32>
    %cst = arith.constant dense<0.000000e+00> : vector<256x32xf32>
    %7 = tpu.matmul %6, %0, %cst {dimension_numbers = #tpu.dot_dimension_numbers<[1], [0], [0], [1], [0, 0, 1, 1], [], []>} : vector<256x32xf32>, vector<32x32xf32>, vector<256x32xf32> -> vector<256x32xf32>
    %c0_3 = arith.constant 0 : index
    %c0_4 = arith.constant 0 : index
    %8 = vector.load %arg4[%c0_3, %c0_4] : memref<32x96xf32, #tpu.memory_space<vmem>>, vector<32x96xf32>
    %cst_5 = arith.constant dense<0.000000e+00> : vector<256x96xf32>
    %9 = tpu.matmul %7, %8, %cst_5 {dimension_numbers = #tpu.dot_dimension_numbers<[1], [0], [0], [1], [0, 0, 1, 1], [], []>} : vector<256x32xf32>, vector<32x96xf32>, vector<256x96xf32> -> vector<256x96xf32>
    %c0_6 = arith.constant 0 : index
    %c0_7 = arith.constant 0 : index
    %10 = vector.load %arg6[%c0_6, %c0_7] : memref<1x96xf32, #tpu.memory_space<vmem>>, vector<1x96xf32>
    %11 = vector.broadcast %10 : vector<1x96xf32> to vector<256x96xf32>
    %12 = arith.addf %9, %11 : vector<256x96xf32>
    %c0_8 = arith.constant 0 : index
    %c0_9 = arith.constant 0 : index
    %13 = vector.load %arg5[%c0_8, %c0_9] : memref<32x96xf32, #tpu.memory_space<vmem>>, vector<32x96xf32>
    %c0_10 = arith.constant 0 : index
    %c0_11 = arith.constant 0 : index
    %14 = vector.load %arg7[%c0_10, %c0_11] : memref<1x96xf32, #tpu.memory_space<vmem>>, vector<1x96xf32>
    %c0_12 = arith.constant 0 : index
    %c0_13 = arith.constant 0 : index
    %15 = vector.load %arg3[%c0_12, %c0_13] : memref<8x32xf32, #tpu.memory_space<vmem>>, vector<8x32xf32>
    %cst_14 = arith.constant 0.000000e+00 : f32
    %16 = vector.broadcast %cst_14 : f32 to vector<32x32xf32>
    %cst_15 = arith.constant 0.000000e+00 : f32
    %17 = vector.broadcast %cst_15 : f32 to vector<32x32xf32>
    %18 = vector.extract_strided_slice %12 {offsets = [0, 0], sizes = [32, 96], strides = [1, 1]} : vector<256x96xf32> to vector<32x96xf32>
    %cst_16 = arith.constant dense<0.000000e+00> : vector<32x96xf32>
    %19 = tpu.matmul %16, %13, %cst_16 {dimension_numbers = #tpu.dot_dimension_numbers<[1], [0], [0], [1], [0, 0, 1, 1], [], []>} : vector<32x32xf32>, vector<32x96xf32>, vector<32x96xf32> -> vector<32x96xf32>
    %20 = vector.broadcast %14 : vector<1x96xf32> to vector<32x96xf32>
    %21 = arith.addf %19, %20 : vector<32x96xf32>
    %22 = vector.extract_strided_slice %18 {offsets = [0, 0], sizes = [32, 32], strides = [1, 1]} : vector<32x96xf32> to vector<32x32xf32>
    %23 = vector.extract_strided_slice %21 {offsets = [0, 0], sizes = [32, 32], strides = [1, 1]} : vector<32x96xf32> to vector<32x32xf32>
    %24 = arith.addf %22, %23 : vector<32x32xf32>
    %25 = arith.negf %24 : vector<32x32xf32>
    %26 = math.exp %25 : vector<32x32xf32>
    %cst_17 = arith.constant 1.000000e+00 : f32
    %27 = vector.broadcast %cst_17 : f32 to vector<32x32xf32>
    %28 = arith.addf %27, %26 : vector<32x32xf32>
    %29 = arith.divf %27, %28 : vector<32x32xf32>
    %30 = vector.extract_strided_slice %18 {offsets = [0, 32], sizes = [32, 32], strides = [1, 1]} : vector<32x96xf32> to vector<32x32xf32>
    %31 = vector.extract_strided_slice %21 {offsets = [0, 32], sizes = [32, 32], strides = [1, 1]} : vector<32x96xf32> to vector<32x32xf32>
    %32 = arith.addf %30, %31 : vector<32x32xf32>
    %33 = arith.negf %32 : vector<32x32xf32>
    %34 = math.exp %33 : vector<32x32xf32>
    %cst_18 = arith.constant 1.000000e+00 : f32
    %35 = vector.broadcast %cst_18 : f32 to vector<32x32xf32>
    %36 = arith.addf %35, %34 : vector<32x32xf32>
    %37 = arith.divf %35, %36 : vector<32x32xf32>
    %38 = vector.extract_strided_slice %18 {offsets = [0, 64], sizes = [32, 32], strides = [1, 1]} : vector<32x96xf32> to vector<32x32xf32>
    %39 = vector.extract_strided_slice %21 {offsets = [0, 64], sizes = [32, 32], strides = [1, 1]} : vector<32x96xf32> to vector<32x32xf32>
    %40 = arith.mulf %29, %39 : vector<32x32xf32>
    %41 = arith.addf %38, %40 : vector<32x32xf32>
    %42 = math.tanh %41 : vector<32x32xf32>
    %cst_19 = arith.constant 1.000000e+00 : f32
    %43 = vector.broadcast %cst_19 : f32 to vector<32x32xf32>
    %44 = arith.subf %43, %37 : vector<32x32xf32>
    %45 = arith.mulf %44, %42 : vector<32x32xf32>
    %46 = arith.mulf %37, %16 : vector<32x32xf32>
    %47 = arith.addf %45, %46 : vector<32x32xf32>
    %48 = vector.extract_strided_slice %15 {offsets = [0, 0], sizes = [1, 32], strides = [1, 1]} : vector<8x32xf32> to vector<1x32xf32>
    %49 = vector.broadcast %48 : vector<1x32xf32> to vector<32x32xf32>
    %50 = arith.mulf %49, %47 : vector<32x32xf32>
    %51 = arith.addf %17, %50 : vector<32x32xf32>
    %52 = vector.extract_strided_slice %12 {offsets = [32, 0], sizes = [32, 96], strides = [1, 1]} : vector<256x96xf32> to vector<32x96xf32>
    %cst_20 = arith.constant dense<0.000000e+00> : vector<32x96xf32>
    %53 = tpu.matmul %47, %13, %cst_20 {dimension_numbers = #tpu.dot_dimension_numbers<[1], [0], [0], [1], [0, 0, 1, 1], [], []>} : vector<32x32xf32>, vector<32x96xf32>, vector<32x96xf32> -> vector<32x96xf32>
    %54 = vector.broadcast %14 : vector<1x96xf32> to vector<32x96xf32>
    %55 = arith.addf %53, %54 : vector<32x96xf32>
    %56 = vector.extract_strided_slice %52 {offsets = [0, 0], sizes = [32, 32], strides = [1, 1]} : vector<32x96xf32> to vector<32x32xf32>
    %57 = vector.extract_strided_slice %55 {offsets = [0, 0], sizes = [32, 32], strides = [1, 1]} : vector<32x96xf32> to vector<32x32xf32>
    %58 = arith.addf %56, %57 : vector<32x32xf32>
    %59 = arith.negf %58 : vector<32x32xf32>
    %60 = math.exp %59 : vector<32x32xf32>
    %cst_21 = arith.constant 1.000000e+00 : f32
    %61 = vector.broadcast %cst_21 : f32 to vector<32x32xf32>
    %62 = arith.addf %61, %60 : vector<32x32xf32>
    %63 = arith.divf %61, %62 : vector<32x32xf32>
    %64 = vector.extract_strided_slice %52 {offsets = [0, 32], sizes = [32, 32], strides = [1, 1]} : vector<32x96xf32> to vector<32x32xf32>
    %65 = vector.extract_strided_slice %55 {offsets = [0, 32], sizes = [32, 32], strides = [1, 1]} : vector<32x96xf32> to vector<32x32xf32>
    %66 = arith.addf %64, %65 : vector<32x32xf32>
    %67 = arith.negf %66 : vector<32x32xf32>
    %68 = math.exp %67 : vector<32x32xf32>
    %cst_22 = arith.constant 1.000000e+00 : f32
    %69 = vector.broadcast %cst_22 : f32 to vector<32x32xf32>
    %70 = arith.addf %69, %68 : vector<32x32xf32>
    %71 = arith.divf %69, %70 : vector<32x32xf32>
    %72 = vector.extract_strided_slice %52 {offsets = [0, 64], sizes = [32, 32], strides = [1, 1]} : vector<32x96xf32> to vector<32x32xf32>
    %73 = vector.extract_strided_slice %55 {offsets = [0, 64], sizes = [32, 32], strides = [1, 1]} : vector<32x96xf32> to vector<32x32xf32>
    %74 = arith.mulf %63, %73 : vector<32x32xf32>
    %75 = arith.addf %72, %74 : vector<32x32xf32>
    %76 = math.tanh %75 : vector<32x32xf32>
    %cst_23 = arith.constant 1.000000e+00 : f32
    %77 = vector.broadcast %cst_23 : f32 to vector<32x32xf32>
    %78 = arith.subf %77, %71 : vector<32x32xf32>
    %79 = arith.mulf %78, %76 : vector<32x32xf32>
    %80 = arith.mulf %71, %47 : vector<32x32xf32>
    %81 = arith.addf %79, %80 : vector<32x32xf32>
    %82 = vector.extract_strided_slice %15 {offsets = [1, 0], sizes = [1, 32], strides = [1, 1]} : vector<8x32xf32> to vector<1x32xf32>
    %83 = vector.broadcast %82 : vector<1x32xf32> to vector<32x32xf32>
    %84 = arith.mulf %83, %81 : vector<32x32xf32>
    %85 = arith.addf %51, %84 : vector<32x32xf32>
    %86 = vector.extract_strided_slice %12 {offsets = [64, 0], sizes = [32, 96], strides = [1, 1]} : vector<256x96xf32> to vector<32x96xf32>
    %cst_24 = arith.constant dense<0.000000e+00> : vector<32x96xf32>
    %87 = tpu.matmul %81, %13, %cst_24 {dimension_numbers = #tpu.dot_dimension_numbers<[1], [0], [0], [1], [0, 0, 1, 1], [], []>} : vector<32x32xf32>, vector<32x96xf32>, vector<32x96xf32> -> vector<32x96xf32>
    %88 = vector.broadcast %14 : vector<1x96xf32> to vector<32x96xf32>
    %89 = arith.addf %87, %88 : vector<32x96xf32>
    %90 = vector.extract_strided_slice %86 {offsets = [0, 0], sizes = [32, 32], strides = [1, 1]} : vector<32x96xf32> to vector<32x32xf32>
    %91 = vector.extract_strided_slice %89 {offsets = [0, 0], sizes = [32, 32], strides = [1, 1]} : vector<32x96xf32> to vector<32x32xf32>
    %92 = arith.addf %90, %91 : vector<32x32xf32>
    %93 = arith.negf %92 : vector<32x32xf32>
    %94 = math.exp %93 : vector<32x32xf32>
    %cst_25 = arith.constant 1.000000e+00 : f32
    %95 = vector.broadcast %cst_25 : f32 to vector<32x32xf32>
    %96 = arith.addf %95, %94 : vector<32x32xf32>
    %97 = arith.divf %95, %96 : vector<32x32xf32>
    %98 = vector.extract_strided_slice %86 {offsets = [0, 32], sizes = [32, 32], strides = [1, 1]} : vector<32x96xf32> to vector<32x32xf32>
    %99 = vector.extract_strided_slice %89 {offsets = [0, 32], sizes = [32, 32], strides = [1, 1]} : vector<32x96xf32> to vector<32x32xf32>
    %100 = arith.addf %98, %99 : vector<32x32xf32>
    %101 = arith.negf %100 : vector<32x32xf32>
    %102 = math.exp %101 : vector<32x32xf32>
    %cst_26 = arith.constant 1.000000e+00 : f32
    %103 = vector.broadcast %cst_26 : f32 to vector<32x32xf32>
    %104 = arith.addf %103, %102 : vector<32x32xf32>
    %105 = arith.divf %103, %104 : vector<32x32xf32>
    %106 = vector.extract_strided_slice %86 {offsets = [0, 64], sizes = [32, 32], strides = [1, 1]} : vector<32x96xf32> to vector<32x32xf32>
    %107 = vector.extract_strided_slice %89 {offsets = [0, 64], sizes = [32, 32], strides = [1, 1]} : vector<32x96xf32> to vector<32x32xf32>
    %108 = arith.mulf %97, %107 : vector<32x32xf32>
    %109 = arith.addf %106, %108 : vector<32x32xf32>
    %110 = math.tanh %109 : vector<32x32xf32>
    %cst_27 = arith.constant 1.000000e+00 : f32
    %111 = vector.broadcast %cst_27 : f32 to vector<32x32xf32>
    %112 = arith.subf %111, %105 : vector<32x32xf32>
    %113 = arith.mulf %112, %110 : vector<32x32xf32>
    %114 = arith.mulf %105, %81 : vector<32x32xf32>
    %115 = arith.addf %113, %114 : vector<32x32xf32>
    %116 = vector.extract_strided_slice %15 {offsets = [2, 0], sizes = [1, 32], strides = [1, 1]} : vector<8x32xf32> to vector<1x32xf32>
    %117 = vector.broadcast %116 : vector<1x32xf32> to vector<32x32xf32>
    %118 = arith.mulf %117, %115 : vector<32x32xf32>
    %119 = arith.addf %85, %118 : vector<32x32xf32>
    %120 = vector.extract_strided_slice %12 {offsets = [96, 0], sizes = [32, 96], strides = [1, 1]} : vector<256x96xf32> to vector<32x96xf32>
    %cst_28 = arith.constant dense<0.000000e+00> : vector<32x96xf32>
    %121 = tpu.matmul %115, %13, %cst_28 {dimension_numbers = #tpu.dot_dimension_numbers<[1], [0], [0], [1], [0, 0, 1, 1], [], []>} : vector<32x32xf32>, vector<32x96xf32>, vector<32x96xf32> -> vector<32x96xf32>
    %122 = vector.broadcast %14 : vector<1x96xf32> to vector<32x96xf32>
    %123 = arith.addf %121, %122 : vector<32x96xf32>
    %124 = vector.extract_strided_slice %120 {offsets = [0, 0], sizes = [32, 32], strides = [1, 1]} : vector<32x96xf32> to vector<32x32xf32>
    %125 = vector.extract_strided_slice %123 {offsets = [0, 0], sizes = [32, 32], strides = [1, 1]} : vector<32x96xf32> to vector<32x32xf32>
    %126 = arith.addf %124, %125 : vector<32x32xf32>
    %127 = arith.negf %126 : vector<32x32xf32>
    %128 = math.exp %127 : vector<32x32xf32>
    %cst_29 = arith.constant 1.000000e+00 : f32
    %129 = vector.broadcast %cst_29 : f32 to vector<32x32xf32>
    %130 = arith.addf %129, %128 : vector<32x32xf32>
    %131 = arith.divf %129, %130 : vector<32x32xf32>
    %132 = vector.extract_strided_slice %120 {offsets = [0, 32], sizes = [32, 32], strides = [1, 1]} : vector<32x96xf32> to vector<32x32xf32>
    %133 = vector.extract_strided_slice %123 {offsets = [0, 32], sizes = [32, 32], strides = [1, 1]} : vector<32x96xf32> to vector<32x32xf32>
    %134 = arith.addf %132, %133 : vector<32x32xf32>
    %135 = arith.negf %134 : vector<32x32xf32>
    %136 = math.exp %135 : vector<32x32xf32>
    %cst_30 = arith.constant 1.000000e+00 : f32
    %137 = vector.broadcast %cst_30 : f32 to vector<32x32xf32>
    %138 = arith.addf %137, %136 : vector<32x32xf32>
    %139 = arith.divf %137, %138 : vector<32x32xf32>
    %140 = vector.extract_strided_slice %120 {offsets = [0, 64], sizes = [32, 32], strides = [1, 1]} : vector<32x96xf32> to vector<32x32xf32>
    %141 = vector.extract_strided_slice %123 {offsets = [0, 64], sizes = [32, 32], strides = [1, 1]} : vector<32x96xf32> to vector<32x32xf32>
    %142 = arith.mulf %131, %141 : vector<32x32xf32>
    %143 = arith.addf %140, %142 : vector<32x32xf32>
    %144 = math.tanh %143 : vector<32x32xf32>
    %cst_31 = arith.constant 1.000000e+00 : f32
    %145 = vector.broadcast %cst_31 : f32 to vector<32x32xf32>
    %146 = arith.subf %145, %139 : vector<32x32xf32>
    %147 = arith.mulf %146, %144 : vector<32x32xf32>
    %148 = arith.mulf %139, %115 : vector<32x32xf32>
    %149 = arith.addf %147, %148 : vector<32x32xf32>
    %150 = vector.extract_strided_slice %15 {offsets = [3, 0], sizes = [1, 32], strides = [1, 1]} : vector<8x32xf32> to vector<1x32xf32>
    %151 = vector.broadcast %150 : vector<1x32xf32> to vector<32x32xf32>
    %152 = arith.mulf %151, %149 : vector<32x32xf32>
    %153 = arith.addf %119, %152 : vector<32x32xf32>
    %154 = vector.extract_strided_slice %12 {offsets = [128, 0], sizes = [32, 96], strides = [1, 1]} : vector<256x96xf32> to vector<32x96xf32>
    %cst_32 = arith.constant dense<0.000000e+00> : vector<32x96xf32>
    %155 = tpu.matmul %149, %13, %cst_32 {dimension_numbers = #tpu.dot_dimension_numbers<[1], [0], [0], [1], [0, 0, 1, 1], [], []>} : vector<32x32xf32>, vector<32x96xf32>, vector<32x96xf32> -> vector<32x96xf32>
    %156 = vector.broadcast %14 : vector<1x96xf32> to vector<32x96xf32>
    %157 = arith.addf %155, %156 : vector<32x96xf32>
    %158 = vector.extract_strided_slice %154 {offsets = [0, 0], sizes = [32, 32], strides = [1, 1]} : vector<32x96xf32> to vector<32x32xf32>
    %159 = vector.extract_strided_slice %157 {offsets = [0, 0], sizes = [32, 32], strides = [1, 1]} : vector<32x96xf32> to vector<32x32xf32>
    %160 = arith.addf %158, %159 : vector<32x32xf32>
    %161 = arith.negf %160 : vector<32x32xf32>
    %162 = math.exp %161 : vector<32x32xf32>
    %cst_33 = arith.constant 1.000000e+00 : f32
    %163 = vector.broadcast %cst_33 : f32 to vector<32x32xf32>
    %164 = arith.addf %163, %162 : vector<32x32xf32>
    %165 = arith.divf %163, %164 : vector<32x32xf32>
    %166 = vector.extract_strided_slice %154 {offsets = [0, 32], sizes = [32, 32], strides = [1, 1]} : vector<32x96xf32> to vector<32x32xf32>
    %167 = vector.extract_strided_slice %157 {offsets = [0, 32], sizes = [32, 32], strides = [1, 1]} : vector<32x96xf32> to vector<32x32xf32>
    %168 = arith.addf %166, %167 : vector<32x32xf32>
    %169 = arith.negf %168 : vector<32x32xf32>
    %170 = math.exp %169 : vector<32x32xf32>
    %cst_34 = arith.constant 1.000000e+00 : f32
    %171 = vector.broadcast %cst_34 : f32 to vector<32x32xf32>
    %172 = arith.addf %171, %170 : vector<32x32xf32>
    %173 = arith.divf %171, %172 : vector<32x32xf32>
    %174 = vector.extract_strided_slice %154 {offsets = [0, 64], sizes = [32, 32], strides = [1, 1]} : vector<32x96xf32> to vector<32x32xf32>
    %175 = vector.extract_strided_slice %157 {offsets = [0, 64], sizes = [32, 32], strides = [1, 1]} : vector<32x96xf32> to vector<32x32xf32>
    %176 = arith.mulf %165, %175 : vector<32x32xf32>
    %177 = arith.addf %174, %176 : vector<32x32xf32>
    %178 = math.tanh %177 : vector<32x32xf32>
    %cst_35 = arith.constant 1.000000e+00 : f32
    %179 = vector.broadcast %cst_35 : f32 to vector<32x32xf32>
    %180 = arith.subf %179, %173 : vector<32x32xf32>
    %181 = arith.mulf %180, %178 : vector<32x32xf32>
    %182 = arith.mulf %173, %149 : vector<32x32xf32>
    %183 = arith.addf %181, %182 : vector<32x32xf32>
    %184 = vector.extract_strided_slice %15 {offsets = [4, 0], sizes = [1, 32], strides = [1, 1]} : vector<8x32xf32> to vector<1x32xf32>
    %185 = vector.broadcast %184 : vector<1x32xf32> to vector<32x32xf32>
    %186 = arith.mulf %185, %183 : vector<32x32xf32>
    %187 = arith.addf %153, %186 : vector<32x32xf32>
    %188 = vector.extract_strided_slice %12 {offsets = [160, 0], sizes = [32, 96], strides = [1, 1]} : vector<256x96xf32> to vector<32x96xf32>
    %cst_36 = arith.constant dense<0.000000e+00> : vector<32x96xf32>
    %189 = tpu.matmul %183, %13, %cst_36 {dimension_numbers = #tpu.dot_dimension_numbers<[1], [0], [0], [1], [0, 0, 1, 1], [], []>} : vector<32x32xf32>, vector<32x96xf32>, vector<32x96xf32> -> vector<32x96xf32>
    %190 = vector.broadcast %14 : vector<1x96xf32> to vector<32x96xf32>
    %191 = arith.addf %189, %190 : vector<32x96xf32>
    %192 = vector.extract_strided_slice %188 {offsets = [0, 0], sizes = [32, 32], strides = [1, 1]} : vector<32x96xf32> to vector<32x32xf32>
    %193 = vector.extract_strided_slice %191 {offsets = [0, 0], sizes = [32, 32], strides = [1, 1]} : vector<32x96xf32> to vector<32x32xf32>
    %194 = arith.addf %192, %193 : vector<32x32xf32>
    %195 = arith.negf %194 : vector<32x32xf32>
    %196 = math.exp %195 : vector<32x32xf32>
    %cst_37 = arith.constant 1.000000e+00 : f32
    %197 = vector.broadcast %cst_37 : f32 to vector<32x32xf32>
    %198 = arith.addf %197, %196 : vector<32x32xf32>
    %199 = arith.divf %197, %198 : vector<32x32xf32>
    %200 = vector.extract_strided_slice %188 {offsets = [0, 32], sizes = [32, 32], strides = [1, 1]} : vector<32x96xf32> to vector<32x32xf32>
    %201 = vector.extract_strided_slice %191 {offsets = [0, 32], sizes = [32, 32], strides = [1, 1]} : vector<32x96xf32> to vector<32x32xf32>
    %202 = arith.addf %200, %201 : vector<32x32xf32>
    %203 = arith.negf %202 : vector<32x32xf32>
    %204 = math.exp %203 : vector<32x32xf32>
    %cst_38 = arith.constant 1.000000e+00 : f32
    %205 = vector.broadcast %cst_38 : f32 to vector<32x32xf32>
    %206 = arith.addf %205, %204 : vector<32x32xf32>
    %207 = arith.divf %205, %206 : vector<32x32xf32>
    %208 = vector.extract_strided_slice %188 {offsets = [0, 64], sizes = [32, 32], strides = [1, 1]} : vector<32x96xf32> to vector<32x32xf32>
    %209 = vector.extract_strided_slice %191 {offsets = [0, 64], sizes = [32, 32], strides = [1, 1]} : vector<32x96xf32> to vector<32x32xf32>
    %210 = arith.mulf %199, %209 : vector<32x32xf32>
    %211 = arith.addf %208, %210 : vector<32x32xf32>
    %212 = math.tanh %211 : vector<32x32xf32>
    %cst_39 = arith.constant 1.000000e+00 : f32
    %213 = vector.broadcast %cst_39 : f32 to vector<32x32xf32>
    %214 = arith.subf %213, %207 : vector<32x32xf32>
    %215 = arith.mulf %214, %212 : vector<32x32xf32>
    %216 = arith.mulf %207, %183 : vector<32x32xf32>
    %217 = arith.addf %215, %216 : vector<32x32xf32>
    %218 = vector.extract_strided_slice %15 {offsets = [5, 0], sizes = [1, 32], strides = [1, 1]} : vector<8x32xf32> to vector<1x32xf32>
    %219 = vector.broadcast %218 : vector<1x32xf32> to vector<32x32xf32>
    %220 = arith.mulf %219, %217 : vector<32x32xf32>
    %221 = arith.addf %187, %220 : vector<32x32xf32>
    %222 = vector.extract_strided_slice %12 {offsets = [192, 0], sizes = [32, 96], strides = [1, 1]} : vector<256x96xf32> to vector<32x96xf32>
    %cst_40 = arith.constant dense<0.000000e+00> : vector<32x96xf32>
    %223 = tpu.matmul %217, %13, %cst_40 {dimension_numbers = #tpu.dot_dimension_numbers<[1], [0], [0], [1], [0, 0, 1, 1], [], []>} : vector<32x32xf32>, vector<32x96xf32>, vector<32x96xf32> -> vector<32x96xf32>
    %224 = vector.broadcast %14 : vector<1x96xf32> to vector<32x96xf32>
    %225 = arith.addf %223, %224 : vector<32x96xf32>
    %226 = vector.extract_strided_slice %222 {offsets = [0, 0], sizes = [32, 32], strides = [1, 1]} : vector<32x96xf32> to vector<32x32xf32>
    %227 = vector.extract_strided_slice %225 {offsets = [0, 0], sizes = [32, 32], strides = [1, 1]} : vector<32x96xf32> to vector<32x32xf32>
    %228 = arith.addf %226, %227 : vector<32x32xf32>
    %229 = arith.negf %228 : vector<32x32xf32>
    %230 = math.exp %229 : vector<32x32xf32>
    %cst_41 = arith.constant 1.000000e+00 : f32
    %231 = vector.broadcast %cst_41 : f32 to vector<32x32xf32>
    %232 = arith.addf %231, %230 : vector<32x32xf32>
    %233 = arith.divf %231, %232 : vector<32x32xf32>
    %234 = vector.extract_strided_slice %222 {offsets = [0, 32], sizes = [32, 32], strides = [1, 1]} : vector<32x96xf32> to vector<32x32xf32>
    %235 = vector.extract_strided_slice %225 {offsets = [0, 32], sizes = [32, 32], strides = [1, 1]} : vector<32x96xf32> to vector<32x32xf32>
    %236 = arith.addf %234, %235 : vector<32x32xf32>
    %237 = arith.negf %236 : vector<32x32xf32>
    %238 = math.exp %237 : vector<32x32xf32>
    %cst_42 = arith.constant 1.000000e+00 : f32
    %239 = vector.broadcast %cst_42 : f32 to vector<32x32xf32>
    %240 = arith.addf %239, %238 : vector<32x32xf32>
    %241 = arith.divf %239, %240 : vector<32x32xf32>
    %242 = vector.extract_strided_slice %222 {offsets = [0, 64], sizes = [32, 32], strides = [1, 1]} : vector<32x96xf32> to vector<32x32xf32>
    %243 = vector.extract_strided_slice %225 {offsets = [0, 64], sizes = [32, 32], strides = [1, 1]} : vector<32x96xf32> to vector<32x32xf32>
    %244 = arith.mulf %233, %243 : vector<32x32xf32>
    %245 = arith.addf %242, %244 : vector<32x32xf32>
    %246 = math.tanh %245 : vector<32x32xf32>
    %cst_43 = arith.constant 1.000000e+00 : f32
    %247 = vector.broadcast %cst_43 : f32 to vector<32x32xf32>
    %248 = arith.subf %247, %241 : vector<32x32xf32>
    %249 = arith.mulf %248, %246 : vector<32x32xf32>
    %250 = arith.mulf %241, %217 : vector<32x32xf32>
    %251 = arith.addf %249, %250 : vector<32x32xf32>
    %252 = vector.extract_strided_slice %15 {offsets = [6, 0], sizes = [1, 32], strides = [1, 1]} : vector<8x32xf32> to vector<1x32xf32>
    %253 = vector.broadcast %252 : vector<1x32xf32> to vector<32x32xf32>
    %254 = arith.mulf %253, %251 : vector<32x32xf32>
    %255 = arith.addf %221, %254 : vector<32x32xf32>
    %256 = vector.extract_strided_slice %12 {offsets = [224, 0], sizes = [32, 96], strides = [1, 1]} : vector<256x96xf32> to vector<32x96xf32>
    %cst_44 = arith.constant dense<0.000000e+00> : vector<32x96xf32>
    %257 = tpu.matmul %251, %13, %cst_44 {dimension_numbers = #tpu.dot_dimension_numbers<[1], [0], [0], [1], [0, 0, 1, 1], [], []>} : vector<32x32xf32>, vector<32x96xf32>, vector<32x96xf32> -> vector<32x96xf32>
    %258 = vector.broadcast %14 : vector<1x96xf32> to vector<32x96xf32>
    %259 = arith.addf %257, %258 : vector<32x96xf32>
    %260 = vector.extract_strided_slice %256 {offsets = [0, 0], sizes = [32, 32], strides = [1, 1]} : vector<32x96xf32> to vector<32x32xf32>
    %261 = vector.extract_strided_slice %259 {offsets = [0, 0], sizes = [32, 32], strides = [1, 1]} : vector<32x96xf32> to vector<32x32xf32>
    %262 = arith.addf %260, %261 : vector<32x32xf32>
    %263 = arith.negf %262 : vector<32x32xf32>
    %264 = math.exp %263 : vector<32x32xf32>
    %cst_45 = arith.constant 1.000000e+00 : f32
    %265 = vector.broadcast %cst_45 : f32 to vector<32x32xf32>
    %266 = arith.addf %265, %264 : vector<32x32xf32>
    %267 = arith.divf %265, %266 : vector<32x32xf32>
    %268 = vector.extract_strided_slice %256 {offsets = [0, 32], sizes = [32, 32], strides = [1, 1]} : vector<32x96xf32> to vector<32x32xf32>
    %269 = vector.extract_strided_slice %259 {offsets = [0, 32], sizes = [32, 32], strides = [1, 1]} : vector<32x96xf32> to vector<32x32xf32>
    %270 = arith.addf %268, %269 : vector<32x32xf32>
    %271 = arith.negf %270 : vector<32x32xf32>
    %272 = math.exp %271 : vector<32x32xf32>
    %cst_46 = arith.constant 1.000000e+00 : f32
    %273 = vector.broadcast %cst_46 : f32 to vector<32x32xf32>
    %274 = arith.addf %273, %272 : vector<32x32xf32>
    %275 = arith.divf %273, %274 : vector<32x32xf32>
    %276 = vector.extract_strided_slice %256 {offsets = [0, 64], sizes = [32, 32], strides = [1, 1]} : vector<32x96xf32> to vector<32x32xf32>
    %277 = vector.extract_strided_slice %259 {offsets = [0, 64], sizes = [32, 32], strides = [1, 1]} : vector<32x96xf32> to vector<32x32xf32>
    %278 = arith.mulf %267, %277 : vector<32x32xf32>
    %279 = arith.addf %276, %278 : vector<32x32xf32>
    %280 = math.tanh %279 : vector<32x32xf32>
    %cst_47 = arith.constant 1.000000e+00 : f32
    %281 = vector.broadcast %cst_47 : f32 to vector<32x32xf32>
    %282 = arith.subf %281, %275 : vector<32x32xf32>
    %283 = arith.mulf %282, %280 : vector<32x32xf32>
    %284 = arith.mulf %275, %251 : vector<32x32xf32>
    %285 = arith.addf %283, %284 : vector<32x32xf32>
    %286 = vector.extract_strided_slice %15 {offsets = [7, 0], sizes = [1, 32], strides = [1, 1]} : vector<8x32xf32> to vector<1x32xf32>
    %287 = vector.broadcast %286 : vector<1x32xf32> to vector<32x32xf32>
    %288 = arith.mulf %287, %285 : vector<32x32xf32>
    %289 = arith.addf %255, %288 : vector<32x32xf32>
    %290 = vector.extract_strided_slice %289 {offsets = [0, 0], sizes = [16, 32], strides = [1, 1]} : vector<32x32xf32> to vector<16x32xf32>
    %291 = vector.extract_strided_slice %289 {offsets = [16, 0], sizes = [16, 32], strides = [1, 1]} : vector<32x32xf32> to vector<16x32xf32>
    %292 = arith.addf %290, %291 : vector<16x32xf32>
    %c0_48 = arith.constant 0 : index
    %c0_49 = arith.constant 0 : index
    %293 = vector.load %arg23[%c0_48, %c0_49] : memref<16x32xf32, #tpu.memory_space<vmem>>, vector<16x32xf32>
    tpu.vector_store %arg23[%c0_48, %c0_49], %292 {strides = array<i32>} : memref<16x32xf32, #tpu.memory_space<vmem>>, vector<16x32xf32>,
    %c0_50 = arith.constant 0 : index
    %c0_51 = arith.constant 0 : index
    %294 = vector.load %arg1[%c0_50, %c0_51] : memref<64x1xi32, #tpu.memory_space<vmem>>, vector<64x1xi32>
    %295 = tpu.iota {dimensions = array<i32: 1>} : vector<64x32xi32>
    %296 = vector.broadcast %294 : vector<64x1xi32> to vector<64x32xi32>
    %297 = arith.cmpi eq, %295, %296 : vector<64x32xi32>
    %298 = arith.extui %297 : vector<64x32xi1> to vector<64x32xi32>
    %299 = arith.sitofp %298 : vector<64x32xi32> to vector<64x32xf32>
    %cst_52 = arith.constant dense<0.000000e+00> : vector<64x32xf32>
    %300 = tpu.matmul %299, %0, %cst_52 {dimension_numbers = #tpu.dot_dimension_numbers<[1], [0], [0], [1], [0, 0, 1, 1], [], []>} : vector<64x32xf32>, vector<32x32xf32>, vector<64x32xf32> -> vector<64x32xf32>
    %c0_53 = arith.constant 0 : index
    %c0_54 = arith.constant 0 : index
    %301 = vector.load %arg8[%c0_53, %c0_54] : memref<32x96xf32, #tpu.memory_space<vmem>>, vector<32x96xf32>
    %cst_55 = arith.constant dense<0.000000e+00> : vector<64x96xf32>
    %302 = tpu.matmul %300, %301, %cst_55 {dimension_numbers = #tpu.dot_dimension_numbers<[1], [0], [0], [1], [0, 0, 1, 1], [], []>} : vector<64x32xf32>, vector<32x96xf32>, vector<64x96xf32> -> vector<64x96xf32>
    %c0_56 = arith.constant 0 : index
    %c0_57 = arith.constant 0 : index
    %303 = vector.load %arg10[%c0_56, %c0_57] : memref<1x96xf32, #tpu.memory_space<vmem>>, vector<1x96xf32>
    %304 = vector.broadcast %303 : vector<1x96xf32> to vector<64x96xf32>
    %305 = arith.addf %302, %304 : vector<64x96xf32>
    %c0_58 = arith.constant 0 : index
    %c0_59 = arith.constant 0 : index
    %306 = vector.load %arg9[%c0_58, %c0_59] : memref<32x96xf32, #tpu.memory_space<vmem>>, vector<32x96xf32>
    %c0_60 = arith.constant 0 : index
    %c0_61 = arith.constant 0 : index
    %307 = vector.load %arg11[%c0_60, %c0_61] : memref<1x96xf32, #tpu.memory_space<vmem>>, vector<1x96xf32>
    %cst_62 = arith.constant 0.000000e+00 : f32
    %308 = vector.broadcast %cst_62 : f32 to vector<8x32xf32>
    %309 = vector.extract_strided_slice %305 {offsets = [0, 0], sizes = [8, 96], strides = [1, 1]} : vector<64x96xf32> to vector<8x96xf32>
    %cst_63 = arith.constant dense<0.000000e+00> : vector<8x96xf32>
    %310 = tpu.matmul %308, %306, %cst_63 {dimension_numbers = #tpu.dot_dimension_numbers<[1], [0], [0], [1], [0, 0, 1, 1], [], []>} : vector<8x32xf32>, vector<32x96xf32>, vector<8x96xf32> -> vector<8x96xf32>
    %311 = vector.broadcast %307 : vector<1x96xf32> to vector<8x96xf32>
    %312 = arith.addf %310, %311 : vector<8x96xf32>
    %313 = vector.extract_strided_slice %309 {offsets = [0, 0], sizes = [8, 32], strides = [1, 1]} : vector<8x96xf32> to vector<8x32xf32>
    %314 = vector.extract_strided_slice %312 {offsets = [0, 0], sizes = [8, 32], strides = [1, 1]} : vector<8x96xf32> to vector<8x32xf32>
    %315 = arith.addf %313, %314 : vector<8x32xf32>
    %316 = arith.negf %315 : vector<8x32xf32>
    %317 = math.exp %316 : vector<8x32xf32>
    %cst_64 = arith.constant 1.000000e+00 : f32
    %318 = vector.broadcast %cst_64 : f32 to vector<8x32xf32>
    %319 = arith.addf %318, %317 : vector<8x32xf32>
    %320 = arith.divf %318, %319 : vector<8x32xf32>
    %321 = vector.extract_strided_slice %309 {offsets = [0, 32], sizes = [8, 32], strides = [1, 1]} : vector<8x96xf32> to vector<8x32xf32>
    %322 = vector.extract_strided_slice %312 {offsets = [0, 32], sizes = [8, 32], strides = [1, 1]} : vector<8x96xf32> to vector<8x32xf32>
    %323 = arith.addf %321, %322 : vector<8x32xf32>
    %324 = arith.negf %323 : vector<8x32xf32>
    %325 = math.exp %324 : vector<8x32xf32>
    %cst_65 = arith.constant 1.000000e+00 : f32
    %326 = vector.broadcast %cst_65 : f32 to vector<8x32xf32>
    %327 = arith.addf %326, %325 : vector<8x32xf32>
    %328 = arith.divf %326, %327 : vector<8x32xf32>
    %329 = vector.extract_strided_slice %309 {offsets = [0, 64], sizes = [8, 32], strides = [1, 1]} : vector<8x96xf32> to vector<8x32xf32>
    %330 = vector.extract_strided_slice %312 {offsets = [0, 64], sizes = [8, 32], strides = [1, 1]} : vector<8x96xf32> to vector<8x32xf32>
    %331 = arith.mulf %320, %330 : vector<8x32xf32>
    %332 = arith.addf %329, %331 : vector<8x32xf32>
    %333 = math.tanh %332 : vector<8x32xf32>
    %cst_66 = arith.constant 1.000000e+00 : f32
    %334 = vector.broadcast %cst_66 : f32 to vector<8x32xf32>
    %335 = arith.subf %334, %328 : vector<8x32xf32>
    %336 = arith.mulf %335, %333 : vector<8x32xf32>
    %337 = arith.mulf %328, %308 : vector<8x32xf32>
    %338 = arith.addf %336, %337 : vector<8x32xf32>
    %339 = vector.extract_strided_slice %305 {offsets = [8, 0], sizes = [8, 96], strides = [1, 1]} : vector<64x96xf32> to vector<8x96xf32>
    %cst_67 = arith.constant dense<0.000000e+00> : vector<8x96xf32>
    %340 = tpu.matmul %338, %306, %cst_67 {dimension_numbers = #tpu.dot_dimension_numbers<[1], [0], [0], [1], [0, 0, 1, 1], [], []>} : vector<8x32xf32>, vector<32x96xf32>, vector<8x96xf32> -> vector<8x96xf32>
    %341 = vector.broadcast %307 : vector<1x96xf32> to vector<8x96xf32>
    %342 = arith.addf %340, %341 : vector<8x96xf32>
    %343 = vector.extract_strided_slice %339 {offsets = [0, 0], sizes = [8, 32], strides = [1, 1]} : vector<8x96xf32> to vector<8x32xf32>
    %344 = vector.extract_strided_slice %342 {offsets = [0, 0], sizes = [8, 32], strides = [1, 1]} : vector<8x96xf32> to vector<8x32xf32>
    %345 = arith.addf %343, %344 : vector<8x32xf32>
    %346 = arith.negf %345 : vector<8x32xf32>
    %347 = math.exp %346 : vector<8x32xf32>
    %cst_68 = arith.constant 1.000000e+00 : f32
    %348 = vector.broadcast %cst_68 : f32 to vector<8x32xf32>
    %349 = arith.addf %348, %347 : vector<8x32xf32>
    %350 = arith.divf %348, %349 : vector<8x32xf32>
    %351 = vector.extract_strided_slice %339 {offsets = [0, 32], sizes = [8, 32], strides = [1, 1]} : vector<8x96xf32> to vector<8x32xf32>
    %352 = vector.extract_strided_slice %342 {offsets = [0, 32], sizes = [8, 32], strides = [1, 1]} : vector<8x96xf32> to vector<8x32xf32>
    %353 = arith.addf %351, %352 : vector<8x32xf32>
    %354 = arith.negf %353 : vector<8x32xf32>
    %355 = math.exp %354 : vector<8x32xf32>
    %cst_69 = arith.constant 1.000000e+00 : f32
    %356 = vector.broadcast %cst_69 : f32 to vector<8x32xf32>
    %357 = arith.addf %356, %355 : vector<8x32xf32>
    %358 = arith.divf %356, %357 : vector<8x32xf32>
    %359 = vector.extract_strided_slice %339 {offsets = [0, 64], sizes = [8, 32], strides = [1, 1]} : vector<8x96xf32> to vector<8x32xf32>
    %360 = vector.extract_strided_slice %342 {offsets = [0, 64], sizes = [8, 32], strides = [1, 1]} : vector<8x96xf32> to vector<8x32xf32>
    %361 = arith.mulf %350, %360 : vector<8x32xf32>
    %362 = arith.addf %359, %361 : vector<8x32xf32>
    %363 = math.tanh %362 : vector<8x32xf32>
    %cst_70 = arith.constant 1.000000e+00 : f32
    %364 = vector.broadcast %cst_70 : f32 to vector<8x32xf32>
    %365 = arith.subf %364, %358 : vector<8x32xf32>
    %366 = arith.mulf %365, %363 : vector<8x32xf32>
    %367 = arith.mulf %358, %338 : vector<8x32xf32>
    %368 = arith.addf %366, %367 : vector<8x32xf32>
    %369 = vector.extract_strided_slice %305 {offsets = [16, 0], sizes = [8, 96], strides = [1, 1]} : vector<64x96xf32> to vector<8x96xf32>
    %cst_71 = arith.constant dense<0.000000e+00> : vector<8x96xf32>
    %370 = tpu.matmul %368, %306, %cst_71 {dimension_numbers = #tpu.dot_dimension_numbers<[1], [0], [0], [1], [0, 0, 1, 1], [], []>} : vector<8x32xf32>, vector<32x96xf32>, vector<8x96xf32> -> vector<8x96xf32>
    %371 = vector.broadcast %307 : vector<1x96xf32> to vector<8x96xf32>
    %372 = arith.addf %370, %371 : vector<8x96xf32>
    %373 = vector.extract_strided_slice %369 {offsets = [0, 0], sizes = [8, 32], strides = [1, 1]} : vector<8x96xf32> to vector<8x32xf32>
    %374 = vector.extract_strided_slice %372 {offsets = [0, 0], sizes = [8, 32], strides = [1, 1]} : vector<8x96xf32> to vector<8x32xf32>
    %375 = arith.addf %373, %374 : vector<8x32xf32>
    %376 = arith.negf %375 : vector<8x32xf32>
    %377 = math.exp %376 : vector<8x32xf32>
    %cst_72 = arith.constant 1.000000e+00 : f32
    %378 = vector.broadcast %cst_72 : f32 to vector<8x32xf32>
    %379 = arith.addf %378, %377 : vector<8x32xf32>
    %380 = arith.divf %378, %379 : vector<8x32xf32>
    %381 = vector.extract_strided_slice %369 {offsets = [0, 32], sizes = [8, 32], strides = [1, 1]} : vector<8x96xf32> to vector<8x32xf32>
    %382 = vector.extract_strided_slice %372 {offsets = [0, 32], sizes = [8, 32], strides = [1, 1]} : vector<8x96xf32> to vector<8x32xf32>
    %383 = arith.addf %381, %382 : vector<8x32xf32>
    %384 = arith.negf %383 : vector<8x32xf32>
    %385 = math.exp %384 : vector<8x32xf32>
    %cst_73 = arith.constant 1.000000e+00 : f32
    %386 = vector.broadcast %cst_73 : f32 to vector<8x32xf32>
    %387 = arith.addf %386, %385 : vector<8x32xf32>
    %388 = arith.divf %386, %387 : vector<8x32xf32>
    %389 = vector.extract_strided_slice %369 {offsets = [0, 64], sizes = [8, 32], strides = [1, 1]} : vector<8x96xf32> to vector<8x32xf32>
    %390 = vector.extract_strided_slice %372 {offsets = [0, 64], sizes = [8, 32], strides = [1, 1]} : vector<8x96xf32> to vector<8x32xf32>
    %391 = arith.mulf %380, %390 : vector<8x32xf32>
    %392 = arith.addf %389, %391 : vector<8x32xf32>
    %393 = math.tanh %392 : vector<8x32xf32>
    %cst_74 = arith.constant 1.000000e+00 : f32
    %394 = vector.broadcast %cst_74 : f32 to vector<8x32xf32>
    %395 = arith.subf %394, %388 : vector<8x32xf32>
    %396 = arith.mulf %395, %393 : vector<8x32xf32>
    %397 = arith.mulf %388, %368 : vector<8x32xf32>
    %398 = arith.addf %396, %397 : vector<8x32xf32>
    %399 = vector.extract_strided_slice %305 {offsets = [24, 0], sizes = [8, 96], strides = [1, 1]} : vector<64x96xf32> to vector<8x96xf32>
    %cst_75 = arith.constant dense<0.000000e+00> : vector<8x96xf32>
    %400 = tpu.matmul %398, %306, %cst_75 {dimension_numbers = #tpu.dot_dimension_numbers<[1], [0], [0], [1], [0, 0, 1, 1], [], []>} : vector<8x32xf32>, vector<32x96xf32>, vector<8x96xf32> -> vector<8x96xf32>
    %401 = vector.broadcast %307 : vector<1x96xf32> to vector<8x96xf32>
    %402 = arith.addf %400, %401 : vector<8x96xf32>
    %403 = vector.extract_strided_slice %399 {offsets = [0, 0], sizes = [8, 32], strides = [1, 1]} : vector<8x96xf32> to vector<8x32xf32>
    %404 = vector.extract_strided_slice %402 {offsets = [0, 0], sizes = [8, 32], strides = [1, 1]} : vector<8x96xf32> to vector<8x32xf32>
    %405 = arith.addf %403, %404 : vector<8x32xf32>
    %406 = arith.negf %405 : vector<8x32xf32>
    %407 = math.exp %406 : vector<8x32xf32>
    %cst_76 = arith.constant 1.000000e+00 : f32
    %408 = vector.broadcast %cst_76 : f32 to vector<8x32xf32>
    %409 = arith.addf %408, %407 : vector<8x32xf32>
    %410 = arith.divf %408, %409 : vector<8x32xf32>
    %411 = vector.extract_strided_slice %399 {offsets = [0, 32], sizes = [8, 32], strides = [1, 1]} : vector<8x96xf32> to vector<8x32xf32>
    %412 = vector.extract_strided_slice %402 {offsets = [0, 32], sizes = [8, 32], strides = [1, 1]} : vector<8x96xf32> to vector<8x32xf32>
    %413 = arith.addf %411, %412 : vector<8x32xf32>
    %414 = arith.negf %413 : vector<8x32xf32>
    %415 = math.exp %414 : vector<8x32xf32>
    %cst_77 = arith.constant 1.000000e+00 : f32
    %416 = vector.broadcast %cst_77 : f32 to vector<8x32xf32>
    %417 = arith.addf %416, %415 : vector<8x32xf32>
    %418 = arith.divf %416, %417 : vector<8x32xf32>
    %419 = vector.extract_strided_slice %399 {offsets = [0, 64], sizes = [8, 32], strides = [1, 1]} : vector<8x96xf32> to vector<8x32xf32>
    %420 = vector.extract_strided_slice %402 {offsets = [0, 64], sizes = [8, 32], strides = [1, 1]} : vector<8x96xf32> to vector<8x32xf32>
    %421 = arith.mulf %410, %420 : vector<8x32xf32>
    %422 = arith.addf %419, %421 : vector<8x32xf32>
    %423 = math.tanh %422 : vector<8x32xf32>
    %cst_78 = arith.constant 1.000000e+00 : f32
    %424 = vector.broadcast %cst_78 : f32 to vector<8x32xf32>
    %425 = arith.subf %424, %418 : vector<8x32xf32>
    %426 = arith.mulf %425, %423 : vector<8x32xf32>
    %427 = arith.mulf %418, %398 : vector<8x32xf32>
    %428 = arith.addf %426, %427 : vector<8x32xf32>
    %429 = vector.extract_strided_slice %305 {offsets = [32, 0], sizes = [8, 96], strides = [1, 1]} : vector<64x96xf32> to vector<8x96xf32>
    %cst_79 = arith.constant dense<0.000000e+00> : vector<8x96xf32>
    %430 = tpu.matmul %428, %306, %cst_79 {dimension_numbers = #tpu.dot_dimension_numbers<[1], [0], [0], [1], [0, 0, 1, 1], [], []>} : vector<8x32xf32>, vector<32x96xf32>, vector<8x96xf32> -> vector<8x96xf32>
    %431 = vector.broadcast %307 : vector<1x96xf32> to vector<8x96xf32>
    %432 = arith.addf %430, %431 : vector<8x96xf32>
    %433 = vector.extract_strided_slice %429 {offsets = [0, 0], sizes = [8, 32], strides = [1, 1]} : vector<8x96xf32> to vector<8x32xf32>
    %434 = vector.extract_strided_slice %432 {offsets = [0, 0], sizes = [8, 32], strides = [1, 1]} : vector<8x96xf32> to vector<8x32xf32>
    %435 = arith.addf %433, %434 : vector<8x32xf32>
    %436 = arith.negf %435 : vector<8x32xf32>
    %437 = math.exp %436 : vector<8x32xf32>
    %cst_80 = arith.constant 1.000000e+00 : f32
    %438 = vector.broadcast %cst_80 : f32 to vector<8x32xf32>
    %439 = arith.addf %438, %437 : vector<8x32xf32>
    %440 = arith.divf %438, %439 : vector<8x32xf32>
    %441 = vector.extract_strided_slice %429 {offsets = [0, 32], sizes = [8, 32], strides = [1, 1]} : vector<8x96xf32> to vector<8x32xf32>
    %442 = vector.extract_strided_slice %432 {offsets = [0, 32], sizes = [8, 32], strides = [1, 1]} : vector<8x96xf32> to vector<8x32xf32>
    %443 = arith.addf %441, %442 : vector<8x32xf32>
    %444 = arith.negf %443 : vector<8x32xf32>
    %445 = math.exp %444 : vector<8x32xf32>
    %cst_81 = arith.constant 1.000000e+00 : f32
    %446 = vector.broadcast %cst_81 : f32 to vector<8x32xf32>
    %447 = arith.addf %446, %445 : vector<8x32xf32>
    %448 = arith.divf %446, %447 : vector<8x32xf32>
    %449 = vector.extract_strided_slice %429 {offsets = [0, 64], sizes = [8, 32], strides = [1, 1]} : vector<8x96xf32> to vector<8x32xf32>
    %450 = vector.extract_strided_slice %432 {offsets = [0, 64], sizes = [8, 32], strides = [1, 1]} : vector<8x96xf32> to vector<8x32xf32>
    %451 = arith.mulf %440, %450 : vector<8x32xf32>
    %452 = arith.addf %449, %451 : vector<8x32xf32>
    %453 = math.tanh %452 : vector<8x32xf32>
    %cst_82 = arith.constant 1.000000e+00 : f32
    %454 = vector.broadcast %cst_82 : f32 to vector<8x32xf32>
    %455 = arith.subf %454, %448 : vector<8x32xf32>
    %456 = arith.mulf %455, %453 : vector<8x32xf32>
    %457 = arith.mulf %448, %428 : vector<8x32xf32>
    %458 = arith.addf %456, %457 : vector<8x32xf32>
    %459 = vector.extract_strided_slice %305 {offsets = [40, 0], sizes = [8, 96], strides = [1, 1]} : vector<64x96xf32> to vector<8x96xf32>
    %cst_83 = arith.constant dense<0.000000e+00> : vector<8x96xf32>
    %460 = tpu.matmul %458, %306, %cst_83 {dimension_numbers = #tpu.dot_dimension_numbers<[1], [0], [0], [1], [0, 0, 1, 1], [], []>} : vector<8x32xf32>, vector<32x96xf32>, vector<8x96xf32> -> vector<8x96xf32>
    %461 = vector.broadcast %307 : vector<1x96xf32> to vector<8x96xf32>
    %462 = arith.addf %460, %461 : vector<8x96xf32>
    %463 = vector.extract_strided_slice %459 {offsets = [0, 0], sizes = [8, 32], strides = [1, 1]} : vector<8x96xf32> to vector<8x32xf32>
    %464 = vector.extract_strided_slice %462 {offsets = [0, 0], sizes = [8, 32], strides = [1, 1]} : vector<8x96xf32> to vector<8x32xf32>
    %465 = arith.addf %463, %464 : vector<8x32xf32>
    %466 = arith.negf %465 : vector<8x32xf32>
    %467 = math.exp %466 : vector<8x32xf32>
    %cst_84 = arith.constant 1.000000e+00 : f32
    %468 = vector.broadcast %cst_84 : f32 to vector<8x32xf32>
    %469 = arith.addf %468, %467 : vector<8x32xf32>
    %470 = arith.divf %468, %469 : vector<8x32xf32>
    %471 = vector.extract_strided_slice %459 {offsets = [0, 32], sizes = [8, 32], strides = [1, 1]} : vector<8x96xf32> to vector<8x32xf32>
    %472 = vector.extract_strided_slice %462 {offsets = [0, 32], sizes = [8, 32], strides = [1, 1]} : vector<8x96xf32> to vector<8x32xf32>
    %473 = arith.addf %471, %472 : vector<8x32xf32>
    %474 = arith.negf %473 : vector<8x32xf32>
    %475 = math.exp %474 : vector<8x32xf32>
    %cst_85 = arith.constant 1.000000e+00 : f32
    %476 = vector.broadcast %cst_85 : f32 to vector<8x32xf32>
    %477 = arith.addf %476, %475 : vector<8x32xf32>
    %478 = arith.divf %476, %477 : vector<8x32xf32>
    %479 = vector.extract_strided_slice %459 {offsets = [0, 64], sizes = [8, 32], strides = [1, 1]} : vector<8x96xf32> to vector<8x32xf32>
    %480 = vector.extract_strided_slice %462 {offsets = [0, 64], sizes = [8, 32], strides = [1, 1]} : vector<8x96xf32> to vector<8x32xf32>
    %481 = arith.mulf %470, %480 : vector<8x32xf32>
    %482 = arith.addf %479, %481 : vector<8x32xf32>
    %483 = math.tanh %482 : vector<8x32xf32>
    %cst_86 = arith.constant 1.000000e+00 : f32
    %484 = vector.broadcast %cst_86 : f32 to vector<8x32xf32>
    %485 = arith.subf %484, %478 : vector<8x32xf32>
    %486 = arith.mulf %485, %483 : vector<8x32xf32>
    %487 = arith.mulf %478, %458 : vector<8x32xf32>
    %488 = arith.addf %486, %487 : vector<8x32xf32>
    %489 = vector.extract_strided_slice %305 {offsets = [48, 0], sizes = [8, 96], strides = [1, 1]} : vector<64x96xf32> to vector<8x96xf32>
    %cst_87 = arith.constant dense<0.000000e+00> : vector<8x96xf32>
    %490 = tpu.matmul %488, %306, %cst_87 {dimension_numbers = #tpu.dot_dimension_numbers<[1], [0], [0], [1], [0, 0, 1, 1], [], []>} : vector<8x32xf32>, vector<32x96xf32>, vector<8x96xf32> -> vector<8x96xf32>
    %491 = vector.broadcast %307 : vector<1x96xf32> to vector<8x96xf32>
    %492 = arith.addf %490, %491 : vector<8x96xf32>
    %493 = vector.extract_strided_slice %489 {offsets = [0, 0], sizes = [8, 32], strides = [1, 1]} : vector<8x96xf32> to vector<8x32xf32>
    %494 = vector.extract_strided_slice %492 {offsets = [0, 0], sizes = [8, 32], strides = [1, 1]} : vector<8x96xf32> to vector<8x32xf32>
    %495 = arith.addf %493, %494 : vector<8x32xf32>
    %496 = arith.negf %495 : vector<8x32xf32>
    %497 = math.exp %496 : vector<8x32xf32>
    %cst_88 = arith.constant 1.000000e+00 : f32
    %498 = vector.broadcast %cst_88 : f32 to vector<8x32xf32>
    %499 = arith.addf %498, %497 : vector<8x32xf32>
    %500 = arith.divf %498, %499 : vector<8x32xf32>
    %501 = vector.extract_strided_slice %489 {offsets = [0, 32], sizes = [8, 32], strides = [1, 1]} : vector<8x96xf32> to vector<8x32xf32>
    %502 = vector.extract_strided_slice %492 {offsets = [0, 32], sizes = [8, 32], strides = [1, 1]} : vector<8x96xf32> to vector<8x32xf32>
    %503 = arith.addf %501, %502 : vector<8x32xf32>
    %504 = arith.negf %503 : vector<8x32xf32>
    %505 = math.exp %504 : vector<8x32xf32>
    %cst_89 = arith.constant 1.000000e+00 : f32
    %506 = vector.broadcast %cst_89 : f32 to vector<8x32xf32>
    %507 = arith.addf %506, %505 : vector<8x32xf32>
    %508 = arith.divf %506, %507 : vector<8x32xf32>
    %509 = vector.extract_strided_slice %489 {offsets = [0, 64], sizes = [8, 32], strides = [1, 1]} : vector<8x96xf32> to vector<8x32xf32>
    %510 = vector.extract_strided_slice %492 {offsets = [0, 64], sizes = [8, 32], strides = [1, 1]} : vector<8x96xf32> to vector<8x32xf32>
    %511 = arith.mulf %500, %510 : vector<8x32xf32>
    %512 = arith.addf %509, %511 : vector<8x32xf32>
    %513 = math.tanh %512 : vector<8x32xf32>
    %cst_90 = arith.constant 1.000000e+00 : f32
    %514 = vector.broadcast %cst_90 : f32 to vector<8x32xf32>
    %515 = arith.subf %514, %508 : vector<8x32xf32>
    %516 = arith.mulf %515, %513 : vector<8x32xf32>
    %517 = arith.mulf %508, %488 : vector<8x32xf32>
    %518 = arith.addf %516, %517 : vector<8x32xf32>
    %519 = vector.extract_strided_slice %305 {offsets = [56, 0], sizes = [8, 96], strides = [1, 1]} : vector<64x96xf32> to vector<8x96xf32>
    %cst_91 = arith.constant dense<0.000000e+00> : vector<8x96xf32>
    %520 = tpu.matmul %518, %306, %cst_91 {dimension_numbers = #tpu.dot_dimension_numbers<[1], [0], [0], [1], [0, 0, 1, 1], [], []>} : vector<8x32xf32>, vector<32x96xf32>, vector<8x96xf32> -> vector<8x96xf32>
    %521 = vector.broadcast %307 : vector<1x96xf32> to vector<8x96xf32>
    %522 = arith.addf %520, %521 : vector<8x96xf32>
    %523 = vector.extract_strided_slice %519 {offsets = [0, 0], sizes = [8, 32], strides = [1, 1]} : vector<8x96xf32> to vector<8x32xf32>
    %524 = vector.extract_strided_slice %522 {offsets = [0, 0], sizes = [8, 32], strides = [1, 1]} : vector<8x96xf32> to vector<8x32xf32>
    %525 = arith.addf %523, %524 : vector<8x32xf32>
    %526 = arith.negf %525 : vector<8x32xf32>
    %527 = math.exp %526 : vector<8x32xf32>
    %cst_92 = arith.constant 1.000000e+00 : f32
    %528 = vector.broadcast %cst_92 : f32 to vector<8x32xf32>
    %529 = arith.addf %528, %527 : vector<8x32xf32>
    %530 = arith.divf %528, %529 : vector<8x32xf32>
    %531 = vector.extract_strided_slice %519 {offsets = [0, 32], sizes = [8, 32], strides = [1, 1]} : vector<8x96xf32> to vector<8x32xf32>
    %532 = vector.extract_strided_slice %522 {offsets = [0, 32], sizes = [8, 32], strides = [1, 1]} : vector<8x96xf32> to vector<8x32xf32>
    %533 = arith.addf %531, %532 : vector<8x32xf32>
    %534 = arith.negf %533 : vector<8x32xf32>
    %535 = math.exp %534 : vector<8x32xf32>
    %cst_93 = arith.constant 1.000000e+00 : f32
    %536 = vector.broadcast %cst_93 : f32 to vector<8x32xf32>
    %537 = arith.addf %536, %535 : vector<8x32xf32>
    %538 = arith.divf %536, %537 : vector<8x32xf32>
    %539 = vector.extract_strided_slice %519 {offsets = [0, 64], sizes = [8, 32], strides = [1, 1]} : vector<8x96xf32> to vector<8x32xf32>
    %540 = vector.extract_strided_slice %522 {offsets = [0, 64], sizes = [8, 32], strides = [1, 1]} : vector<8x96xf32> to vector<8x32xf32>
    %541 = arith.mulf %530, %540 : vector<8x32xf32>
    %542 = arith.addf %539, %541 : vector<8x32xf32>
    %543 = math.tanh %542 : vector<8x32xf32>
    %cst_94 = arith.constant 1.000000e+00 : f32
    %544 = vector.broadcast %cst_94 : f32 to vector<8x32xf32>
    %545 = arith.subf %544, %538 : vector<8x32xf32>
    %546 = arith.mulf %545, %543 : vector<8x32xf32>
    %547 = arith.mulf %538, %518 : vector<8x32xf32>
    %548 = arith.addf %546, %547 : vector<8x32xf32>
    %c0_95 = arith.constant 0 : index
    %c0_96 = arith.constant 0 : index
    %549 = vector.load %arg13[%c0_95, %c0_96] : memref<32x32xf32, #tpu.memory_space<vmem>>, vector<32x32xf32>
    %cst_97 = arith.constant dense<0.000000e+00> : vector<8x32xf32>
    %550 = tpu.matmul %548, %549, %cst_97 {dimension_numbers = #tpu.dot_dimension_numbers<[1], [0], [0], [1], [0, 0, 1, 1], [], []>} : vector<8x32xf32>, vector<32x32xf32>, vector<8x32xf32> -> vector<8x32xf32>
    %c0_98 = arith.constant 0 : index
    %c0_99 = arith.constant 0 : index
    %551 = vector.load %arg14[%c0_98, %c0_99] : memref<1x32xf32, #tpu.memory_space<vmem>>, vector<1x32xf32>
    %552 = vector.broadcast %551 : vector<1x32xf32> to vector<8x32xf32>
    %553 = arith.addf %550, %552 : vector<8x32xf32>
    %c0_100 = arith.constant 0 : index
    %c0_101 = arith.constant 0 : index
    %554 = vector.load %arg12[%c0_100, %c0_101] : memref<32x32xf32, #tpu.memory_space<vmem>>, vector<32x32xf32>
    %c0_i32 = arith.constant 0 : i32
    %c3_i32 = arith.constant 3 : i32
    %555 = arith.addi %c0_i32, %c3_i32 : i32
    %c1_i32 = arith.constant 1 : i32
    %556 = scf.for %arg24 = %c0_i32 to %555 step %c1_i32 iter_args(%arg25 = %548) -> (vector<8x32xf32>)  : i32 {
      %cst_143 = arith.constant dense<0.000000e+00> : vector<8x32xf32>
      %700 = tpu.matmul %arg25, %554, %cst_143 {dimension_numbers = #tpu.dot_dimension_numbers<[1], [0], [0], [1], [0, 0, 1, 1], [], []>} : vector<8x32xf32>, vector<32x32xf32>, vector<8x32xf32> -> vector<8x32xf32>
      %701 = arith.addf %700, %553 : vector<8x32xf32>
      %cst_144 = arith.constant 0.000000e+00 : f32
      %702 = vector.broadcast %cst_144 : f32 to vector<8x32xf32>
      %703 = arith.maximumf %701, %702 : vector<8x32xf32>
      scf.yield %703 : vector<8x32xf32>
    }
    %557 = vector.extract_strided_slice %0 {offsets = [2, 0], sizes = [1, 32], strides = [1, 1]} : vector<32x32xf32> to vector<1x32xf32>
    %c0_102 = arith.constant 0 : index
    %c0_103 = arith.constant 0 : index
    %558 = vector.load %arg15[%c0_102, %c0_103] : memref<32x96xf32, #tpu.memory_space<vmem>>, vector<32x96xf32>
    %cst_104 = arith.constant dense<0.000000e+00> : vector<1x96xf32>
    %559 = tpu.matmul %557, %558, %cst_104 {dimension_numbers = #tpu.dot_dimension_numbers<[1], [0], [0], [1], [0, 0, 1, 1], [], []>} : vector<1x32xf32>, vector<32x96xf32>, vector<1x96xf32> -> vector<1x96xf32>
    %c0_105 = arith.constant 0 : index
    %c0_106 = arith.constant 0 : index
    %560 = vector.load %arg16[%c0_105, %c0_106] : memref<32x96xf32, #tpu.memory_space<vmem>>, vector<32x96xf32>
    %cst_107 = arith.constant dense<0.000000e+00> : vector<8x96xf32>
    %561 = tpu.matmul %548, %560, %cst_107 {dimension_numbers = #tpu.dot_dimension_numbers<[1], [0], [0], [1], [0, 0, 1, 1], [], []>} : vector<8x32xf32>, vector<32x96xf32>, vector<8x96xf32> -> vector<8x96xf32>
    %562 = vector.broadcast %559 : vector<1x96xf32> to vector<8x96xf32>
    %563 = arith.addf %562, %561 : vector<8x96xf32>
    %c0_108 = arith.constant 0 : index
    %c0_109 = arith.constant 0 : index
    %564 = vector.load %arg18[%c0_108, %c0_109] : memref<1x96xf32, #tpu.memory_space<vmem>>, vector<1x96xf32>
    %565 = vector.broadcast %564 : vector<1x96xf32> to vector<8x96xf32>
    %566 = arith.addf %563, %565 : vector<8x96xf32>
    %c0_110 = arith.constant 0 : index
    %c0_111 = arith.constant 0 : index
    %567 = vector.load %arg17[%c0_110, %c0_111] : memref<32x96xf32, #tpu.memory_space<vmem>>, vector<32x96xf32>
    %c0_112 = arith.constant 0 : index
    %c0_113 = arith.constant 0 : index
    %568 = vector.load %arg19[%c0_112, %c0_113] : memref<1x96xf32, #tpu.memory_space<vmem>>, vector<1x96xf32>
    %c0_114 = arith.constant 0 : index
    %c0_115 = arith.constant 0 : index
    %569 = vector.load %arg20[%c0_114, %c0_115] : memref<32x32xf32, #tpu.memory_space<vmem>>, vector<32x32xf32>
    %c0_116 = arith.constant 0 : index
    %c0_117 = arith.constant 0 : index
    %570 = vector.load %arg21[%c0_116, %c0_117] : memref<1x32xf32, #tpu.memory_space<vmem>>, vector<1x32xf32>
    %cst_118 = arith.constant dense<0.000000e+00> : vector<8x96xf32>
    %571 = tpu.matmul %556, %567, %cst_118 {dimension_numbers = #tpu.dot_dimension_numbers<[1], [0], [0], [1], [0, 0, 1, 1], [], []>} : vector<8x32xf32>, vector<32x96xf32>, vector<8x96xf32> -> vector<8x96xf32>
    %572 = vector.broadcast %568 : vector<1x96xf32> to vector<8x96xf32>
    %573 = arith.addf %571, %572 : vector<8x96xf32>
    %574 = vector.extract_strided_slice %566 {offsets = [0, 0], sizes = [8, 32], strides = [1, 1]} : vector<8x96xf32> to vector<8x32xf32>
    %575 = vector.extract_strided_slice %573 {offsets = [0, 0], sizes = [8, 32], strides = [1, 1]} : vector<8x96xf32> to vector<8x32xf32>
    %576 = arith.addf %574, %575 : vector<8x32xf32>
    %577 = arith.negf %576 : vector<8x32xf32>
    %578 = math.exp %577 : vector<8x32xf32>
    %cst_119 = arith.constant 1.000000e+00 : f32
    %579 = vector.broadcast %cst_119 : f32 to vector<8x32xf32>
    %580 = arith.addf %579, %578 : vector<8x32xf32>
    %581 = arith.divf %579, %580 : vector<8x32xf32>
    %582 = vector.extract_strided_slice %566 {offsets = [0, 32], sizes = [8, 32], strides = [1, 1]} : vector<8x96xf32> to vector<8x32xf32>
    %583 = vector.extract_strided_slice %573 {offsets = [0, 32], sizes = [8, 32], strides = [1, 1]} : vector<8x96xf32> to vector<8x32xf32>
    %584 = arith.addf %582, %583 : vector<8x32xf32>
    %585 = arith.negf %584 : vector<8x32xf32>
    %586 = math.exp %585 : vector<8x32xf32>
    %cst_120 = arith.constant 1.000000e+00 : f32
    %587 = vector.broadcast %cst_120 : f32 to vector<8x32xf32>
    %588 = arith.addf %587, %586 : vector<8x32xf32>
    %589 = arith.divf %587, %588 : vector<8x32xf32>
    %590 = vector.extract_strided_slice %566 {offsets = [0, 64], sizes = [8, 32], strides = [1, 1]} : vector<8x96xf32> to vector<8x32xf32>
    %591 = vector.extract_strided_slice %573 {offsets = [0, 64], sizes = [8, 32], strides = [1, 1]} : vector<8x96xf32> to vector<8x32xf32>
    %592 = arith.mulf %581, %591 : vector<8x32xf32>
    %593 = arith.addf %590, %592 : vector<8x32xf32>
    %594 = math.tanh %593 : vector<8x32xf32>
    %cst_121 = arith.constant 1.000000e+00 : f32
    %595 = vector.broadcast %cst_121 : f32 to vector<8x32xf32>
    %596 = arith.subf %595, %589 : vector<8x32xf32>
    %597 = arith.mulf %596, %594 : vector<8x32xf32>
    %598 = arith.mulf %589, %556 : vector<8x32xf32>
    %599 = arith.addf %597, %598 : vector<8x32xf32>
    %cst_122 = arith.constant dense<0.000000e+00> : vector<8x32xf32>
    %600 = tpu.matmul %599, %569, %cst_122 {dimension_numbers = #tpu.dot_dimension_numbers<[1], [0], [0], [1], [0, 0, 1, 1], [], []>} : vector<8x32xf32>, vector<32x32xf32>, vector<8x32xf32> -> vector<8x32xf32>
    %601 = vector.broadcast %570 : vector<1x32xf32> to vector<8x32xf32>
    %602 = arith.addf %600, %601 : vector<8x32xf32>
    %cst_123 = arith.constant dense<0xFF800000> : vector<8xf32>
    %603 = vector.multi_reduction <maximumf>, %602, %cst_123 [1] : vector<8x32xf32> to vector<8xf32>
    %604 = vector.shape_cast %603 : vector<8xf32> to vector<8x1xf32>
    %605 = vector.broadcast %604 : vector<8x1xf32> to vector<8x32xf32>
    %606 = arith.subf %602, %605 : vector<8x32xf32>
    %607 = math.exp %606 : vector<8x32xf32>
    %cst_124 = arith.constant dense<0.000000e+00> : vector<8xf32>
    %608 = vector.multi_reduction <add>, %607, %cst_124 [1] : vector<8x32xf32> to vector<8xf32>
    %609 = vector.shape_cast %608 : vector<8xf32> to vector<8x1xf32>
    %610 = math.log %609 : vector<8x1xf32>
    %611 = vector.broadcast %610 : vector<8x1xf32> to vector<8x32xf32>
    %612 = arith.subf %606, %611 : vector<8x32xf32>
    %c0_125 = arith.constant 0 : index
    %c0_126 = arith.constant 0 : index
    %613 = vector.load %arg22[%c0_125, %c0_126] : memref<8x96xf32, #tpu.memory_space<vmem>>, vector<8x32xf32>
    tpu.vector_store %arg22[%c0_125, %c0_126], %612 {strides = array<i32>} : memref<8x96xf32, #tpu.memory_space<vmem>>, vector<8x32xf32>,
    %cst_127 = arith.constant dense<0.000000e+00> : vector<8x96xf32>
    %614 = tpu.matmul %599, %567, %cst_127 {dimension_numbers = #tpu.dot_dimension_numbers<[1], [0], [0], [1], [0, 0, 1, 1], [], []>} : vector<8x32xf32>, vector<32x96xf32>, vector<8x96xf32> -> vector<8x96xf32>
    %615 = vector.broadcast %568 : vector<1x96xf32> to vector<8x96xf32>
    %616 = arith.addf %614, %615 : vector<8x96xf32>
    %617 = vector.extract_strided_slice %566 {offsets = [0, 0], sizes = [8, 32], strides = [1, 1]} : vector<8x96xf32> to vector<8x32xf32>
    %618 = vector.extract_strided_slice %616 {offsets = [0, 0], sizes = [8, 32], strides = [1, 1]} : vector<8x96xf32> to vector<8x32xf32>
    %619 = arith.addf %617, %618 : vector<8x32xf32>
    %620 = arith.negf %619 : vector<8x32xf32>
    %621 = math.exp %620 : vector<8x32xf32>
    %cst_128 = arith.constant 1.000000e+00 : f32
    %622 = vector.broadcast %cst_128 : f32 to vector<8x32xf32>
    %623 = arith.addf %622, %621 : vector<8x32xf32>
    %624 = arith.divf %622, %623 : vector<8x32xf32>
    %625 = vector.extract_strided_slice %566 {offsets = [0, 32], sizes = [8, 32], strides = [1, 1]} : vector<8x96xf32> to vector<8x32xf32>
    %626 = vector.extract_strided_slice %616 {offsets = [0, 32], sizes = [8, 32], strides = [1, 1]} : vector<8x96xf32> to vector<8x32xf32>
    %627 = arith.addf %625, %626 : vector<8x32xf32>
    %628 = arith.negf %627 : vector<8x32xf32>
    %629 = math.exp %628 : vector<8x32xf32>
    %cst_129 = arith.constant 1.000000e+00 : f32
    %630 = vector.broadcast %cst_129 : f32 to vector<8x32xf32>
    %631 = arith.addf %630, %629 : vector<8x32xf32>
    %632 = arith.divf %630, %631 : vector<8x32xf32>
    %633 = vector.extract_strided_slice %566 {offsets = [0, 64], sizes = [8, 32], strides = [1, 1]} : vector<8x96xf32> to vector<8x32xf32>
    %634 = vector.extract_strided_slice %616 {offsets = [0, 64], sizes = [8, 32], strides = [1, 1]} : vector<8x96xf32> to vector<8x32xf32>
    %635 = arith.mulf %624, %634 : vector<8x32xf32>
    %636 = arith.addf %633, %635 : vector<8x32xf32>
    %637 = math.tanh %636 : vector<8x32xf32>
    %cst_130 = arith.constant 1.000000e+00 : f32
    %638 = vector.broadcast %cst_130 : f32 to vector<8x32xf32>
    %639 = arith.subf %638, %632 : vector<8x32xf32>
    %640 = arith.mulf %639, %637 : vector<8x32xf32>
    %641 = arith.mulf %632, %599 : vector<8x32xf32>
    %642 = arith.addf %640, %641 : vector<8x32xf32>
    %cst_131 = arith.constant dense<0.000000e+00> : vector<8x32xf32>
    %643 = tpu.matmul %642, %569, %cst_131 {dimension_numbers = #tpu.dot_dimension_numbers<[1], [0], [0], [1], [0, 0, 1, 1], [], []>} : vector<8x32xf32>, vector<32x32xf32>, vector<8x32xf32> -> vector<8x32xf32>
    %644 = vector.broadcast %570 : vector<1x32xf32> to vector<8x32xf32>
    %645 = arith.addf %643, %644 : vector<8x32xf32>
    %cst_132 = arith.constant dense<0xFF800000> : vector<8xf32>
    %646 = vector.multi_reduction <maximumf>, %645, %cst_132 [1] : vector<8x32xf32> to vector<8xf32>
    %647 = vector.shape_cast %646 : vector<8xf32> to vector<8x1xf32>
    %648 = vector.broadcast %647 : vector<8x1xf32> to vector<8x32xf32>
    %649 = arith.subf %645, %648 : vector<8x32xf32>
    %650 = math.exp %649 : vector<8x32xf32>
    %cst_133 = arith.constant dense<0.000000e+00> : vector<8xf32>
    %651 = vector.multi_reduction <add>, %650, %cst_133 [1] : vector<8x32xf32> to vector<8xf32>
    %652 = vector.shape_cast %651 : vector<8xf32> to vector<8x1xf32>
    %653 = math.log %652 : vector<8x1xf32>
    %654 = vector.broadcast %653 : vector<8x1xf32> to vector<8x32xf32>
    %655 = arith.subf %649, %654 : vector<8x32xf32>
    %c0_134 = arith.constant 0 : index
    %c32 = arith.constant 32 : index
    %656 = vector.load %arg22[%c0_134, %c32] : memref<8x96xf32, #tpu.memory_space<vmem>>, vector<8x32xf32>
    tpu.vector_store %arg22[%c0_134, %c32], %655 {strides = array<i32>} : memref<8x96xf32, #tpu.memory_space<vmem>>, vector<8x32xf32>,
    %cst_135 = arith.constant dense<0.000000e+00> : vector<8x96xf32>
    %657 = tpu.matmul %642, %567, %cst_135 {dimension_numbers = #tpu.dot_dimension_numbers<[1], [0], [0], [1], [0, 0, 1, 1], [], []>} : vector<8x32xf32>, vector<32x96xf32>, vector<8x96xf32> -> vector<8x96xf32>
    %658 = vector.broadcast %568 : vector<1x96xf32> to vector<8x96xf32>
    %659 = arith.addf %657, %658 : vector<8x96xf32>
    %660 = vector.extract_strided_slice %566 {offsets = [0, 0], sizes = [8, 32], strides = [1, 1]} : vector<8x96xf32> to vector<8x32xf32>
    %661 = vector.extract_strided_slice %659 {offsets = [0, 0], sizes = [8, 32], strides = [1, 1]} : vector<8x96xf32> to vector<8x32xf32>
    %662 = arith.addf %660, %661 : vector<8x32xf32>
    %663 = arith.negf %662 : vector<8x32xf32>
    %664 = math.exp %663 : vector<8x32xf32>
    %cst_136 = arith.constant 1.000000e+00 : f32
    %665 = vector.broadcast %cst_136 : f32 to vector<8x32xf32>
    %666 = arith.addf %665, %664 : vector<8x32xf32>
    %667 = arith.divf %665, %666 : vector<8x32xf32>
    %668 = vector.extract_strided_slice %566 {offsets = [0, 32], sizes = [8, 32], strides = [1, 1]} : vector<8x96xf32> to vector<8x32xf32>
    %669 = vector.extract_strided_slice %659 {offsets = [0, 32], sizes = [8, 32], strides = [1, 1]} : vector<8x96xf32> to vector<8x32xf32>
    %670 = arith.addf %668, %669 : vector<8x32xf32>
    %671 = arith.negf %670 : vector<8x32xf32>
    %672 = math.exp %671 : vector<8x32xf32>
    %cst_137 = arith.constant 1.000000e+00 : f32
    %673 = vector.broadcast %cst_137 : f32 to vector<8x32xf32>
    %674 = arith.addf %673, %672 : vector<8x32xf32>
    %675 = arith.divf %673, %674 : vector<8x32xf32>
    %676 = vector.extract_strided_slice %566 {offsets = [0, 64], sizes = [8, 32], strides = [1, 1]} : vector<8x96xf32> to vector<8x32xf32>
    %677 = vector.extract_strided_slice %659 {offsets = [0, 64], sizes = [8, 32], strides = [1, 1]} : vector<8x96xf32> to vector<8x32xf32>
    %678 = arith.mulf %667, %677 : vector<8x32xf32>
    %679 = arith.addf %676, %678 : vector<8x32xf32>
    %680 = math.tanh %679 : vector<8x32xf32>
    %cst_138 = arith.constant 1.000000e+00 : f32
    %681 = vector.broadcast %cst_138 : f32 to vector<8x32xf32>
    %682 = arith.subf %681, %675 : vector<8x32xf32>
    %683 = arith.mulf %682, %680 : vector<8x32xf32>
    %684 = arith.mulf %675, %642 : vector<8x32xf32>
    %685 = arith.addf %683, %684 : vector<8x32xf32>
    %cst_139 = arith.constant dense<0.000000e+00> : vector<8x32xf32>
    %686 = tpu.matmul %685, %569, %cst_139 {dimension_numbers = #tpu.dot_dimension_numbers<[1], [0], [0], [1], [0, 0, 1, 1], [], []>} : vector<8x32xf32>, vector<32x32xf32>, vector<8x32xf32> -> vector<8x32xf32>
    %687 = vector.broadcast %570 : vector<1x32xf32> to vector<8x32xf32>
    %688 = arith.addf %686, %687 : vector<8x32xf32>
    %cst_140 = arith.constant dense<0xFF800000> : vector<8xf32>
    %689 = vector.multi_reduction <maximumf>, %688, %cst_140 [1] : vector<8x32xf32> to vector<8xf32>
    %690 = vector.shape_cast %689 : vector<8xf32> to vector<8x1xf32>
    %691 = vector.broadcast %690 : vector<8x1xf32> to vector<8x32xf32>
    %692 = arith.subf %688, %691 : vector<8x32xf32>
    %693 = math.exp %692 : vector<8x32xf32>
    %cst_141 = arith.constant dense<0.000000e+00> : vector<8xf32>
    %694 = vector.multi_reduction <add>, %693, %cst_141 [1] : vector<8x32xf32> to vector<8xf32>
    %695 = vector.shape_cast %694 : vector<8xf32> to vector<8x1xf32>
    %696 = math.log %695 : vector<8x1xf32>
    %697 = vector.broadcast %696 : vector<8x1xf32> to vector<8x32xf32>
    %698 = arith.subf %692, %697 : vector<8x32xf32>
    %c0_142 = arith.constant 0 : index
    %c64 = arith.constant 64 : index
    %699 = vector.load %arg22[%c0_142, %c64] : memref<8x96xf32, #tpu.memory_space<vmem>>, vector<8x32xf32>
    tpu.vector_store %arg22[%c0_142, %c64], %698 {strides = array<i32>} : memref<8x96xf32, #tpu.memory_space<vmem>>, vector<8x32xf32>,
    return
  }
}

</mosaic_0001>

<bundles_post_ra>
// kernel: dmn_forward.1
= control target key start
LH: loop header
LB: loop body
LE: loop exit
PB: predicated region body
PF: predicated region fallthrough
CT: control target
= control target key end

     0   :  { %s7889_s0 = inlined_call_operand.vmem [shape: s32[256,1], index: 0, kind: input, shape index: {}]   ;;  %s7890_s1 = inlined_call_operand.vmem [shape: s32[64,1], index: 1, kind: input, shape index: {}]   ;;  %s7891_s2 = inlined_call_operand.vmem [shape: f32[32,32], index: 2, kind: input, shape index: {}]   ;;  %s7892_s3 = inlined_call_operand.vmem [shape: f32[8,32], index: 3, kind: input, shape index: {}]   ;;  %s7893_s4 = inlined_call_operand.vmem [shape: f32[32,96], index: 4, kind: input, shape index: {}]   ;;  %s7894_s5 = inlined_call_operand.vmem [shape: f32[32,96], index: 5, kind: input, shape index: {}]   ;;  %s7895_s6 = inlined_call_operand.vmem [shape: f32[1,96], index: 6, kind: input, shape index: {}]   ;;  %s7896_s7 = inlined_call_operand.vmem [shape: f32[1,96], index: 7, kind: input, shape index: {}]   ;;  %s7897_s8 = inlined_call_operand.vmem [shape: f32[32,96], index: 8, kind: input, shape index: {}]   ;;  %s7898_s9 = inlined_call_operand.vmem [shape: f32[32,96], index: 9, kind: input, shape index: {}]   ;;  %s7899_s10 = inlined_call_operand.vmem [shape: f32[1,96], index: 10, kind: input, shape index: {}]   ;;  %s7900_s11 = inlined_call_operand.vmem [shape: f32[1,96], index: 11, kind: input, shape index: {}]   ;;  %s7901_s12 = inlined_call_operand.vmem [shape: f32[32,32], index: 12, kind: input, shape index: {}]   ;;  %s7902_s13 = inlined_call_operand.vmem [shape: f32[32,32], index: 13, kind: input, shape index: {}]   ;;  %s7903_s14 = inlined_call_operand.vmem [shape: f32[1,32], index: 14, kind: input, shape index: {}]   ;;  %s7904_s15 = inlined_call_operand.vmem [shape: f32[32,96], index: 15, kind: input, shape index: {}]   ;;  %s7905_s16 = inlined_call_operand.vmem [shape: f32[32,96], index: 16, kind: input, shape index: {}]   ;;  %s7906_s17 = inlined_call_operand.vmem [shape: f32[32,96], index: 17, kind: input, shape index: {}]   ;;  %s7907_s18 = inlined_call_operand.vmem [shape: f32[1,96], index: 18, kind: input, shape index: {}]   ;;  %s7908_s19 = inlined_call_operand.vmem [shape: f32[1,96], index: 19, kind: input, shape index: {}]   ;;  %s7909_s20 = inlined_call_operand.vmem [shape: f32[32,32], index: 20, kind: input, shape index: {}]   ;;  %s7910_s21 = inlined_call_operand.vmem [shape: f32[1,32], index: 21, kind: input, shape index: {}]   ;;  %s7911_s22 = inlined_call_operand.vmem [shape: f32[8,96], index: 22, kind: output, shape index: {0}]   ;;  %s7912_s23 = inlined_call_operand.hbm [shape: f32[16,32], index: 23, kind: output, shape index: {1}]  }
   0x1   :  { %7924 = sst [smem:[#allocation5_spill]] %s7889_s0 }
   0x2   :  { %7925 = sst [smem:[#allocation6_spill]] %s7890_s1 }
   0x3   :  { %7926 = sst [smem:[#allocation7_spill]] %s7891_s2 }
   0x4   :  { %7927 = sst [smem:[#allocation8_spill]] %s7892_s3 }
   0x5   :  { %7928 = sst [smem:[#allocation9_spill]] %s7893_s4 }
   0x6   :  { %7929 = sst [smem:[#allocation10_spill]] %s7894_s5 }
   0x7   :  { %7930 = sst [smem:[#allocation11_spill]] %s7895_s6 }
   0x8   :  { %7931 = sst [smem:[#allocation12_spill]] %s7896_s7 }
   0x9   :  { %s7932_s24 = sld [smem:[#allocation5_spill]]  ;;  %v6140_v2 = vmov 0  }
   0xa   :  { %5819 = vset.pattern.permute.xlu1 %v6140_v2  ;;  %5818 = vset.pattern.permute.xlu0 %v6140_v2 }
   0xf   :  { %v80_v0 = vld [vmem:[%s7932_s24 + $0x10] sm:$0xff]  ;;  %v78_v1 = vld [vmem:[%s7932_s24] sm:$0xff]  ;;  %v81_v3 = vld [vmem:[%s7932_s24 + $0x18] sm:$0xff] }
  0x10   :  { %119 = vperm.xlu1 %5819, %v80_v0   ;;  %113 = vperm.xlu0 %5818, %v78_v1   ;;  %v79_v4 = vld [vmem:[%s7932_s24 + $0x8] sm:$0xff]  ;;  %v82_v6 = vld [vmem:[%s7932_s24 + $0x20] sm:$0xff] }
  0x11   :  { %v83_v5 = vld [vmem:[%s7932_s24 + $0x28] sm:$0xff] }
  0x14   :  { %122 = vperm.xlu1 %5819, %v81_v3   ;;  %116 = vperm.xlu0 %5818, %v79_v4  }
  0x18   :  { %128 = vperm.xlu1 %5819, %v83_v5   ;;  %125 = vperm.xlu0 %5818, %v82_v6  }
  0x19   :  { %29 = vsyncpa [#allocation3], 0  ;;  %v85_v7 = vld [vmem:[%s7932_s24 + $0x38] sm:$0xff]  ;;  %v84_v8 = vld [vmem:[%s7932_s24 + $0x30] sm:$0xff]  ;;  %s7933_s1 = sld [smem:[#allocation7_spill]]  ;;  %v110_v40 = vlaneseq  ;;  %vm304_vm0 = vcmask 261120  }
  0x1a   :  { %v87_v12 = vld [vmem:[%s7932_s24 + $0x48] sm:$0xff]  ;;  %v86_v13 = vld [vmem:[%s7932_s24 + $0x40] sm:$0xff]  ;;  %v89_v15 = vld [vmem:[%s7932_s24 + $0x58] sm:$0xff]  ;;  %s7934_s26 = sld [smem:[#allocation10_spill]]  ;;  %v6141_v44 = vmov 0.0   ;;  %s6143_s2 = smov 96  }
  0x1b   :  { %v88_v16 = vld [vmem:[%s7932_s24 + $0x50] sm:$0xff]  ;;  %v91_v17 = vld [vmem:[%s7932_s24 + $0x68] sm:$0xff]  ;;  %v90_v18 = vld [vmem:[%s7932_s24 + $0x60] sm:$0xff]  ;;  %s7935_s3 = sld [smem:[#allocation9_spill]]  ;;  %v6396_v41 = vand.u32 127, %v110_v40 }
  0x1c   :  { %134 = vperm.xlu1 %5819, %v85_v7   ;;  %131 = vperm.xlu0 %5818, %v84_v8   ;;  %v93_v19 = vld [vmem:[%s7932_s24 + $0x78] sm:$0xff]  ;;  %v92_v20 = vld [vmem:[%s7932_s24 + $0x70] sm:$0xff]  ;;  %v95_v21 = vld [vmem:[%s7932_s24 + $0x88] sm:$0xff]  ;;  %s7936_s4 = sld [smem:[#allocation12_spill]] }
  0x1d   :  { %v94_v22 = vld [vmem:[%s7932_s24 + $0x80] sm:$0xff]  ;;  %v97_v23 = vld [vmem:[%s7932_s24 + $0x98] sm:$0xff]  ;;  %v96_v24 = vld [vmem:[%s7932_s24 + $0x90] sm:$0xff]  ;;  %s7937_s5 = sld [smem:[#allocation11_spill]] }
  0x1e   :  { %v99_v25 = vld [vmem:[%s7932_s24 + $0xa8] sm:$0xff]  ;;  %v98_v26 = vld [vmem:[%s7932_s24 + $0xa0] sm:$0xff]  ;;  %v101_v27 = vld [vmem:[%s7932_s24 + $0xb8] sm:$0xff]  ;;  %s7938_s7 = sld [smem:[#allocation8_spill]] }
  0x1f   :  { %v77_v9 = vld [vmem:[%s7933_s1 + $0x18] sm:$0xff]  ;;  %v76_v10 = vld [vmem:[%s7933_s1 + $0x10] sm:$0xff]  ;;  %v75_v11 = vld [vmem:[%s7933_s1 + $0x8] sm:$0xff]  ;;  %s7939_s25 = sld [smem:[#allocation6_spill]] }
  0x20   :  { %5329 = vmatprep.subr.mxu0 %v77_v9  ;;  %v6313_v14 = vld [vmem:[%s7933_s1] sm:$0xff]  ;;  %140 = vperm.xlu1 %5819, %v87_v12   ;;  %v100_v28 = vld [vmem:[%s7932_s24 + $0xb0] sm:$0xff]  ;;  %v103_v29 = vld [vmem:[%s7932_s24 + $0xc8] sm:$0xff] }
  0x21   :  { %5330 = vmatpush3.msra.mxu0 %v77_v9  ;;  %137 = vperm.xlu0 %5818, %v86_v13   ;;  %v102_v30 = vld [vmem:[%s7932_s24 + $0xc0] sm:$0xff]  ;;  %v105_v31 = vld [vmem:[%s7932_s24 + $0xd8] sm:$0xff]  ;;  %v104_v32 = vld [vmem:[%s7932_s24 + $0xd0] sm:$0xff] }
  0x22   :  { %5331 = vmatprep.subr.mxu0 %v76_v10  ;;  %v107_v33 = vld [vmem:[%s7932_s24 + $0xe8] sm:$0xff]  ;;  %v106_v34 = vld [vmem:[%s7932_s24 + $0xe0] sm:$0xff]  ;;  %v6380_v35 = vld [vmem:[%s7934_s26 + $0x18] sm:$0xff] }
  0x23   :  { %5332 = vmatpush3.msra.mxu0 %v76_v10  ;;  %v109_v36 = vld [vmem:[%s7932_s24 + $0xf8] sm:$0xff]  ;;  %v108_v37 = vld [vmem:[%s7932_s24 + $0xf0] sm:$0xff]  ;;  %v6417_v53 = vld [vmem:[%s7934_s26 + $0x8] sm:$0xff]  ;;  %s7921_s24 = smov 64  }
  0x24   :  { %5333 = vmatprep.subr.mxu0 %v75_v11  ;;  %146 = vperm.xlu1 %5819, %v89_v15   ;;  %v629_v38 = vld [vmem:[%s7935_s3 + $0x18] sm:$0xff]  ;;  %v628_v39 = vld [vmem:[%s7935_s3 + $0x10] sm:$0xff]  ;;  %v6427_v56 = vld [vmem:[%s7934_s26] sm:$0xff] }
  0x25   :  { %5334 = vmatpush3.msra.mxu0 %v75_v11  ;;  %143 = vperm.xlu0 %5818, %v88_v16   ;;  %v6408_v50 = vld [vmem:[%s7934_s26 + $0x10] sm:$0xff] }
  0x26   :  { %5335 = vmatprep.subr.mxu0 %v6313_v14  ;;  %5385 = vmatprep.subr.mxu1 %v629_v38 }
  0x27   :  { %5336 = vmatpush3.msra.mxu0 %v6313_v14  ;;  %5386 = vmatpush3.msra.mxu1 %v629_v38 }
  0x28   :  { %152 = vperm.xlu1 %5819, %v91_v17   ;;  %5441 = vmatprep.subr.mxu0 %v6380_v35 }
  0x29   :  { %149 = vperm.xlu0 %5818, %v90_v18   ;;  %5387 = vmatprep.subr.mxu1 %v628_v39 }
  0x2a   :  { %5388 = vmatpush3.msra.mxu1 %v628_v39 }
  0x2c   :  { %158 = vperm.xlu1 %5819, %v93_v19  }
  0x2d   :  { %155 = vperm.xlu0 %5818, %v92_v20  }
  0x30   :  { %164 = vperm.xlu1 %5819, %v95_v21  }
  0x31   :  { %161 = vperm.xlu0 %5818, %v94_v22  }
  0x34   :  { %170 = vperm.xlu1 %5819, %v97_v23  }
  0x35   :  { %167 = vperm.xlu0 %5818, %v96_v24  }
  0x38   :  { %176 = vperm.xlu1 %5819, %v99_v25  }
  0x39   :  { %173 = vperm.xlu0 %5818, %v98_v26  }
  0x3c   :  { %182 = vperm.xlu1 %5819, %v101_v27  }
  0x3d   :  { %179 = vperm.xlu0 %5818, %v100_v28  }
  0x40   :  { %188 = vperm.xlu1 %5819, %v103_v29  }
  0x41   :  { %185 = vperm.xlu0 %5818, %v102_v30  }
  0x44   :  { %194 = vperm.xlu1 %5819, %v105_v31  }
  0x45   :  { %191 = vperm.xlu0 %5818, %v104_v32  }
  0x48   :  { %200 = vperm.xlu1 %5819, %v107_v33  }
  0x49   :  { %197 = vperm.xlu0 %5818, %v106_v34  }
  0x4c   :  { %206 = vperm.xlu1 %5819, %v109_v36  }
  0x4d   :  { %203 = vperm.xlu0 %5818, %v108_v37  }
  0x8b   :  { %v120_v42 = vpop.permute.xlu1 %119  ;;  %v114_v43 = vpop.permute.xlu0 %113 }
  0x8c   :  { %vm208_vm1 = vcmp.eq.s32.totalorder %v6396_v41, %v114_v43  ;;  %vm210_vm2 = vcmp.eq.s32.totalorder %v6396_v41, %v120_v42 }
  0x8d   :  { %v4863_v45 = vsel %vm208_vm1, 1.0, %v6141_v44  ;;  %v4865_v48 = vsel %vm210_vm2, 1.0, %v6141_v44 }
  0x8e   :  { %5337 = vmatprep.mubr.msk.f32.mxu0 %vm304_vm0, %v4863_v45 }
  0x8f   :  { %v123_v46 = vpop.permute.xlu1 %122  ;;  %v117_v47 = vpop.permute.xlu0 %116 }
  0x90   :  { %vm209_vm3 = vcmp.eq.s32.totalorder %v6396_v41, %v117_v47  ;;  %vm211_vm4 = vcmp.eq.s32.totalorder %v6396_v41, %v123_v46 }
  0x91   :  { %v4864_v49 = vsel %vm209_vm3, 1.0, %v6141_v44  ;;  %v4866_v54 = vsel %vm211_vm4, 1.0, %v6141_v44 }
  0x92   :  { %5338 = vmatmul.mubr.msk.f32.vlgmr.msra.gmra.mxu0 %vm304_vm0, %v4864_v49 }
  0x93   :  { %v129_v51 = vpop.permute.xlu1 %128  ;;  %v126_v52 = vpop.permute.xlu0 %125  ;;  %5340 = vmatprep.mubr.msk.f32.mxu0 %vm304_vm0, %v4865_v48  ;;  %5442 = vmatpush3.msra.mxu0 %v6380_v35 }
  0x94   :  { %vm212_vm5 = vcmp.eq.s32.totalorder %v6396_v41, %v126_v52  ;;  %5443 = vmatprep.subr.mxu0 %v6408_v50  ;;  %vm213_vm6 = vcmp.eq.s32.totalorder %v6396_v41, %v129_v51  ;;  %v627_v52 = vld [vmem:[%s7935_s3 + $0x8] sm:$0xff] }
  0x95   :  { %v4867_v55 = vsel %vm212_vm5, 1.0, %v6141_v44  ;;  %5444 = vmatpush3.msra.mxu0 %v6408_v50  ;;  %v4868_v59 = vsel %vm213_vm6, 1.0, %v6141_v44  ;;  %5389 = vmatprep.subr.mxu1 %v627_v52 }
  0x96   :  { %5341 = vmatmul.mubr.msk.f32.gmra.mxu0 %vm304_vm0, %v4866_v54  ;;  %5445 = vmatprep.subr.mxu0 %v6417_v53  ;;  %v626_v54 = vld [vmem:[%s7935_s3] sm:$0xff] }
  0x97   :  { %v135_v57 = vpop.permute.xlu1 %134  ;;  %v132_v58 = vpop.permute.xlu0 %131  ;;  %5343 = vmatprep.mubr.msk.f32.mxu0 %vm304_vm0, %v4867_v55  ;;  %5446 = vmatpush3.msra.mxu0 %v6417_v53 }
  0x98   :  { %vm214_vm7 = vcmp.eq.s32.totalorder %v6396_v41, %v132_v58  ;;  %5447 = vmatprep.subr.mxu0 %v6427_v56  ;;  %vm215_vm8 = vcmp.eq.s32.totalorder %v6396_v41, %v135_v57  ;;  %5390 = vmatpush3.msra.mxu1 %v627_v52 }
  0x99   :  { %v4869_v60 = vsel %vm214_vm7, 1.0, %v6141_v44  ;;  %5448 = vmatpush3.msra.mxu0 %v6427_v56  ;;  %v4870_v63 = vsel %vm215_vm8, 1.0, %v6141_v44  ;;  %5391 = vmatprep.subr.mxu1 %v626_v54 }
  0x9a   :  { %5344 = vmatmul.mubr.msk.f32.gmra.mxu0 %vm304_vm0, %v4868_v59  ;;  %5469 = vmatprep.subr.mxu0 %v6380_v35 }
  0x9b   :  { %v141_v61 = vpop.permute.xlu1 %140  ;;  %5346 = vmatprep.mubr.msk.f32.mxu0 %vm304_vm0, %v4869_v60  ;;  %5392 = vmatpush3.msra.mxu1 %v626_v54 }
  0x9c   :  { %v138_v62 = vpop.permute.xlu0 %137  ;;  %vm217_vm10 = vcmp.eq.s32.totalorder %v6396_v41, %v141_v61  ;;  %5455 = vmatprep.subr.mxu1 %v6380_v35 }
  0x9d   :  { %vm216_vm9 = vcmp.eq.s32.totalorder %v6396_v41, %v138_v62  ;;  %v4872_v3 = vsel %vm217_vm10, 1.0, %v6141_v44 }
  0x9e   :  { %v4871_v0 = vsel %vm216_vm9, 1.0, %v6141_v44  ;;  %5347 = vmatmul.mubr.msk.f32.gmra.mxu0 %vm304_vm0, %v4870_v63 }
  0x9f   :  { %v147_v1 = vpop.permute.xlu1 %146  ;;  %5349 = vmatprep.mubr.msk.f32.mxu0 %vm304_vm0, %v4871_v0 }
  0xa0   :  { %v144_v2 = vpop.permute.xlu0 %143  ;;  %vm219_vm12 = vcmp.eq.s32.totalorder %v6396_v41, %v147_v1 }
  0xa1   :  { %vm218_vm11 = vcmp.eq.s32.totalorder %v6396_v41, %v144_v2  ;;  %v4874_v7 = vsel %vm219_vm12, 1.0, %v6141_v44 }
  0xa2   :  { %v4873_v4 = vsel %vm218_vm11, 1.0, %v6141_v44  ;;  %5350 = vmatmul.mubr.msk.f32.gmra.mxu0 %vm304_vm0, %v4872_v3 }
  0xa3   :  { %v153_v5 = vpop.permute.xlu1 %152  ;;  %5352 = vmatprep.mubr.msk.f32.mxu0 %vm304_vm0, %v4873_v4 }
  0xa4   :  { %v150_v6 = vpop.permute.xlu0 %149  ;;  %vm221_vm14 = vcmp.eq.s32.totalorder %v6396_v41, %v153_v5 }
  0xa5   :  { %vm220_vm13 = vcmp.eq.s32.totalorder %v6396_v41, %v150_v6  ;;  %v4876_v11 = vsel %vm221_vm14, 1.0, %v6141_v44 }
  0xa6   :  { %v4875_v8 = vsel %vm220_vm13, 1.0, %v6141_v44  ;;  %5353 = vmatmul.mubr.msk.f32.gmra.mxu0 %vm304_vm0, %v4874_v7 }
  0xa7   :  { %v159_v9 = vpop.permute.xlu1 %158  ;;  %5355 = vmatprep.mubr.msk.f32.mxu0 %vm304_vm0, %v4875_v8 }
  0xa8   :  { %v156_v10 = vpop.permute.xlu0 %155  ;;  %vm223_vm1 = vcmp.eq.s32.totalorder %v6396_v41, %v159_v9 }
  0xa9   :  { %vm222_vm15 = vcmp.eq.s32.totalorder %v6396_v41, %v156_v10  ;;  %v4878_v16 = vsel %vm223_vm1, 1.0, %v6141_v44 }
  0xaa   :  { %v4877_v12 = vsel %vm222_vm15, 1.0, %v6141_v44  ;;  %5356 = vmatmul.mubr.msk.f32.gmra.mxu0 %vm304_vm0, %v4876_v11 }
  0xab   :  { %v165_v13 = vpop.permute.xlu1 %164  ;;  %5358 = vmatprep.mubr.msk.f32.mxu0 %vm304_vm0, %v4877_v12 }
  0xac   :  { %v162_v15 = vpop.permute.xlu0 %161  ;;  %vm225_vm3 = vcmp.eq.s32.totalorder %v6396_v41, %v165_v13 }
  0xad   :  { %vm224_vm2 = vcmp.eq.s32.totalorder %v6396_v41, %v162_v15  ;;  %v4880_v20 = vsel %vm225_vm3, 1.0, %v6141_v44 }
  0xae   :  { %v4879_v17 = vsel %vm224_vm2, 1.0, %v6141_v44  ;;  %5359 = vmatmul.mubr.msk.f32.gmra.mxu0 %vm304_vm0, %v4878_v16 }
  0xaf   :  { %v171_v18 = vpop.permute.xlu1 %170  ;;  %5361 = vmatprep.mubr.msk.f32.mxu0 %vm304_vm0, %v4879_v17 }
  0xb0   :  { %v168_v19 = vpop.permute.xlu0 %167  ;;  %vm227_vm5 = vcmp.eq.s32.totalorder %v6396_v41, %v171_v18 }
  0xb1   :  { %vm226_vm4 = vcmp.eq.s32.totalorder %v6396_v41, %v168_v19  ;;  %v4882_v24 = vsel %vm227_vm5, 1.0, %v6141_v44 }
  0xb2   :  { %v4881_v21 = vsel %vm226_vm4, 1.0, %v6141_v44  ;;  %5362 = vmatmul.mubr.msk.f32.gmra.mxu0 %vm304_vm0, %v4880_v20 }
  0xb3   :  { %v177_v22 = vpop.permute.xlu1 %176  ;;  %5364 = vmatprep.mubr.msk.f32.mxu0 %vm304_vm0, %v4881_v21 }
  0xb4   :  { %v174_v23 = vpop.permute.xlu0 %173  ;;  %vm229_vm7 = vcmp.eq.s32.totalorder %v6396_v41, %v177_v22 }
  0xb5   :  { %vm228_vm6 = vcmp.eq.s32.totalorder %v6396_v41, %v174_v23  ;;  %v4884_v28 = vsel %vm229_vm7, 1.0, %v6141_v44 }
  0xb6   :  { %v4883_v25 = vsel %vm228_vm6, 1.0, %v6141_v44  ;;  %5365 = vmatmul.mubr.msk.f32.gmra.mxu0 %vm304_vm0, %v4882_v24 }
  0xb7   :  { %v183_v26 = vpop.permute.xlu1 %182  ;;  %5367 = vmatprep.mubr.msk.f32.mxu0 %vm304_vm0, %v4883_v25  ;;  %v6577_v25 = vld [vmem:[%s7936_s4] ss:$0 sm:$0xff] }
  0xb8   :  { %v180_v27 = vpop.permute.xlu0 %179  ;;  %vm231_vm9 = vcmp.eq.s32.totalorder %v6396_v41, %v183_v26 }
  0xb9   :  { %vm230_vm8 = vcmp.eq.s32.totalorder %v6396_v41, %v180_v27  ;;  %v4886_v32 = vsel %vm231_vm9, 1.0, %v6141_v44 }
  0xba   :  { %v4885_v29 = vsel %vm230_vm8, 1.0, %v6141_v44  ;;  %5368 = vmatmul.mubr.msk.f32.gmra.mxu0 %vm304_vm0, %v4884_v28 }
  0xbb   :  { %v189_v30 = vpop.permute.xlu1 %188  ;;  %5370 = vmatprep.mubr.msk.f32.mxu0 %vm304_vm0, %v4885_v29 }
  0xbc   :  { %v186_v31 = vpop.permute.xlu0 %185  ;;  %vm233_vm11 = vcmp.eq.s32.totalorder %v6396_v41, %v189_v30 }
  0xbd   :  { %vm232_vm10 = vcmp.eq.s32.totalorder %v6396_v41, %v186_v31  ;;  %v4888_v37 = vsel %vm233_vm11, 1.0, %v6141_v44  ;;  %vm6144_vm11 = vmmov 0  }
  0xbe   :  { %v4887_v33 = vsel %vm232_vm10, 1.0, %v6141_v44  ;;  %5371 = vmatmul.mubr.msk.f32.gmra.mxu0 %vm304_vm0, %v4886_v32 }
  0xbf   :  { %v195_v34 = vpop.permute.xlu1 %194  ;;  %5373 = vmatprep.mubr.msk.f32.mxu0 %vm304_vm0, %v4887_v33 }
  0xc0   :  { %v192_v36 = vpop.permute.xlu0 %191  ;;  %vm235_vm13 = vcmp.eq.s32.totalorder %v6396_v41, %v195_v34  ;;  %v6592_v34 = vld [vmem:[%s7937_s5] ss:$0 sm:$0xff] }
  0xc1   :  { %vm234_vm12 = vcmp.eq.s32.totalorder %v6396_v41, %v192_v36  ;;  %v4890_v43 = vsel %vm235_vm13, 1.0, %v6141_v44 }
  0xc2   :  { %v4889_v38 = vsel %vm234_vm12, 1.0, %v6141_v44  ;;  %5374 = vmatmul.mubr.msk.f32.gmra.mxu0 %vm304_vm0, %v4888_v37 }
  0xc3   :  { %v201_v39 = vpop.permute.xlu1 %200  ;;  %5376 = vmatprep.mubr.msk.f32.mxu0 %vm304_vm0, %v4889_v38 }
  0xc4   :  { %v198_v42 = vpop.permute.xlu0 %197  ;;  %vm237_vm15 = vcmp.eq.s32.totalorder %v6396_v41, %v201_v39 }
  0xc5   :  { %vm236_vm14 = vcmp.eq.s32.totalorder %v6396_v41, %v198_v42  ;;  %v4892_v48 = vsel %vm237_vm15, 1.0, %v6141_v44 }
  0xc6   :  { %v4891_v45 = vsel %vm236_vm14, 1.0, %v6141_v44  ;;  %5377 = vmatmul.mubr.msk.f32.gmra.mxu0 %vm304_vm0, %v4890_v43 }
  0xc7   :  { %v207_v46 = vpop.permute.xlu1 %206  ;;  %5379 = vmatprep.mubr.msk.f32.mxu0 %vm304_vm0, %v4891_v45 }
  0xc8   :  { %v204_v47 = vpop.permute.xlu0 %203  ;;  %vm239_vm2 = vcmp.eq.s32.totalorder %v6396_v41, %v207_v46 }
  0xc9   :  { %vm238_vm1 = vcmp.eq.s32.totalorder %v6396_v41, %v204_v47  ;;  %v4894_v51 = vsel %vm239_vm2, 1.0, %v6141_v44 }
  0xca   :  { %v4893_v49 = vsel %vm238_vm1, 1.0, %v6141_v44  ;;  %5380 = vmatmul.mubr.msk.f32.gmra.mxu0 %vm304_vm0, %v4892_v48 }
  0xcb   :  { %5382 = vmatprep.mubr.msk.f32.mxu0 %vm304_vm0, %v4893_v49 }
  0xce   :  { %5383 = vmatmul.mubr.msk.f32.gmra.mxu0 %vm304_vm0, %v4894_v51 }
  0xcf   :  { %5449 = vmatprep.mubr.f32.mxu0 %v6141_v44 }
  0xd2   :  { %5450 = vmatmul.mubr.f32.vlgmr.msra.gmra.mxu0 %v6141_v44 }
  0xd3   :  { %5452 = vmatprep.mubr.f32.mxu0 %v6141_v44  ;;  %5470 = vmatpush3.msra.mxu0 %v6380_v35 }
  0xd4   :  { %5471 = vmatprep.subr.mxu0 %v6408_v50 }
  0xd5   :  { %5472 = vmatpush3.msra.mxu0 %v6408_v50 }
  0xd6   :  { %5453 = vmatmul.mubr.f32.gmra.mxu0 %v6141_v44  ;;  %5473 = vmatprep.subr.mxu0 %v6417_v53 }
  0xd7   :  { %5474 = vmatpush3.msra.mxu0 %v6417_v53 }
  0xd8   :  { %5475 = vmatprep.subr.mxu0 %v6427_v56 }
  0xd9   :  { %5476 = vmatpush3.msra.mxu0 %v6427_v56 }
  0xda   :  { %5497 = vmatprep.subr.mxu0 %v6380_v35 }
 0x152   :  { %v5339_v55 = vpop.f32.mrf.mxu0 }
 0x154   :  { %v467_v57 = vpop.f32.mrf.mxu0 }
 0x155   :  { %5393 = vmatprep.mubr.msk.f32.mxu1 %vm304_vm0, %v467_v57 }
 0x156   :  { %v5342_v58 = vpop.f32.mrf.mxu0  ;;  %5394 = vmatmul.mubr.msk.f32.vlgmr.msra.gmra.mxu1 %vm304_vm0, %v5339_v55 }
 0x157   :  { %5456 = vmatpush3.msra.mxu1 %v6380_v35 }
 0x158   :  { %v477_v59 = vpop.f32.mrf.mxu0  ;;  %5457 = vmatprep.subr.mxu1 %v6408_v50 }
 0x159   :  { %5396 = vmatprep.mubr.msk.f32.mxu1 %vm304_vm0, %v477_v59  ;;  %5458 = vmatpush3.msra.mxu1 %v6408_v50 }
 0x15a   :  { %v5345_v60 = vpop.f32.mrf.mxu0  ;;  %5397 = vmatmul.mubr.msk.f32.gmra.mxu1 %vm304_vm0, %v5342_v58  ;;  %5459 = vmatprep.subr.mxu1 %v6417_v53 }
 0x15b   :  { %5460 = vmatpush3.msra.mxu1 %v6417_v53 }
 0x15c   :  { %v487_v61 = vpop.f32.mrf.mxu0  ;;  %5461 = vmatprep.subr.mxu1 %v6427_v56 }
 0x15d   :  { %5399 = vmatprep.mubr.msk.f32.mxu1 %vm304_vm0, %v487_v61  ;;  %5462 = vmatpush3.msra.mxu1 %v6427_v56 }
 0x15e   :  { %v5348_v62 = vpop.f32.mrf.mxu0  ;;  %5400 = vmatmul.mubr.msk.f32.gmra.mxu1 %vm304_vm0, %v5345_v60  ;;  %5483 = vmatprep.subr.mxu1 %v6380_v35 }
 0x160   :  { %v497_v63 = vpop.f32.mrf.mxu0 }
 0x161   :  { %5402 = vmatprep.mubr.msk.f32.mxu1 %vm304_vm0, %v497_v63 }
 0x162   :  { %v5351_v0 = vpop.f32.mrf.mxu0  ;;  %5403 = vmatmul.mubr.msk.f32.gmra.mxu1 %vm304_vm0, %v5348_v62 }
 0x164   :  { %v507_v1 = vpop.f32.mrf.mxu0 }
 0x165   :  { %5405 = vmatprep.mubr.msk.f32.mxu1 %vm304_vm0, %v507_v1 }
 0x166   :  { %v5354_v2 = vpop.f32.mrf.mxu0  ;;  %5406 = vmatmul.mubr.msk.f32.gmra.mxu1 %vm304_vm0, %v5351_v0 }
 0x168   :  { %v517_v3 = vpop.f32.mrf.mxu0 }
 0x169   :  { %5408 = vmatprep.mubr.msk.f32.mxu1 %vm304_vm0, %v517_v3 }
 0x16a   :  { %v5357_v4 = vpop.f32.mrf.mxu0  ;;  %5409 = vmatmul.mubr.msk.f32.gmra.mxu1 %vm304_vm0, %v5354_v2 }
 0x16c   :  { %v527_v5 = vpop.f32.mrf.mxu0 }
 0x16d   :  { %5411 = vmatprep.mubr.msk.f32.mxu1 %vm304_vm0, %v527_v5 }
 0x16e   :  { %v5360_v6 = vpop.f32.mrf.mxu0  ;;  %5412 = vmatmul.mubr.msk.f32.gmra.mxu1 %vm304_vm0, %v5357_v4 }
 0x170   :  { %v537_v7 = vpop.f32.mrf.mxu0 }
 0x171   :  { %5414 = vmatprep.mubr.msk.f32.mxu1 %vm304_vm0, %v537_v7 }
 0x172   :  { %v5363_v8 = vpop.f32.mrf.mxu0  ;;  %5415 = vmatmul.mubr.msk.f32.gmra.mxu1 %vm304_vm0, %v5360_v6 }
 0x174   :  { %v547_v9 = vpop.f32.mrf.mxu0 }
 0x175   :  { %5417 = vmatprep.mubr.msk.f32.mxu1 %vm304_vm0, %v547_v9 }
 0x176   :  { %v5366_v10 = vpop.f32.mrf.mxu0  ;;  %5418 = vmatmul.mubr.msk.f32.gmra.mxu1 %vm304_vm0, %v5363_v8 }
 0x178   :  { %v557_v11 = vpop.f32.mrf.mxu0 }
 0x179   :  { %5420 = vmatprep.mubr.msk.f32.mxu1 %vm304_vm0, %v557_v11 }
 0x17a   :  { %v5369_v12 = vpop.f32.mrf.mxu0  ;;  %5421 = vmatmul.mubr.msk.f32.gmra.mxu1 %vm304_vm0, %v5366_v10 }
 0x17c   :  { %v567_v13 = vpop.f32.mrf.mxu0 }
 0x17d   :  { %5423 = vmatprep.mubr.msk.f32.mxu1 %vm304_vm0, %v567_v13 }
 0x17e   :  { %v5372_v15 = vpop.f32.mrf.mxu0  ;;  %5424 = vmatmul.mubr.msk.f32.gmra.mxu1 %vm304_vm0, %v5369_v12 }
 0x180   :  { %v577_v16 = vpop.f32.mrf.mxu0 }
 0x181   :  { %5426 = vmatprep.mubr.msk.f32.mxu1 %vm304_vm0, %v577_v16 }
 0x182   :  { %v5375_v17 = vpop.f32.mrf.mxu0  ;;  %5427 = vmatmul.mubr.msk.f32.gmra.mxu1 %vm304_vm0, %v5372_v15 }
 0x184   :  { %v587_v18 = vpop.f32.mrf.mxu0 }
 0x185   :  { %5429 = vmatprep.mubr.msk.f32.mxu1 %vm304_vm0, %v587_v18 }
 0x186   :  { %v5378_v19 = vpop.f32.mrf.mxu0  ;;  %5430 = vmatmul.mubr.msk.f32.gmra.mxu1 %vm304_vm0, %v5375_v17 }
 0x188   :  { %v597_v20 = vpop.f32.mrf.mxu0 }
 0x189   :  { %5432 = vmatprep.mubr.msk.f32.mxu1 %vm304_vm0, %v597_v20 }
 0x18a   :  { %v5381_v21 = vpop.f32.mrf.mxu0  ;;  %5433 = vmatmul.mubr.msk.f32.gmra.mxu1 %vm304_vm0, %v5378_v19 }
 0x18c   :  { %v607_v22 = vpop.f32.mrf.mxu0 }
 0x18d   :  { %5435 = vmatprep.mubr.msk.f32.mxu1 %vm304_vm0, %v607_v22 }
 0x18e   :  { %v5384_v23 = vpop.f32.mrf.mxu0  ;;  %5436 = vmatmul.mubr.msk.f32.gmra.mxu1 %vm304_vm0, %v5381_v21 }
 0x190   :  { %v617_v24 = vpop.f32.mrf.mxu0 }
 0x191   :  { %5438 = vmatprep.mubr.msk.f32.mxu1 %vm304_vm0, %v617_v24 }
 0x192   :  { %5439 = vmatmul.mubr.msk.f32.gmra.mxu1 %vm304_vm0, %v5384_v23  ;;  %v5451_v26 = vpop.f32.mrf.mxu0 }
 0x193   :  { %v1045_v27 = vadd.f32 %v5451_v26, %v6577_v25 }
 0x194   :  { %v1039_v28 = vpop.f32.mrf.mxu0 }
 0x195   :  { %v1040_v29 = vadd.f32 %v6577_v25, %v1039_v28  ;;  %1092 = vrot.lane.b32.xlu1 %v1045_v27, %s7921_s24 }
 0x196   :  { %v5454_v30 = vpop.f32.mrf.mxu0 }
 0x197   :  { %v1055_v31 = vadd.f32 %v5454_v30, %v6577_v25  ;;  %1090 = vrot.lane.b32.xlu0 %v1040_v29, %s7921_s24 }
 0x198   :  { %v1049_v32 = vpop.f32.mrf.mxu0 }
 0x199   :  { %v1050_v33 = vadd.f32 %v6577_v25, %v1049_v32  ;;  %1096 = vrot.lane.b32.xlu1 %v1055_v31, %s7921_s24 }
 0x19b   :  { %1094 = vrot.lane.b32.xlu0 %v1050_v33, %s7921_s24 }
 0x216   :  { %v5395_v36 = vpop.f32.mrf.mxu1 }
 0x217   :  { %v6595_v37 = vadd.f32 %v5395_v36, %v6592_v34 }
 0x218   :  { %v799_v38 = vpop.f32.mrf.mxu1 }
 0x219   :  { %v1059_v39 = vadd.f32 %v1045_v27, %v6595_v37  ;;  %v6599_v42 = vadd.f32 %v6592_v34, %v799_v38  ;;  %v1091_v38 = vpop.permute.xlu0 %1090 }
 0x21a   :  { %v5398_v43 = vpop.f32.mrf.mxu1 }
 0x21b   :  { %v4962_v45 = vmul.f32 -1.442695, %v1059_v39  ;;  %v1058_v46 = vadd.f32 %v1040_v29, %v6599_v42  ;;  %v6603_v47 = vadd.f32 %v5398_v43, %v6592_v34  ;;  %v1093_v29 = vpop.permute.xlu1 %1092 }
 0x21c   :  { %v809_v48 = vpop.f32.mrf.mxu1 }
 0x21d   :  { %5820 = vpow2.f32 %v4962_v45  ;;  %v4961_v49 = vmul.f32 -1.442695, %v1058_v46  ;;  %v1061_v51 = vadd.f32 %v1055_v31, %v6603_v47  ;;  %v6607_v52 = vadd.f32 %v6592_v34, %v809_v48 }
 0x21e   :  { %v5401_v54 = vpop.f32.mrf.mxu1 }
 0x21f   :  { %5822 = vpow2.f32 %v4961_v49  ;;  %v4964_v55 = vmul.f32 -1.442695, %v1061_v51  ;;  %v1060_v57 = vadd.f32 %v1050_v33, %v6607_v52  ;;  %v6611_v58 = vadd.f32 %v5401_v54, %v6592_v34  ;;  %v1097_v48 = vpop.permute.xlu1 %1096 }
 0x220   :  { %v819_v59 = vpop.f32.mrf.mxu1 }
 0x221   :  { %5824 = vpow2.f32 %v4964_v55  ;;  %v4963_v60 = vmul.f32 -1.442695, %v1060_v57  ;;  %v6614_v61 = vadd.f32 %v6592_v34, %v819_v59 }
 0x222   :  { %v5404_v62 = vpop.f32.mrf.mxu1 }
 0x223   :  { %5826 = vpow2.f32 %v4963_v60  ;;  %v6617_v63 = vadd.f32 %v5404_v62, %v6592_v34  ;;  %v1095_v62 = vpop.permute.xlu0 %1094 }
 0x224   :  { %v829_v0 = vpop.f32.mrf.mxu1 }
 0x225   :  { %v6620_v1 = vadd.f32 %v6592_v34, %v829_v0 }
 0x226   :  { %v5407_v2 = vpop.f32.mrf.mxu1 }
 0x227   :  { %v6623_v3 = vadd.f32 %v5407_v2, %v6592_v34 }
 0x228   :  { %v839_v4 = vpop.f32.mrf.mxu1 }
 0x229   :  { %v6626_v5 = vadd.f32 %v6592_v34, %v839_v4 }
 0x22a   :  { %v5821_v6 = vpop.eup %5820  ;;  %v5410_v7 = vpop.f32.mrf.mxu1 }
 0x22b   :  { %v1075_v8 = vadd.f32 1.0, %v5821_v6  ;;  %v6629_v9 = vadd.f32 %v5410_v7, %v6592_v34 }
 0x22c   :  { %v5823_v10 = vpop.eup %5822  ;;  %v849_v11 = vpop.f32.mrf.mxu1 }
 0x22d   :  { %5828 = vrcp.f32 %v1075_v8  ;;  %v1074_v12 = vadd.f32 1.0, %v5823_v10  ;;  %v6632_v13 = vadd.f32 %v6592_v34, %v849_v11 }
 0x22e   :  { %v5825_v15 = vpop.eup %5824  ;;  %v5413_v16 = vpop.f32.mrf.mxu1 }
 0x22f   :  { %5830 = vrcp.f32 %v1074_v12  ;;  %v1077_v17 = vadd.f32 1.0, %v5825_v15  ;;  %v6635_v18 = vadd.f32 %v5413_v16, %v6592_v34 }
 0x230   :  { %v5827_v19 = vpop.eup %5826  ;;  %v859_v20 = vpop.f32.mrf.mxu1 }
 0x231   :  { %5832 = vrcp.f32 %v1077_v17  ;;  %v1076_v21 = vadd.f32 1.0, %v5827_v19  ;;  %v6638_v22 = vadd.f32 %v6592_v34, %v859_v20 }
 0x232   :  { %v5416_v23 = vpop.f32.mrf.mxu1 }
 0x233   :  { %5834 = vrcp.f32 %v1076_v21  ;;  %v6641_v24 = vadd.f32 %v5416_v23, %v6592_v34 }
 0x234   :  { %v869_v26 = vpop.f32.mrf.mxu1 }
 0x235   :  { %v6644_v27 = vadd.f32 %v6592_v34, %v869_v26 }
 0x236   :  { %v5419_v28 = vpop.f32.mrf.mxu1 }
 0x237   :  { %v6647_v30 = vadd.f32 %v5419_v28, %v6592_v34 }
 0x238   :  { %v879_v31 = vpop.f32.mrf.mxu1 }
 0x239   :  { %v6650_v32 = vadd.f32 %v6592_v34, %v879_v31 }
 0x23a   :  { %v6652_v33 = vpop.eup %5828  ;;  %v5422_v36 = vpop.f32.mrf.mxu1 }
 0x23b   :  { %v6655_v39 = vadd.f32 %v5422_v36, %v6592_v34  ;;  %v1103_v43 = vmul.f32 %v6652_v33, %v1093_v29 }
 0x23c   :  { %v6658_v45 = vpop.eup %5830  ;;  %v889_v46 = vpop.f32.mrf.mxu1 }
 0x23d   :  { %v1102_v49 = vmul.f32 %v6658_v45, %v1091_v38  ;;  %v6662_v51 = vadd.f32 %v6592_v34, %v889_v46  ;;  %1112 = vrot.lane.b32.xlu1 %v1103_v43, %s7921_s24 }
 0x23e   :  { %v6665_v54 = vpop.eup %5832  ;;  %v5425_v55 = vpop.f32.mrf.mxu1 }
 0x23f   :  { %v6668_v57 = vadd.f32 %v5425_v55, %v6592_v34  ;;  %v1105_v59 = vmul.f32 %v6665_v54, %v1097_v48  ;;  %1110 = vrot.lane.b32.xlu0 %v1102_v49, %s7921_s24 }
 0x240   :  { %v6672_v60 = vpop.eup %5834  ;;  %v899_v0 = vpop.f32.mrf.mxu1 }
 0x241   :  { %v1104_v2 = vmul.f32 %v6672_v60, %v1095_v62  ;;  %v6676_v4 = vadd.f32 %v6592_v34, %v899_v0  ;;  %1116 = vrot.lane.b32.xlu1 %v1105_v59, %s7921_s24 }
 0x242   :  { %v5428_v6 = vpop.f32.mrf.mxu1 }
 0x243   :  { %v6680_v7 = vadd.f32 %v5428_v6, %v6592_v34  ;;  %1114 = vrot.lane.b32.xlu0 %v1104_v2, %s7921_s24  ;;  %v1155_v6 = vmul.f32 0.0, %v6652_v33 }
 0x244   :  { %v909_v8 = vpop.f32.mrf.mxu1 }
 0x245   :  { %v6684_v10 = vadd.f32 %v6592_v34, %v909_v8  ;;  %v1130_v8 = vsub.f32 1.0, %v6658_v45 }
 0x246   :  { %v5431_v11 = vpop.f32.mrf.mxu1 }
 0x247   :  { %v6687_v12 = vadd.f32 %v5431_v11, %v6592_v34 }
 0x248   :  { %v919_v15 = vpop.f32.mrf.mxu1 }
 0x249   :  { %v6690_v16 = vadd.f32 %v6592_v34, %v919_v15 }
 0x24a   :  { %v5434_v17 = vpop.f32.mrf.mxu1 }
 0x24b   :  { %v6693_v19 = vadd.f32 %v5434_v17, %v6592_v34  ;;  %v1154_v17 = vmul.f32 0.0, %v6658_v45 }
 0x24c   :  { %v929_v20 = vpop.f32.mrf.mxu1 }
 0x24d   :  { %v6696_v21 = vadd.f32 %v6592_v34, %v929_v20 }
 0x24e   :  { %v5437_v23 = vpop.f32.mrf.mxu1 }
 0x24f   :  { %v6699_v26 = vadd.f32 %v5437_v23, %v6592_v34  ;;  %v1133_v23 = vsub.f32 1.0, %v6665_v54 }
 0x250   :  { %v939_v28 = vpop.f32.mrf.mxu1 }
 0x251   :  { %v6702_v29 = vadd.f32 %v6592_v34, %v939_v28 }
 0x252   :  { %v5440_v31 = vpop.f32.mrf.mxu1 }
 0x253   :  { %v6705_v36 = vadd.f32 %v5440_v31, %v6592_v34 }
 0x2af   :  { %v1113_v38 = vpop.permute.xlu1 %1112 }
 0x2b0   :  { %v1123_v43 = vadd.f32 %v1113_v38, %v6595_v37  ;;  %v1157_v38 = vmul.f32 0.0, %v6665_v54 }
 0x2b1   :  { %v1111_v46 = vpop.permute.xlu0 %1110 }
 0x2b2   :  { %5836 = vtanh.f32 %v1123_v43  ;;  %v1122_v48 = vadd.f32 %v1111_v46, %v6599_v42 }
 0x2b3   :  { %v1117_v49 = vpop.permute.xlu1 %1116 }
 0x2b4   :  { %5838 = vtanh.f32 %v1122_v48  ;;  %v1125_v55 = vadd.f32 %v1117_v49, %v6603_v47  ;;  %v1131_v47 = vsub.f32 1.0, %v6652_v33  ;;  %v1132_v33 = vsub.f32 1.0, %v6672_v60 }
 0x2b5   :  { %v1115_v59 = vpop.permute.xlu0 %1114  ;;  %v1156_v49 = vmul.f32 0.0, %v6672_v60 }
 0x2b6   :  { %5840 = vtanh.f32 %v1125_v55  ;;  %v1124_v62 = vadd.f32 %v1115_v59, %v6607_v52 }
 0x2b8   :  { %5842 = vtanh.f32 %v1124_v62 }
 0x2bf   :  { %v5837_v0 = vpop.eup %5836 }
 0x2c0   :  { %1140 = vrot.lane.b32.xlu1 %v5837_v0, %s6143_s2  ;;  %v6763_v0 = vpop.f32.mrf.mxu1 }
 0x2c1   :  { %v5839_v34 = vpop.eup %5838 }
 0x2c2   :  { %1138 = vrot.lane.b32.xlu0 %v5839_v34, %s6143_s2 }
 0x2c3   :  { %v5841_v37 = vpop.eup %5840 }
 0x2c4   :  { %1144 = vrot.lane.b32.xlu1 %v5841_v37, %s6143_s2 }
 0x2c5   :  { %v5843_v42 = vpop.eup %5842 }
 0x2c6   :  { %1142 = vrot.lane.b32.xlu0 %v5843_v42, %s6143_s2 }
 0x332   :  { %v1141_v2 = vpop.permute.xlu1 %1140 }
 0x333   :  { %v1151_v52 = vmul.f32 %v1141_v2, %v1131_v47 }
 0x334   :  { %v1139_v11 = vpop.permute.xlu0 %1138 }
 0x335   :  { %v6718_v15 = vadd.f32 %v1155_v6, %v1151_v52  ;;  %v1150_v20 = vmul.f32 %v1139_v11, %v1130_v8 }
 0x336   :  { %v1145_v28 = vpop.permute.xlu1 %1144 }
 0x337   :  { %v6722_v31 = vadd.f32 %v1154_v17, %v1150_v20  ;;  %v1153_v43 = vmul.f32 %v1145_v28, %v1133_v23  ;;  %1172 = vrot.lane.b32.xlu1 %v6718_v15, %s6143_s2 }
 0x338   :  { %v1143_v46 = vpop.permute.xlu0 %1142 }
 0x339   :  { %v6728_v48 = vadd.f32 %v1157_v38, %v1153_v43  ;;  %v1152_v45 = vmul.f32 %v1143_v46, %v1132_v33  ;;  %1170 = vrot.lane.b32.xlu0 %v6722_v31, %s6143_s2 }
 0x33b   :  { %v6733_v55 = vadd.f32 %v1156_v49, %v1152_v45  ;;  %1176 = vrot.lane.b32.xlu1 %v6728_v48, %s6143_s2 }
 0x33d   :  { %1174 = vrot.lane.b32.xlu0 %v6733_v55, %s6143_s2 }
 0x3a9   :  { %v6739_v54 = vpop.permute.xlu1 %1172 }
 0x3ab   :  { %v6741_v59 = vpop.permute.xlu0 %1170 }
 0x3ac   :  { %5463 = vmatprep.mubr.msk.f32.mxu1 %vm304_vm0, %v6741_v59 }
 0x3ad   :  { %5464 = vmatmul.mubr.msk.f32.vlgmr.msra.gmra.mxu1 %vm304_vm0, %v6739_v54  ;;  %v6751_v62 = vpop.permute.xlu1 %1176 }
 0x3ae   :  { %5484 = vmatpush3.msra.mxu1 %v6380_v35 }
 0x3af   :  { %v6748_v60 = vpop.permute.xlu0 %1174  ;;  %5485 = vmatprep.subr.mxu1 %v6408_v50 }
 0x3b0   :  { %5466 = vmatprep.mubr.msk.f32.mxu1 %vm304_vm0, %v6748_v60  ;;  %5486 = vmatpush3.msra.mxu1 %v6408_v50 }
 0x3b1   :  { %5467 = vmatmul.mubr.msk.f32.gmra.mxu1 %vm304_vm0, %v6751_v62  ;;  %5487 = vmatprep.subr.mxu1 %v6417_v53 }
 0x3b2   :  { %5488 = vmatpush3.msra.mxu1 %v6417_v53 }
 0x3b3   :  { %5489 = vmatprep.subr.mxu1 %v6427_v56 }
 0x3b4   :  { %5490 = vmatpush3.msra.mxu1 %v6427_v56 }
 0x3b5   :  { %5511 = vmatprep.subr.mxu1 %v6380_v35 }
 0x46d   :  { %v5465_v34 = vpop.f32.mrf.mxu1 }
 0x46e   :  { %v1270_v37 = vadd.f32 %v5465_v34, %v6577_v25 }
 0x46f   :  { %v1264_v42 = vpop.f32.mrf.mxu1 }
 0x470   :  { %v1265_v50 = vadd.f32 %v6577_v25, %v1264_v42  ;;  %1317 = vrot.lane.b32.xlu1 %v1270_v37, %s7921_s24  ;;  %v1284_v35 = vadd.f32 %v1270_v37, %v6611_v58 }
 0x471   :  { %v5468_v47 = vpop.f32.mrf.mxu1 }
 0x472   :  { %v1280_v2 = vadd.f32 %v5468_v47, %v6577_v25  ;;  %1315 = vrot.lane.b32.xlu0 %v1265_v50, %s7921_s24  ;;  %v1283_v8 = vadd.f32 %v1265_v50, %v6614_v61  ;;  %v4970_v11 = vmul.f32 -1.442695, %v1284_v35 }
 0x473   :  { %v1274_v6 = vpop.f32.mrf.mxu1 }
 0x474   :  { %v1275_v52 = vadd.f32 %v6577_v25, %v1274_v6  ;;  %1321 = vrot.lane.b32.xlu1 %v1280_v2, %s7921_s24  ;;  %v1286_v17 = vadd.f32 %v1280_v2, %v6617_v63  ;;  %v4969_v20 = vmul.f32 -1.442695, %v1283_v8  ;;  %5844 = vpow2.f32 %v4970_v11 }
 0x476   :  { %1319 = vrot.lane.b32.xlu0 %v1275_v52, %s7921_s24  ;;  %v1285_v23 = vadd.f32 %v1275_v52, %v6620_v1  ;;  %v4972_v28 = vmul.f32 -1.442695, %v1286_v17  ;;  %5846 = vpow2.f32 %v4969_v20 }
 0x478   :  { %v4971_v38 = vmul.f32 -1.442695, %v1285_v23  ;;  %5848 = vpow2.f32 %v4972_v28 }
 0x47a   :  { %5850 = vpow2.f32 %v4971_v38 }
 0x481   :  { %v5845_v43 = vpop.eup %5844 }
 0x482   :  { %v1300_v46 = vadd.f32 1.0, %v5845_v43 }
 0x483   :  { %v5847_v33 = vpop.eup %5846 }
 0x484   :  { %v1299_v45 = vadd.f32 1.0, %v5847_v33  ;;  %5852 = vrcp.f32 %v1300_v46 }
 0x485   :  { %v5849_v49 = vpop.eup %5848 }
 0x486   :  { %v1302_v37 = vadd.f32 1.0, %v5849_v49  ;;  %5854 = vrcp.f32 %v1299_v45 }
 0x487   :  { %v5851_v34 = vpop.eup %5850 }
 0x488   :  { %v1301_v42 = vadd.f32 1.0, %v5851_v34  ;;  %5856 = vrcp.f32 %v1302_v37 }
 0x48a   :  { %5858 = vrcp.f32 %v1301_v42 }
 0x491   :  { %v5853_v50 = vpop.eup %5852 }
 0x493   :  { %v5855_v6 = vpop.eup %5854 }
 0x495   :  { %v5857_v8 = vpop.eup %5856 }
 0x497   :  { %v5859_v20 = vpop.eup %5858 }
 0x4e2   :  { %v1318_v47 = vpop.permute.xlu1 %1317 }
 0x4e3   :  { %v1328_v2 = vmul.f32 %v5853_v50, %v1318_v47 }
 0x4e4   :  { %v1316_v52 = vpop.permute.xlu0 %1315 }
 0x4e5   :  { %v1327_v35 = vmul.f32 %v5855_v6, %v1316_v52  ;;  %1337 = vrot.lane.b32.xlu1 %v1328_v2, %s7921_s24 }
 0x4e6   :  { %v1322_v11 = vpop.permute.xlu1 %1321 }
 0x4e7   :  { %v1330_v17 = vmul.f32 %v5857_v8, %v1322_v11  ;;  %1335 = vrot.lane.b32.xlu0 %v1327_v35, %s7921_s24  ;;  %v1355_v11 = vsub.f32 1.0, %v5855_v6 }
 0x4e8   :  { %v1320_v23 = vpop.permute.xlu0 %1319 }
 0x4e9   :  { %v1329_v28 = vmul.f32 %v5859_v20, %v1320_v23  ;;  %1341 = vrot.lane.b32.xlu1 %v1330_v17, %s7921_s24  ;;  %v1379_v23 = vmul.f32 %v5855_v6, %v6722_v31 }
 0x4eb   :  { %1339 = vrot.lane.b32.xlu0 %v1329_v28, %s7921_s24 }
 0x557   :  { %v1338_v38 = vpop.permute.xlu1 %1337 }
 0x558   :  { %v1348_v43 = vadd.f32 %v1338_v38, %v6611_v58  ;;  %v1358_v38 = vsub.f32 1.0, %v5857_v8 }
 0x559   :  { %v1336_v33 = vpop.permute.xlu0 %1335 }
 0x55a   :  { %5860 = vtanh.f32 %v1348_v43  ;;  %v1347_v46 = vadd.f32 %v1336_v33, %v6614_v61  ;;  %v1356_v61 = vsub.f32 1.0, %v5853_v50 }
 0x55b   :  { %v1342_v49 = vpop.permute.xlu1 %1341 }
 0x55c   :  { %5862 = vtanh.f32 %v1347_v46  ;;  %v1350_v45 = vadd.f32 %v1342_v49, %v6617_v63  ;;  %v1380_v63 = vmul.f32 %v5853_v50, %v6718_v15  ;;  %v1382_v46 = vmul.f32 %v5857_v8, %v6728_v48 }
 0x55d   :  { %v1340_v34 = vpop.permute.xlu0 %1339  ;;  %v6810_v48 = vshrl.u32 %v110_v40, 7 }
 0x55e   :  { %5864 = vtanh.f32 %v1350_v45  ;;  %v1349_v37 = vadd.f32 %v1340_v34, %v6620_v1  ;;  %v1357_v45 = vsub.f32 1.0, %v5859_v20  ;;  %v1381_v34 = vmul.f32 %v5859_v20, %v6733_v55  ;;  %v6817_v55 = vld [vmem:[%s7938_s7] sm:$0xff] }
 0x55f   :  { %v1164_v6 = vsub.s32 0, %v6810_v48  ;;  %v1389_v8 = vsub.s32 1, %v6810_v48 }
 0x560   :  { %5866 = vtanh.f32 %v1349_v37 }
 0x561   :  { %v6822_v20 = vrot.slane %v6817_v55, %v1164_v6 }
 0x563   :  { %v1183_v40 = vmul.f32 %v6739_v54, %v6822_v20  ;;  %v6843_v54 = vld [vmem:[%s7934_s26 + $0x18] sm:$0xff] }
 0x567   :  { %v5861_v42 = vpop.eup %5860 }
 0x568   :  { %1365 = vrot.lane.b32.xlu1 %v5861_v42, %s6143_s2  ;;  %v6825_v42 = vrot.slane %v6817_v55, %v1389_v8 }
 0x569   :  { %v5863_v47 = vpop.eup %5862 }
 0x56a   :  { %1363 = vrot.lane.b32.xlu0 %v5863_v47, %s6143_s2 }
 0x56b   :  { %v5865_v58 = vpop.eup %5864 }
 0x56c   :  { %1369 = vrot.lane.b32.xlu1 %v5865_v58, %s6143_s2 }
 0x56d   :  { %v5867_v2 = vpop.eup %5866 }
 0x56e   :  { %1367 = vrot.lane.b32.xlu0 %v5867_v2, %s6143_s2 }
 0x5da   :  { %v1366_v52 = vpop.permute.xlu1 %1365 }
 0x5db   :  { %v1376_v35 = vmul.f32 %v1366_v52, %v1356_v61 }
 0x5dc   :  { %v1364_v1 = vpop.permute.xlu0 %1363 }
 0x5dd   :  { %v6790_v17 = vadd.f32 %v1380_v63, %v1376_v35  ;;  %v1375_v28 = vmul.f32 %v1364_v1, %v1355_v11  ;;  %v1185_v63 = vmul.f32 %v6751_v62, %v6822_v20  ;;  %v6851_v1 = vld [vmem:[%s7934_s26 + $0x10] sm:$0xff] }
 0x5de   :  { %v1370_v43 = vpop.permute.xlu1 %1369 }
 0x5df   :  { %v6793_v33 = vadd.f32 %v1379_v23, %v1375_v28  ;;  %v1378_v49 = vmul.f32 %v1370_v43, %v1358_v38  ;;  %1397 = vrot.lane.b32.xlu1 %v6790_v17, %s6143_s2 }
 0x5e0   :  { %v1368_v15 = vpop.permute.xlu0 %1367 }
 0x5e1   :  { %v6798_v50 = vadd.f32 %v1382_v46, %v1378_v49  ;;  %v1377_v37 = vmul.f32 %v1368_v15, %v1357_v45  ;;  %1395 = vrot.lane.b32.xlu0 %v6793_v33, %s6143_s2 }
 0x5e3   :  { %v6803_v31 = vadd.f32 %v1381_v34, %v1377_v37  ;;  %1401 = vrot.lane.b32.xlu1 %v6798_v50, %s6143_s2 }
 0x5e5   :  { %1399 = vrot.lane.b32.xlu0 %v6803_v31, %s6143_s2 }
 0x651   :  { %v1398_v47 = vpop.permute.xlu1 %1397 }
 0x652   :  { %v1408_v58 = vmul.f32 %v1398_v47, %v6825_v42 }
 0x653   :  { %v6830_v2 = vpop.permute.xlu0 %1395 }
 0x654   :  { %v6832_v61 = vadd.f32 %v1408_v58, %v1183_v40  ;;  %5477 = vmatprep.mubr.msk.f32.mxu0 %vm304_vm0, %v6830_v2 }
 0x655   :  { %v1402_v52 = vpop.permute.xlu1 %1401  ;;  %5478 = vmatmul.mubr.msk.f32.vlgmr.msra.gmra.mxu0 %vm304_vm0, %v1398_v47 }
 0x656   :  { %v1410_v35 = vmul.f32 %v1402_v52, %v6825_v42  ;;  %5498 = vmatpush3.msra.mxu0 %v6843_v54 }
 0x657   :  { %v6846_v11 = vpop.permute.xlu0 %1399  ;;  %5499 = vmatprep.subr.mxu0 %v6851_v1 }
 0x658   :  { %v6854_v23 = vadd.f32 %v1410_v35, %v1185_v63  ;;  %5480 = vmatprep.mubr.msk.f32.mxu0 %vm304_vm0, %v6846_v11  ;;  %5500 = vmatpush3.msra.mxu0 %v6851_v1 }
 0x659   :  { %5481 = vmatmul.mubr.msk.f32.gmra.mxu0 %vm304_vm0, %v1402_v52  ;;  %5501 = vmatprep.subr.mxu0 %v6417_v53 }
 0x65a   :  { %5502 = vmatpush3.msra.mxu0 %v6417_v53 }
 0x65b   :  { %5503 = vmatprep.subr.mxu0 %v6427_v56 }
 0x65c   :  { %5504 = vmatpush3.msra.mxu0 %v6427_v56 }
 0x65d   :  { %5525 = vmatprep.subr.mxu0 %v6843_v54 }
 0x715   :  { %v5479_v62 = vpop.f32.mrf.mxu0 }
 0x716   :  { %v1495_v28 = vadd.f32 %v5479_v62, %v6577_v25 }
 0x717   :  { %v1489_v38 = vpop.f32.mrf.mxu0 }
 0x718   :  { %v1490_v43 = vadd.f32 %v6577_v25, %v1489_v38  ;;  %1542 = vrot.lane.b32.xlu1 %v1495_v28, %s7921_s24  ;;  %v1509_v56 = vadd.f32 %v1495_v28, %v6623_v3 }
 0x719   :  { %v5482_v46 = vpop.f32.mrf.mxu0 }
 0x71a   :  { %v1505_v49 = vadd.f32 %v5482_v46, %v6577_v25  ;;  %1540 = vrot.lane.b32.xlu0 %v1490_v43, %s7921_s24  ;;  %v1508_v15 = vadd.f32 %v1490_v43, %v6626_v5  ;;  %v4978_v34 = vmul.f32 -1.442695, %v1509_v56 }
 0x71b   :  { %v1499_v53 = vpop.f32.mrf.mxu0 }
 0x71c   :  { %v1500_v45 = vadd.f32 %v6577_v25, %v1499_v53  ;;  %1546 = vrot.lane.b32.xlu1 %v1505_v49, %s7921_s24  ;;  %v1511_v37 = vadd.f32 %v1505_v49, %v6629_v9  ;;  %v4977_v8 = vmul.f32 -1.442695, %v1508_v15  ;;  %5868 = vpow2.f32 %v4978_v34 }
 0x71e   :  { %1544 = vrot.lane.b32.xlu0 %v1500_v45, %s7921_s24  ;;  %v1510_v47 = vadd.f32 %v1500_v45, %v6632_v13  ;;  %v4980_v40 = vmul.f32 -1.442695, %v1511_v37  ;;  %5870 = vpow2.f32 %v4977_v8 }
 0x720   :  { %v4979_v58 = vmul.f32 -1.442695, %v1510_v47  ;;  %5872 = vpow2.f32 %v4980_v40 }
 0x722   :  { %5874 = vpow2.f32 %v4979_v58 }
 0x729   :  { %v5869_v52 = vpop.eup %5868 }
 0x72a   :  { %v1525_v35 = vadd.f32 1.0, %v5869_v52 }
 0x72b   :  { %v5871_v63 = vpop.eup %5870 }
 0x72c   :  { %v1524_v38 = vadd.f32 1.0, %v5871_v63  ;;  %5876 = vrcp.f32 %v1525_v35 }
 0x72d   :  { %v5873_v62 = vpop.eup %5872 }
 0x72e   :  { %v1527_v43 = vadd.f32 1.0, %v5873_v62  ;;  %5878 = vrcp.f32 %v1524_v38 }
 0x72f   :  { %v5875_v28 = vpop.eup %5874 }
 0x730   :  { %v1526_v46 = vadd.f32 1.0, %v5875_v28  ;;  %5880 = vrcp.f32 %v1527_v43 }
 0x732   :  { %5882 = vrcp.f32 %v1526_v46 }
 0x739   :  { %v5877_v49 = vpop.eup %5876 }
 0x73b   :  { %v5879_v56 = vpop.eup %5878 }
 0x73d   :  { %v5881_v37 = vpop.eup %5880 }
 0x73f   :  { %v5883_v40 = vpop.eup %5882 }
 0x78a   :  { %v1543_v53 = vpop.permute.xlu1 %1542 }
 0x78b   :  { %v1553_v45 = vmul.f32 %v5877_v49, %v1543_v53 }
 0x78c   :  { %v1541_v15 = vpop.permute.xlu0 %1540 }
 0x78d   :  { %v1552_v34 = vmul.f32 %v5879_v56, %v1541_v15  ;;  %1562 = vrot.lane.b32.xlu1 %v1553_v45, %s7921_s24 }
 0x78e   :  { %v1547_v8 = vpop.permute.xlu1 %1546 }
 0x78f   :  { %v1555_v47 = vmul.f32 %v5881_v37, %v1547_v8  ;;  %1560 = vrot.lane.b32.xlu0 %v1552_v34, %s7921_s24 }
 0x790   :  { %v1545_v58 = vpop.permute.xlu0 %1544 }
 0x791   :  { %v1554_v52 = vmul.f32 %v5883_v40, %v1545_v58  ;;  %1566 = vrot.lane.b32.xlu1 %v1555_v47, %s7921_s24  ;;  %v1580_v58 = vsub.f32 1.0, %v5879_v56 }
 0x793   :  { %1564 = vrot.lane.b32.xlu0 %v1554_v52, %s7921_s24 }
 0x7ff   :  { %v1563_v63 = vpop.permute.xlu1 %1562 }
 0x800   :  { %v1573_v35 = vadd.f32 %v1563_v63, %v6623_v3  ;;  %v1604_v63 = vmul.f32 %v5879_v56, %v6793_v33 }
 0x801   :  { %v1561_v62 = vpop.permute.xlu0 %1560 }
 0x802   :  { %5884 = vtanh.f32 %v1573_v35  ;;  %v1572_v38 = vadd.f32 %v1561_v62, %v6626_v5  ;;  %v1581_v5 = vsub.f32 1.0, %v5877_v49  ;;  %v1583_v62 = vsub.f32 1.0, %v5881_v37 }
 0x803   :  { %v1567_v28 = vpop.permute.xlu1 %1566 }
 0x804   :  { %5886 = vtanh.f32 %v1572_v38  ;;  %v1575_v43 = vadd.f32 %v1567_v28, %v6629_v9  ;;  %v1605_v9 = vmul.f32 %v5877_v49, %v6790_v17 }
 0x805   :  { %v1565_v46 = vpop.permute.xlu0 %1564 }
 0x806   :  { %5888 = vtanh.f32 %v1575_v43  ;;  %v1574_v53 = vadd.f32 %v1565_v46, %v6632_v13  ;;  %v1607_v43 = vmul.f32 %v5881_v37, %v6798_v50  ;;  %v1614_v50 = vsub.s32 2, %v6810_v48 }
 0x808   :  { %5890 = vtanh.f32 %v1574_v53  ;;  %v1582_v53 = vsub.f32 1.0, %v5883_v40  ;;  %v6911_v56 = vrot.slane %v6817_v55, %v1614_v50 }
 0x80f   :  { %v5885_v45 = vpop.eup %5884 }
 0x810   :  { %1590 = vrot.lane.b32.xlu1 %v5885_v45, %s6143_s2  ;;  %v1606_v45 = vmul.f32 %v5883_v40, %v6803_v31 }
 0x811   :  { %v5887_v15 = vpop.eup %5886 }
 0x812   :  { %1588 = vrot.lane.b32.xlu0 %v5887_v15, %s6143_s2 }
 0x813   :  { %v5889_v3 = vpop.eup %5888 }
 0x814   :  { %1594 = vrot.lane.b32.xlu1 %v5889_v3, %s6143_s2 }
 0x815   :  { %v5891_v34 = vpop.eup %5890 }
 0x816   :  { %1592 = vrot.lane.b32.xlu0 %v5891_v34, %s6143_s2 }
 0x882   :  { %v1591_v8 = vpop.permute.xlu1 %1590 }
 0x883   :  { %v1601_v47 = vmul.f32 %v1591_v8, %v1581_v5 }
 0x884   :  { %v1589_v13 = vpop.permute.xlu0 %1588 }
 0x885   :  { %v6890_v52 = vadd.f32 %v1605_v9, %v1601_v47  ;;  %v1600_v35 = vmul.f32 %v1589_v13, %v1580_v58 }
 0x886   :  { %v1595_v38 = vpop.permute.xlu1 %1594 }
 0x887   :  { %v6893_v28 = vadd.f32 %v1604_v63, %v1600_v35  ;;  %v1603_v46 = vmul.f32 %v1595_v38, %v1583_v62  ;;  %1622 = vrot.lane.b32.xlu1 %v6890_v52, %s6143_s2 }
 0x888   :  { %v1593_v17 = vpop.permute.xlu0 %1592 }
 0x889   :  { %v6898_v49 = vadd.f32 %v1607_v43, %v1603_v46  ;;  %v1602_v15 = vmul.f32 %v1593_v17, %v1582_v53  ;;  %1620 = vrot.lane.b32.xlu0 %v6893_v28, %s6143_s2 }
 0x88b   :  { %v6903_v33 = vadd.f32 %v1606_v45, %v1602_v15  ;;  %1626 = vrot.lane.b32.xlu1 %v6898_v49, %s6143_s2 }
 0x88d   :  { %1624 = vrot.lane.b32.xlu0 %v6903_v33, %s6143_s2 }
 0x8f9   :  { %v1623_v37 = vpop.permute.xlu1 %1622 }
 0x8fa   :  { %v1633_v31 = vmul.f32 %v1623_v37, %v6911_v56 }
 0x8fb   :  { %v6914_v40 = vpop.permute.xlu0 %1620 }
 0x8fc   :  { %v6917_v3 = vadd.f32 %v1633_v31, %v6832_v61  ;;  %5491 = vmatprep.mubr.msk.f32.mxu1 %vm304_vm0, %v6914_v40  ;;  %v6937_v61 = vld [vmem:[%s7934_s26 + $0x8] sm:$0xff] }
 0x8fd   :  { %v1627_v34 = vpop.permute.xlu1 %1626  ;;  %5492 = vmatmul.mubr.msk.f32.vlgmr.msra.gmra.mxu1 %vm304_vm0, %v1623_v37 }
 0x8fe   :  { %v1635_v5 = vmul.f32 %v1627_v34, %v6911_v56  ;;  %5512 = vmatpush3.msra.mxu1 %v6843_v54 }
 0x8ff   :  { %v6924_v8 = vpop.permute.xlu0 %1624  ;;  %5513 = vmatprep.subr.mxu1 %v6851_v1 }
 0x900   :  { %v6928_v9 = vadd.f32 %v1635_v5, %v6854_v23  ;;  %5494 = vmatprep.mubr.msk.f32.mxu1 %vm304_vm0, %v6924_v8  ;;  %5514 = vmatpush3.msra.mxu1 %v6851_v1  ;;  %v6944_v23 = vld [vmem:[%s7934_s26] sm:$0xff] }
 0x901   :  { %5495 = vmatmul.mubr.msk.f32.gmra.mxu1 %vm304_vm0, %v1627_v34  ;;  %5515 = vmatprep.subr.mxu1 %v6937_v61 }
 0x902   :  { %5516 = vmatpush3.msra.mxu1 %v6937_v61 }
 0x903   :  { %5517 = vmatprep.subr.mxu1 %v6944_v23 }
 0x904   :  { %5518 = vmatpush3.msra.mxu1 %v6944_v23 }
 0x905   :  { %5539 = vmatprep.subr.mxu1 %v6843_v54 }
 0x9bd   :  { %v5493_v47 = vpop.f32.mrf.mxu1 }
 0x9be   :  { %v1720_v58 = vadd.f32 %v5493_v47, %v6577_v25 }
 0x9bf   :  { %v1714_v13 = vpop.f32.mrf.mxu1 }
 0x9c0   :  { %v1715_v63 = vadd.f32 %v6577_v25, %v1714_v13  ;;  %1767 = vrot.lane.b32.xlu1 %v1720_v58, %s7921_s24  ;;  %v1734_v46 = vadd.f32 %v1720_v58, %v6635_v18 }
 0x9c1   :  { %v5496_v35 = vpop.f32.mrf.mxu1 }
 0x9c2   :  { %v1730_v62 = vadd.f32 %v5496_v35, %v6577_v25  ;;  %1765 = vrot.lane.b32.xlu0 %v1715_v63, %s7921_s24  ;;  %v1733_v53 = vadd.f32 %v1715_v63, %v6638_v22  ;;  %v4986_v17 = vmul.f32 -1.442695, %v1734_v46 }
 0x9c3   :  { %v1724_v38 = vpop.f32.mrf.mxu1 }
 0x9c4   :  { %v1725_v43 = vadd.f32 %v6577_v25, %v1724_v38  ;;  %1771 = vrot.lane.b32.xlu1 %v1730_v62, %s7921_s24  ;;  %v1736_v45 = vadd.f32 %v1730_v62, %v6641_v24  ;;  %v4985_v15 = vmul.f32 -1.442695, %v1733_v53  ;;  %5892 = vpow2.f32 %v4986_v17 }
 0x9c6   :  { %1769 = vrot.lane.b32.xlu0 %v1725_v43, %s7921_s24  ;;  %v1735_v50 = vadd.f32 %v1725_v43, %v6644_v27  ;;  %v4988_v37 = vmul.f32 -1.442695, %v1736_v45  ;;  %5894 = vpow2.f32 %v4985_v15 }
 0x9c8   :  { %v4987_v31 = vmul.f32 -1.442695, %v1735_v50  ;;  %5896 = vpow2.f32 %v4988_v37 }
 0x9ca   :  { %5898 = vpow2.f32 %v4987_v31 }
 0x9d1   :  { %v5893_v25 = vpop.eup %5892 }
 0x9d2   :  { %v1750_v5 = vadd.f32 1.0, %v5893_v25 }
 0x9d3   :  { %v5895_v34 = vpop.eup %5894 }
 0x9d4   :  { %v1749_v13 = vadd.f32 1.0, %v5895_v34  ;;  %5900 = vrcp.f32 %v1750_v5 }
 0x9d5   :  { %v5897_v47 = vpop.eup %5896 }
 0x9d6   :  { %v1752_v63 = vadd.f32 1.0, %v5897_v47  ;;  %5902 = vrcp.f32 %v1749_v13 }
 0x9d7   :  { %v5899_v58 = vpop.eup %5898 }
 0x9d8   :  { %v1751_v35 = vadd.f32 1.0, %v5899_v58  ;;  %5904 = vrcp.f32 %v1752_v63 }
 0x9da   :  { %5906 = vrcp.f32 %v1751_v35 }
 0x9e1   :  { %v5901_v62 = vpop.eup %5900 }
 0x9e3   :  { %v5903_v46 = vpop.eup %5902 }
 0x9e5   :  { %v5905_v45 = vpop.eup %5904 }
 0x9e7   :  { %v5907_v37 = vpop.eup %5906 }
 0xa32   :  { %v1768_v38 = vpop.permute.xlu1 %1767 }
 0xa33   :  { %v1778_v43 = vmul.f32 %v5901_v62, %v1768_v38 }
 0xa34   :  { %v1766_v53 = vpop.permute.xlu0 %1765 }
 0xa35   :  { %v1777_v17 = vmul.f32 %v5903_v46, %v1766_v53  ;;  %1787 = vrot.lane.b32.xlu1 %v1778_v43, %s7921_s24 }
 0xa36   :  { %v1772_v15 = vpop.permute.xlu1 %1771 }
 0xa37   :  { %v1780_v50 = vmul.f32 %v5905_v45, %v1772_v15  ;;  %1785 = vrot.lane.b32.xlu0 %v1777_v17, %s7921_s24 }
 0xa38   :  { %v1770_v31 = vpop.permute.xlu0 %1769 }
 0xa39   :  { %v1779_v25 = vmul.f32 %v5907_v37, %v1770_v31  ;;  %1791 = vrot.lane.b32.xlu1 %v1780_v50, %s7921_s24  ;;  %v1805_v31 = vsub.f32 1.0, %v5903_v46 }
 0xa3b   :  { %1789 = vrot.lane.b32.xlu0 %v1779_v25, %s7921_s24 }
 0xaa7   :  { %v1788_v34 = vpop.permute.xlu1 %1787 }
 0xaa8   :  { %v1798_v5 = vadd.f32 %v1788_v34, %v6635_v18  ;;  %v1829_v34 = vmul.f32 %v5903_v46, %v6893_v28 }
 0xaa9   :  { %v1786_v47 = vpop.permute.xlu0 %1785 }
 0xaaa   :  { %5908 = vtanh.f32 %v1798_v5  ;;  %v1797_v13 = vadd.f32 %v1786_v47, %v6638_v22  ;;  %v1806_v22 = vsub.f32 1.0, %v5901_v62  ;;  %v1808_v47 = vsub.f32 1.0, %v5905_v45 }
 0xaab   :  { %v1792_v58 = vpop.permute.xlu1 %1791 }
 0xaac   :  { %5910 = vtanh.f32 %v1797_v13  ;;  %v1800_v63 = vadd.f32 %v1792_v58, %v6641_v24  ;;  %v1830_v24 = vmul.f32 %v5901_v62, %v6890_v52 }
 0xaad   :  { %v1790_v35 = vpop.permute.xlu0 %1789 }
 0xaae   :  { %5912 = vtanh.f32 %v1800_v63  ;;  %v1799_v38 = vadd.f32 %v1790_v35, %v6644_v27  ;;  %v1832_v63 = vmul.f32 %v5905_v45, %v6898_v49  ;;  %v1839_v49 = vsub.s32 3, %v6810_v48 }
 0xab0   :  { %5914 = vtanh.f32 %v1799_v38  ;;  %v1807_v38 = vsub.f32 1.0, %v5907_v37  ;;  %v6995_v46 = vrot.slane %v6817_v55, %v1839_v49 }
 0xab7   :  { %v5909_v43 = vpop.eup %5908 }
 0xab8   :  { %1815 = vrot.lane.b32.xlu1 %v5909_v43, %s6143_s2  ;;  %v1831_v43 = vmul.f32 %v5907_v37, %v6903_v33 }
 0xab9   :  { %v5911_v53 = vpop.eup %5910 }
 0xaba   :  { %1813 = vrot.lane.b32.xlu0 %v5911_v53, %s6143_s2 }
 0xabb   :  { %v5913_v18 = vpop.eup %5912 }
 0xabc   :  { %1819 = vrot.lane.b32.xlu1 %v5913_v18, %s6143_s2 }
 0xabd   :  { %v5915_v17 = vpop.eup %5914 }
 0xabe   :  { %1817 = vrot.lane.b32.xlu0 %v5915_v17, %s6143_s2 }
 0xb2a   :  { %v1816_v15 = vpop.permute.xlu1 %1815 }
 0xb2b   :  { %v1826_v50 = vmul.f32 %v1816_v15, %v1806_v22 }
 0xb2c   :  { %v1814_v27 = vpop.permute.xlu0 %1813 }
 0xb2d   :  { %v6974_v25 = vadd.f32 %v1830_v24, %v1826_v50  ;;  %v1825_v5 = vmul.f32 %v1814_v27, %v1805_v31  ;;  %v7031_v50 = vld [vmem:[%s7936_s4] ss:$0 sm:$0xff] }
 0xb2e   :  { %v1820_v13 = vpop.permute.xlu1 %1819 }
 0xb2f   :  { %v6977_v58 = vadd.f32 %v1829_v34, %v1825_v5  ;;  %v1828_v35 = vmul.f32 %v1820_v13, %v1808_v47  ;;  %1847 = vrot.lane.b32.xlu1 %v6974_v25, %s6143_s2 }
 0xb30   :  { %v1818_v52 = vpop.permute.xlu0 %1817 }
 0xb31   :  { %v6982_v62 = vadd.f32 %v1832_v63, %v1828_v35  ;;  %v1827_v53 = vmul.f32 %v1818_v52, %v1807_v38  ;;  %1845 = vrot.lane.b32.xlu0 %v6977_v58, %s6143_s2 }
 0xb33   :  { %v6987_v28 = vadd.f32 %v1831_v43, %v1827_v53  ;;  %1851 = vrot.lane.b32.xlu1 %v6982_v62, %s6143_s2 }
 0xb35   :  { %1849 = vrot.lane.b32.xlu0 %v6987_v28, %s6143_s2 }
 0xba1   :  { %v1848_v45 = vpop.permute.xlu1 %1847 }
 0xba2   :  { %v1858_v33 = vmul.f32 %v1848_v45, %v6995_v46 }
 0xba3   :  { %v6998_v37 = vpop.permute.xlu0 %1845 }
 0xba4   :  { %v7001_v18 = vadd.f32 %v1858_v33, %v6917_v3  ;;  %5505 = vmatprep.mubr.msk.f32.mxu0 %vm304_vm0, %v6998_v37  ;;  %v7025_v3 = vld [vmem:[%s7933_s1 + $0x18] sm:$0xff] }
 0xba5   :  { %v1852_v17 = vpop.permute.xlu1 %1851  ;;  %5506 = vmatmul.mubr.msk.f32.vlgmr.msra.gmra.mxu0 %vm304_vm0, %v1848_v45 }
 0xba6   :  { %v1860_v22 = vmul.f32 %v1852_v17, %v6995_v46  ;;  %5526 = vmatpush3.msra.mxu0 %v6843_v54 }
 0xba7   :  { %v7008_v15 = vpop.permute.xlu0 %1849  ;;  %5527 = vmatprep.subr.mxu0 %v6851_v1 }
 0xba8   :  { %v7012_v24 = vadd.f32 %v1860_v22, %v6928_v9  ;;  %5508 = vmatprep.mubr.msk.f32.mxu0 %vm304_vm0, %v7008_v15  ;;  %5528 = vmatpush3.msra.mxu0 %v6851_v1 }
 0xba9   :  { %5509 = vmatmul.mubr.msk.f32.gmra.mxu0 %vm304_vm0, %v1852_v17  ;;  %5529 = vmatprep.subr.mxu0 %v6937_v61 }
 0xbaa   :  { %5530 = vmatpush3.msra.mxu0 %v6937_v61 }
 0xbab   :  { %5531 = vmatprep.subr.mxu0 %v6944_v23 }
 0xbac   :  { %5532 = vmatpush3.msra.mxu0 %v6944_v23 }
 0xbad   :  { %5553 = vmatprep.subr.mxu0 %v7025_v3 }
 0xc65   :  { %v5507_v9 = vpop.f32.mrf.mxu0 }
 0xc66   :  { %v1945_v31 = vadd.f32 %v7031_v50, %v5507_v9 }
 0xc67   :  { %v1939_v27 = vpop.f32.mrf.mxu0 }
 0xc68   :  { %v1940_v34 = vadd.f32 %v7031_v50, %v1939_v27  ;;  %1992 = vrot.lane.b32.xlu1 %v1945_v31, %s7921_s24  ;;  %v1959_v35 = vadd.f32 %v1945_v31, %v6647_v30 }
 0xc69   :  { %v5510_v5 = vpop.f32.mrf.mxu0 }
 0xc6a   :  { %v1955_v47 = vadd.f32 %v7031_v50, %v5510_v5  ;;  %1990 = vrot.lane.b32.xlu0 %v1940_v34, %s7921_s24  ;;  %v1958_v38 = vadd.f32 %v1940_v34, %v6650_v32  ;;  %v4994_v52 = vmul.f32 -1.442695, %v1959_v35 }
 0xc6b   :  { %v1949_v13 = vpop.f32.mrf.mxu0 }
 0xc6c   :  { %v1950_v63 = vadd.f32 %v7031_v50, %v1949_v13  ;;  %1996 = vrot.lane.b32.xlu1 %v1955_v47, %s7921_s24  ;;  %v1961_v43 = vadd.f32 %v1955_v47, %v6655_v39  ;;  %v4993_v53 = vmul.f32 -1.442695, %v1958_v38  ;;  %5916 = vpow2.f32 %v4994_v52 }
 0xc6e   :  { %1994 = vrot.lane.b32.xlu0 %v1950_v63, %s7921_s24  ;;  %v1960_v49 = vadd.f32 %v1950_v63, %v6662_v51  ;;  %v4996_v45 = vmul.f32 -1.442695, %v1961_v43  ;;  %5918 = vpow2.f32 %v4993_v53 }
 0xc70   :  { %v4995_v33 = vmul.f32 -1.442695, %v1960_v49  ;;  %5920 = vpow2.f32 %v4996_v45 }
 0xc72   :  { %5922 = vpow2.f32 %v4995_v33 }
 0xc79   :  { %v5917_v17 = vpop.eup %5916 }
 0xc7a   :  { %v1975_v9 = vadd.f32 1.0, %v5917_v17 }
 0xc7b   :  { %v5919_v22 = vpop.eup %5918 }
 0xc7c   :  { %v1974_v5 = vadd.f32 1.0, %v5919_v22  ;;  %5924 = vrcp.f32 %v1975_v9 }
 0xc7d   :  { %v5921_v27 = vpop.eup %5920 }
 0xc7e   :  { %v1977_v34 = vadd.f32 1.0, %v5921_v27  ;;  %5926 = vrcp.f32 %v1974_v5 }
 0xc7f   :  { %v5923_v31 = vpop.eup %5922 }
 0xc80   :  { %v1976_v13 = vadd.f32 1.0, %v5923_v31  ;;  %5928 = vrcp.f32 %v1977_v34 }
 0xc82   :  { %5930 = vrcp.f32 %v1976_v13 }
 0xc89   :  { %v5925_v47 = vpop.eup %5924 }
 0xc8b   :  { %v5927_v38 = vpop.eup %5926 }
 0xc8d   :  { %v5929_v53 = vpop.eup %5928 }
 0xc8f   :  { %v5931_v33 = vpop.eup %5930 }
 0xcda   :  { %v1993_v63 = vpop.permute.xlu1 %1992 }
 0xcdb   :  { %v2003_v35 = vmul.f32 %v5925_v47, %v1993_v63 }
 0xcdc   :  { %v1991_v52 = vpop.permute.xlu0 %1990 }
 0xcdd   :  { %v2002_v43 = vmul.f32 %v5927_v38, %v1991_v52  ;;  %2012 = vrot.lane.b32.xlu1 %v2003_v35, %s7921_s24 }
 0xcde   :  { %v1997_v49 = vpop.permute.xlu1 %1996 }
 0xcdf   :  { %v2005_v45 = vmul.f32 %v5929_v53, %v1997_v49  ;;  %2010 = vrot.lane.b32.xlu0 %v2002_v43, %s7921_s24 }
 0xce0   :  { %v1995_v17 = vpop.permute.xlu0 %1994 }
 0xce1   :  { %v2004_v22 = vmul.f32 %v5931_v33, %v1995_v17  ;;  %2016 = vrot.lane.b32.xlu1 %v2005_v45, %s7921_s24 }
 0xce3   :  { %2014 = vrot.lane.b32.xlu0 %v2004_v22, %s7921_s24  ;;  %v2030_v22 = vsub.f32 1.0, %v5927_v38 }
 0xd4f   :  { %v2013_v9 = vpop.permute.xlu1 %2012 }
 0xd50   :  { %v2023_v27 = vadd.f32 %v2013_v9, %v6647_v30 }
 0xd51   :  { %v2011_v5 = vpop.permute.xlu0 %2010 }
 0xd52   :  { %5932 = vtanh.f32 %v2023_v27  ;;  %v2022_v31 = vadd.f32 %v2011_v5, %v6650_v32  ;;  %v2031_v32 = vsub.f32 1.0, %v5925_v47  ;;  %v2054_v27 = vmul.f32 %v5927_v38, %v6977_v58 }
 0xd53   :  { %v2017_v34 = vpop.permute.xlu1 %2016 }
 0xd54   :  { %5934 = vtanh.f32 %v2022_v31  ;;  %v2025_v13 = vadd.f32 %v2017_v34, %v6655_v39  ;;  %v2055_v39 = vmul.f32 %v5925_v47, %v6974_v25  ;;  %v2033_v31 = vsub.f32 1.0, %v5929_v53 }
 0xd55   :  { %v2015_v63 = vpop.permute.xlu0 %2014 }
 0xd56   :  { %5936 = vtanh.f32 %v2025_v13  ;;  %v2024_v35 = vadd.f32 %v2015_v63, %v6662_v51  ;;  %v2057_v63 = vmul.f32 %v5929_v53, %v6982_v62  ;;  %v2064_v62 = vsub.s32 4, %v6810_v48 }
 0xd58   :  { %5938 = vtanh.f32 %v2024_v35  ;;  %v7079_v38 = vrot.slane %v6817_v55, %v2064_v62 }
 0xd5f   :  { %v5933_v52 = vpop.eup %5932 }
 0xd60   :  { %2040 = vrot.lane.b32.xlu1 %v5933_v52, %s6143_s2  ;;  %v2032_v52 = vsub.f32 1.0, %v5931_v33 }
 0xd61   :  { %v5935_v43 = vpop.eup %5934 }
 0xd62   :  { %2038 = vrot.lane.b32.xlu0 %v5935_v43, %s6143_s2  ;;  %v2056_v43 = vmul.f32 %v5931_v33, %v6987_v28 }
 0xd63   :  { %v5937_v30 = vpop.eup %5936 }
 0xd64   :  { %2044 = vrot.lane.b32.xlu1 %v5937_v30, %s6143_s2 }
 0xd65   :  { %v5939_v49 = vpop.eup %5938 }
 0xd66   :  { %2042 = vrot.lane.b32.xlu0 %v5939_v49, %s6143_s2 }
 0xdd2   :  { %v2041_v45 = vpop.permute.xlu1 %2040 }
 0xdd3   :  { %v2051_v17 = vmul.f32 %v2041_v45, %v2031_v32 }
 0xdd4   :  { %v2039_v51 = vpop.permute.xlu0 %2038 }
 0xdd5   :  { %v7058_v9 = vadd.f32 %v2055_v39, %v2051_v17  ;;  %v2050_v5 = vmul.f32 %v2039_v51, %v2030_v22 }
 0xdd6   :  { %v2045_v34 = vpop.permute.xlu1 %2044 }
 0xdd7   :  { %v7061_v13 = vadd.f32 %v2054_v27, %v2050_v5  ;;  %v2053_v35 = vmul.f32 %v2045_v34, %v2033_v31  ;;  %2072 = vrot.lane.b32.xlu1 %v7058_v9, %s6143_s2 }
 0xdd8   :  { %v2043_v25 = vpop.permute.xlu0 %2042 }
 0xdd9   :  { %v7066_v47 = vadd.f32 %v2057_v63, %v2053_v35  ;;  %v2052_v30 = vmul.f32 %v2043_v25, %v2032_v52  ;;  %2070 = vrot.lane.b32.xlu0 %v7061_v13, %s6143_s2 }
 0xddb   :  { %v7071_v58 = vadd.f32 %v2056_v43, %v2052_v30  ;;  %2076 = vrot.lane.b32.xlu1 %v7066_v47, %s6143_s2 }
 0xddd   :  { %2074 = vrot.lane.b32.xlu0 %v7071_v58, %s6143_s2 }
 0xe49   :  { %v2073_v53 = vpop.permute.xlu1 %2072 }
 0xe4a   :  { %v2083_v28 = vmul.f32 %v2073_v53, %v7079_v38 }
 0xe4b   :  { %v7082_v33 = vpop.permute.xlu0 %2070 }
 0xe4c   :  { %v7085_v49 = vadd.f32 %v2083_v28, %v7001_v18  ;;  %5519 = vmatprep.mubr.msk.f32.mxu1 %vm304_vm0, %v7082_v33 }
 0xe4d   :  { %v2077_v32 = vpop.permute.xlu1 %2076  ;;  %5520 = vmatmul.mubr.msk.f32.vlgmr.msra.gmra.mxu1 %vm304_vm0, %v2073_v53 }
 0xe4e   :  { %v2085_v45 = vmul.f32 %v2077_v32, %v7079_v38  ;;  %5540 = vmatpush3.msra.mxu1 %v6843_v54 }
 0xe4f   :  { %v7092_v39 = vpop.permute.xlu0 %2074  ;;  %5541 = vmatprep.subr.mxu1 %v6851_v1 }
 0xe50   :  { %v7096_v17 = vadd.f32 %v2085_v45, %v7012_v24  ;;  %5522 = vmatprep.mubr.msk.f32.mxu1 %vm304_vm0, %v7092_v39  ;;  %5542 = vmatpush3.msra.mxu1 %v6851_v1 }
 0xe51   :  { %5523 = vmatmul.mubr.msk.f32.gmra.mxu1 %vm304_vm0, %v2077_v32  ;;  %5543 = vmatprep.subr.mxu1 %v6937_v61 }
 0xe52   :  { %5544 = vmatpush3.msra.mxu1 %v6937_v61 }
 0xe53   :  { %5545 = vmatprep.subr.mxu1 %v6944_v23 }
 0xe54   :  { %5546 = vmatpush3.msra.mxu1 %v6944_v23 }
 0xf0d   :  { %v5521_v54 = vpop.f32.mrf.mxu1 }
 0xf0e   :  { %v2170_v18 = vadd.f32 %v7031_v50, %v5521_v54 }
 0xf0f   :  { %v2164_v24 = vpop.f32.mrf.mxu1 }
 0xf10   :  { %v2165_v22 = vadd.f32 %v7031_v50, %v2164_v24  ;;  %2217 = vrot.lane.b32.xlu1 %v2170_v18, %s7921_s24  ;;  %v2184_v23 = vadd.f32 %v2170_v18, %v6668_v57 }
 0xf11   :  { %v5524_v51 = vpop.f32.mrf.mxu1 }
 0xf12   :  { %v2180_v1 = vadd.f32 %v7031_v50, %v5524_v51  ;;  %2215 = vrot.lane.b32.xlu0 %v2165_v22, %s7921_s24  ;;  %v2183_v5 = vadd.f32 %v2165_v22, %v6676_v4  ;;  %v5002_v31 = vmul.f32 -1.442695, %v2184_v23 }
 0xf13   :  { %v2174_v27 = vpop.f32.mrf.mxu1 }
 0xf14   :  { %v2175_v61 = vadd.f32 %v7031_v50, %v2174_v27  ;;  %2221 = vrot.lane.b32.xlu1 %v2180_v1, %s7921_s24  ;;  %v2186_v34 = vadd.f32 %v2180_v1, %v6680_v7  ;;  %v5001_v63 = vmul.f32 -1.442695, %v2183_v5  ;;  %5940 = vpow2.f32 %v5002_v31 }
 0xf16   :  { %2219 = vrot.lane.b32.xlu0 %v2175_v61, %s7921_s24  ;;  %v2185_v35 = vadd.f32 %v2175_v61, %v6684_v10  ;;  %v5004_v52 = vmul.f32 -1.442695, %v2186_v34  ;;  %5942 = vpow2.f32 %v5001_v63 }
 0xf18   :  { %v5003_v25 = vmul.f32 -1.442695, %v2185_v35  ;;  %5944 = vpow2.f32 %v5004_v52 }
 0xf1a   :  { %5946 = vpow2.f32 %v5003_v25 }
 0xf21   :  { %v5941_v43 = vpop.eup %5940 }
 0xf22   :  { %v2200_v62 = vadd.f32 1.0, %v5941_v43 }
 0xf23   :  { %v5943_v30 = vpop.eup %5942 }
 0xf24   :  { %v2199_v28 = vadd.f32 1.0, %v5943_v30  ;;  %5948 = vrcp.f32 %v2200_v62 }
 0xf25   :  { %v5945_v53 = vpop.eup %5944 }
 0xf26   :  { %v2202_v45 = vadd.f32 1.0, %v5945_v53  ;;  %5950 = vrcp.f32 %v2199_v28 }
 0xf27   :  { %v5947_v32 = vpop.eup %5946 }
 0xf28   :  { %v2201_v54 = vadd.f32 1.0, %v5947_v32  ;;  %5952 = vrcp.f32 %v2202_v45 }
 0xf2a   :  { %5954 = vrcp.f32 %v2201_v54 }
 0xf31   :  { %v5949_v18 = vpop.eup %5948 }
 0xf33   :  { %v5951_v51 = vpop.eup %5950 }
 0xf35   :  { %v5953_v61 = vpop.eup %5952 }
 0xf37   :  { %v5955_v31 = vpop.eup %5954 }
 0xf82   :  { %v2218_v24 = vpop.permute.xlu1 %2217 }
 0xf83   :  { %v2228_v22 = vmul.f32 %v5949_v18, %v2218_v24 }
 0xf84   :  { %v2216_v1 = vpop.permute.xlu0 %2215 }
 0xf85   :  { %v2227_v27 = vmul.f32 %v5951_v51, %v2216_v1  ;;  %2237 = vrot.lane.b32.xlu1 %v2228_v22, %s7921_s24  ;;  %v2255_v1 = vsub.f32 1.0, %v5951_v51 }
 0xf86   :  { %v2222_v23 = vpop.permute.xlu1 %2221 }
 0xf87   :  { %v2230_v5 = vmul.f32 %v5953_v61, %v2222_v23  ;;  %2235 = vrot.lane.b32.xlu0 %v2227_v27, %s7921_s24  ;;  %v2279_v23 = vmul.f32 %v5951_v51, %v7061_v13  ;;  %v1407_v51 = vmul.f32 %v6830_v2, %v6825_v42 }
 0xf88   :  { %v2220_v34 = vpop.permute.xlu0 %2219 }
 0xf89   :  { %v2229_v63 = vmul.f32 %v5955_v31, %v2220_v34  ;;  %2241 = vrot.lane.b32.xlu1 %v2230_v5, %s7921_s24  ;;  %v2258_v34 = vsub.f32 1.0, %v5953_v61 }
 0xf8b   :  { %2239 = vrot.lane.b32.xlu0 %v2229_v63, %s7921_s24 }
 0xff7   :  { %v2238_v35 = vpop.permute.xlu1 %2237 }
 0xff8   :  { %v2248_v52 = vadd.f32 %v2238_v35, %v6668_v57 }
 0xff9   :  { %v2236_v25 = vpop.permute.xlu0 %2235 }
 0xffa   :  { %5956 = vtanh.f32 %v2248_v52  ;;  %v2247_v43 = vadd.f32 %v2236_v25, %v6676_v4  ;;  %v2256_v4 = vsub.f32 1.0, %v5949_v18  ;;  %v2282_v52 = vmul.f32 %v5953_v61, %v7066_v47  ;;  %v2770_v47 = vld [vmem:[%s7939_s25 + $0x8] sm:$0xff] }
 0xffb   :  { %v2242_v30 = vpop.permute.xlu1 %2241  ;;  %v2289_v61 = vsub.s32 5, %v6810_v48 }
 0xffc   :  { %5958 = vtanh.f32 %v2247_v43  ;;  %v2250_v62 = vadd.f32 %v2242_v30, %v6680_v7  ;;  %v2280_v7 = vmul.f32 %v5949_v18, %v7058_v9  ;;  %v2257_v43 = vsub.f32 1.0, %v5955_v31 }
 0xffd   :  { %v2240_v53 = vpop.permute.xlu0 %2239  ;;  %v2281_v30 = vmul.f32 %v5955_v31, %v7071_v58  ;;  %v2769_v58 = vld [vmem:[%s7939_s25] sm:$0xff]  ;;  %v1182_v31 = vmul.f32 %v6741_v59, %v6822_v20 }
 0xffe   :  { %5960 = vtanh.f32 %v2250_v62  ;;  %v2249_v28 = vadd.f32 %v2240_v53, %v6684_v10  ;;  %v1632_v53 = vmul.f32 %v6914_v40, %v6911_v56 }
0x1000   :  { %5962 = vtanh.f32 %v2249_v28  ;;  %v1411_v28 = vadd.f32 %v1407_v51, %v1182_v31 }
0x1007   :  { %v5957_v32 = vpop.eup %5956 }
0x1008   :  { %2265 = vrot.lane.b32.xlu1 %v5957_v32, %s6143_s2  ;;  %v1857_v32 = vmul.f32 %v6998_v37, %v6995_v46 }
0x1009   :  { %v5959_v45 = vpop.eup %5958 }
0x100a   :  { %2263 = vrot.lane.b32.xlu0 %v5959_v45, %s6143_s2  ;;  %v7166_v45 = vrot.slane %v6817_v55, %v2289_v61 }
0x100b   :  { %v5961_v57 = vpop.eup %5960 }
0x100c   :  { %2269 = vrot.lane.b32.xlu1 %v5961_v57, %s6143_s2  ;;  %v1636_v57 = vadd.f32 %v1632_v53, %v1411_v28 }
0x100d   :  { %v5963_v54 = vpop.eup %5962 }
0x100e   :  { %2267 = vrot.lane.b32.xlu0 %v5963_v54, %s6143_s2  ;;  %v2082_v54 = vmul.f32 %v7082_v33, %v7079_v38 }
0x107a   :  { %v2266_v24 = vpop.permute.xlu1 %2265 }
0x107b   :  { %v2276_v22 = vmul.f32 %v2266_v24, %v2256_v4  ;;  %v1861_v4 = vadd.f32 %v1857_v32, %v1636_v57 }
0x107c   :  { %v2264_v10 = vpop.permute.xlu0 %2263 }
0x107d   :  { %v7131_v27 = vadd.f32 %v2280_v7, %v2276_v22  ;;  %v2275_v5 = vmul.f32 %v2264_v10, %v2255_v1  ;;  %v2086_v59 = vadd.f32 %v2082_v54, %v1861_v4 }
0x107e   :  { %v2270_v63 = vpop.permute.xlu1 %2269 }
0x107f   :  { %v7134_v35 = vadd.f32 %v2279_v23, %v2275_v5  ;;  %v2278_v25 = vmul.f32 %v2270_v63, %v2258_v34  ;;  %2297 = vrot.lane.b32.xlu1 %v7131_v27, %s6143_s2  ;;  %v6068_v23 = vld [vmem:[%s7933_s1] sm:$0xff] }
0x1080   :  { %v2268_v9 = vpop.permute.xlu0 %2267 }
0x1081   :  { %v7139_v18 = vadd.f32 %v2282_v52, %v2278_v25  ;;  %v2277_v62 = vmul.f32 %v2268_v9, %v2257_v43  ;;  %2295 = vrot.lane.b32.xlu0 %v7134_v35, %s6143_s2 }
0x1083   :  { %v7144_v13 = vadd.f32 %v2281_v30, %v2277_v62  ;;  %2301 = vrot.lane.b32.xlu1 %v7139_v18, %s6143_s2 }
0x1085   :  { %2299 = vrot.lane.b32.xlu0 %v7144_v13, %s6143_s2 }
0x1087   :  { %2781 = vperm.xlu1 %5819, %v2770_v47  }
0x1089   :  { %2778 = vperm.xlu0 %5818, %v2769_v58  }
0x10f1   :  { %v2298_v2 = vpop.permute.xlu1 %2297 }
0x10f2   :  { %v2308_v24 = vmul.f32 %v2298_v2, %v7166_v45 }
0x10f3   :  { %v2296_v7 = vpop.permute.xlu0 %2295 }
0x10f4   :  { %v7172_v22 = vadd.f32 %v2308_v24, %v7085_v49  ;;  %v2307_v40 = vmul.f32 %v2296_v7, %v7166_v45  ;;  %5533 = vmatprep.mubr.msk.f32.mxu0 %vm304_vm0, %v2296_v7  ;;  %v6066_v49 = vld [vmem:[%s7933_s1 + $0x10] sm:$0xff] }
0x10f5   :  { %v2302_v37 = vpop.permute.xlu1 %2301  ;;  %5534 = vmatmul.mubr.msk.f32.vlgmr.msra.gmra.mxu0 %vm304_vm0, %v2298_v2 }
0x10f6   :  { %v7177_v55 = vadd.f32 %v2307_v40, %v2086_v59  ;;  %v2310_v33 = vmul.f32 %v2302_v37, %v7166_v45  ;;  %5554 = vmatpush3.msra.mxu0 %v7025_v3  ;;  %v6067_v3 = vld [vmem:[%s7933_s1 + $0x8] sm:$0xff]  ;;  %s6136_s1 = smov 0  }
0x10f7   :  { %v7181_v1 = vpop.permute.xlu0 %2299  ;;  %5555 = vmatprep.subr.mxu0 %v6066_v49 }
0x10f8   :  { %v7187_v10 = vadd.f32 %v2310_v33, %v7096_v17  ;;  %5536 = vmatprep.mubr.msk.f32.mxu0 %vm304_vm0, %v7181_v1  ;;  %5556 = vmatpush3.msra.mxu0 %v6066_v49 }
0x10f9   :  { %5537 = vmatmul.mubr.msk.f32.gmra.mxu0 %vm304_vm0, %v2302_v37  ;;  %5557 = vmatprep.subr.mxu0 %v6067_v3 }
0x10fa   :  { %5558 = vmatpush3.msra.mxu0 %v6067_v3 }
0x10fb   :  { %5559 = vmatprep.subr.mxu0 %v6068_v23 }
0x10fc   :  { %5560 = vmatpush3.msra.mxu0 %v6068_v23 }
0x10fd   :  { %5593 = vmatprep.subr.mxu0 %v6141_v44 }
0x1102   :  { %v2782_v17 = vpop.permute.xlu1 %2781 }
0x1103   :  { %vm2802_vm3 = vcmp.eq.s32.totalorder %v6396_v41, %v2782_v17 }
0x1104   :  { %v2779_v5 = vpop.permute.xlu0 %2778  ;;  %v5022_v63 = vsel %vm2802_vm3, 1.0, %v6141_v44 }
0x1105   :  { %vm2801_vm4 = vcmp.eq.s32.totalorder %v6396_v41, %v2779_v5 }
0x1106   :  { %v5021_v34 = vsel %vm2801_vm4, 1.0, %v6141_v44 }
0x1107   :  { %5561 = vmatprep.mubr.msk.f32.mxu0 %vm304_vm0, %v5021_v34 }
0x1108   :  { %5562 = vmatmul.mubr.msk.f32.vlgmr.msra.gmra.mxu0 %vm304_vm0, %v5022_v63 }
0x11b5   :  { %v5535_v52 = vpop.f32.mrf.mxu0 }
0x11b6   :  { %v2395_v25 = vadd.f32 %v7031_v50, %v5535_v52 }
0x11b7   :  { %v2389_v43 = vpop.f32.mrf.mxu0 }
0x11b8   :  { %v2390_v9 = vadd.f32 %v7031_v50, %v2389_v43  ;;  %2442 = vrot.lane.b32.xlu1 %v2395_v25, %s7921_s24  ;;  %v2409_v51 = vadd.f32 %v2395_v25, %v6687_v12 }
0x11b9   :  { %v5538_v30 = vpop.f32.mrf.mxu0 }
0x11ba   :  { %v2405_v62 = vadd.f32 %v7031_v50, %v5538_v30  ;;  %2440 = vrot.lane.b32.xlu0 %v2390_v9, %s7921_s24  ;;  %v2408_v61 = vadd.f32 %v2390_v9, %v6690_v16  ;;  %v5010_v31 = vmul.f32 -1.442695, %v2409_v51 }
0x11bb   :  { %v2399_v47 = vpop.f32.mrf.mxu0 }
0x11bc   :  { %v2400_v58 = vadd.f32 %v7031_v50, %v2399_v47  ;;  %2446 = vrot.lane.b32.xlu1 %v2405_v62, %s7921_s24  ;;  %v2411_v53 = vadd.f32 %v2405_v62, %v6693_v19  ;;  %v5009_v28 = vmul.f32 -1.442695, %v2408_v61  ;;  %5964 = vpow2.f32 %v5010_v31 }
0x11be   :  { %2444 = vrot.lane.b32.xlu0 %v2400_v58, %s7921_s24  ;;  %v2410_v32 = vadd.f32 %v2400_v58, %v6696_v21  ;;  %v5012_v57 = vmul.f32 -1.442695, %v2411_v53  ;;  %5966 = vpow2.f32 %v5009_v28 }
0x11c0   :  { %v5011_v54 = vmul.f32 -1.442695, %v2410_v32  ;;  %5968 = vpow2.f32 %v5012_v57 }
0x11c2   :  { %5970 = vpow2.f32 %v5011_v54  ;;  %v2773_v54 = vld [vmem:[%s7939_s25 + $0x20] sm:$0xff] }
0x11c9   :  { %v5965_v50 = vpop.eup %5964 }
0x11ca   :  { %v2425_v4 = vadd.f32 1.0, %v5965_v50  ;;  %v2776_v50 = vld [vmem:[%s7939_s25 + $0x38] sm:$0xff] }
0x11cb   :  { %v5967_v2 = vpop.eup %5966 }
0x11cc   :  { %v2424_v7 = vadd.f32 1.0, %v5967_v2  ;;  %5972 = vrcp.f32 %v2425_v4  ;;  %v2775_v2 = vld [vmem:[%s7939_s25 + $0x30] sm:$0xff]  ;;  %v7262_v4 = vld [vmem:[%s7898_s9 + $0x18] sm:$0xff] }
0x11cd   :  { %v5969_v24 = vpop.eup %5968  ;;  %5594 = vmatpush3.msra.mxu0 %v7262_v4 }
0x11ce   :  { %v2427_v40 = vadd.f32 1.0, %v5969_v24  ;;  %5974 = vrcp.f32 %v2424_v7  ;;  %v7267_v24 = vld [vmem:[%s7898_s9 + $0x10] sm:$0xff]  ;;  %5595 = vmatprep.subr.mxu0 %v6141_v44  ;;  %v7274_v7 = vld [vmem:[%s7898_s9 + $0x8] sm:$0xff] }
0x11cf   :  { %v5971_v59 = vpop.eup %5970  ;;  %5596 = vmatpush3.msra.mxu0 %v7267_v24 }
0x11d0   :  { %v2426_v37 = vadd.f32 1.0, %v5971_v59  ;;  %5976 = vrcp.f32 %v2427_v40  ;;  %5597 = vmatprep.subr.mxu0 %v6141_v44  ;;  %v7281_v59 = vld [vmem:[%s7898_s9] sm:$0xff]  ;;  %v7290_v40 = vld [vmem:[%s7897_s8 + $0x18] sm:$0xff] }
0x11d1   :  { %5598 = vmatpush3.msra.mxu0 %v7274_v7  ;;  %5573 = vmatprep.subr.mxu1 %v7290_v40 }
0x11d2   :  { %5978 = vrcp.f32 %v2426_v37  ;;  %5599 = vmatprep.subr.mxu0 %v6141_v44 }
0x11d3   :  { %5600 = vmatpush3.msra.mxu0 %v7281_v59 }
0x11d4   :  { %5615 = vmatprep.subr.mxu0 %v6141_v44 }
0x11d9   :  { %v7217_v33 = vpop.eup %5972 }
0x11da   :  { %v2481_v37 = vsub.f32 1.0, %v7217_v33 }
0x11db   :  { %v7220_v23 = vpop.eup %5974 }
0x11dd   :  { %v7224_v34 = vpop.eup %5976 }
0x11df   :  { %v7228_v25 = vpop.eup %5978 }
0x122a   :  { %v2443_v49 = vpop.permute.xlu1 %2442 }
0x122b   :  { %v2453_v3 = vmul.f32 %v7217_v33, %v2443_v49 }
0x122c   :  { %v2441_v17 = vpop.permute.xlu0 %2440 }
0x122d   :  { %v2452_v5 = vmul.f32 %v7220_v23, %v2441_v17  ;;  %2462 = vrot.lane.b32.xlu1 %v2453_v3, %s7921_s24  ;;  %v2505_v3 = vmul.f32 %v7217_v33, %v7131_v27  ;;  %v2482_v27 = vsub.f32 1.0, %v7228_v25 }
0x122e   :  { %v2447_v63 = vpop.permute.xlu1 %2446 }
0x122f   :  { %v2455_v52 = vmul.f32 %v7224_v34, %v2447_v63  ;;  %2460 = vrot.lane.b32.xlu0 %v2452_v5, %s7921_s24  ;;  %v2480_v5 = vsub.f32 1.0, %v7220_v23 }
0x1230   :  { %v2445_v43 = vpop.permute.xlu0 %2444 }
0x1231   :  { %v2454_v9 = vmul.f32 %v7228_v25, %v2445_v43  ;;  %2466 = vrot.lane.b32.xlu1 %v2455_v52, %s7921_s24  ;;  %v2504_v43 = vmul.f32 %v7220_v23, %v7134_v35  ;;  %v2506_v35 = vmul.f32 %v7228_v25, %v7144_v13 }
0x1233   :  { %2464 = vrot.lane.b32.xlu0 %v2454_v9, %s7921_s24  ;;  %s7940_s24 = smov 64  }
0x129f   :  { %v2463_v30 = vpop.permute.xlu1 %2462 }
0x12a0   :  { %v2473_v62 = vadd.f32 %v2463_v30, %v6687_v12  ;;  %v2483_v30 = vsub.f32 1.0, %v7224_v34 }
0x12a1   :  { %v2461_v47 = vpop.permute.xlu0 %2460 }
0x12a2   :  { %5980 = vtanh.f32 %v2473_v62  ;;  %v2472_v58 = vadd.f32 %v2461_v47, %v6690_v16  ;;  %v2772_v16 = vld [vmem:[%s7939_s25 + $0x18] sm:$0xff] }
0x12a3   :  { %v2467_v51 = vpop.permute.xlu1 %2466 }
0x12a4   :  { %5982 = vtanh.f32 %v2472_v58  ;;  %v2475_v61 = vadd.f32 %v2467_v51, %v6693_v19  ;;  %v2771_v19 = vld [vmem:[%s7939_s25 + $0x10] sm:$0xff]  ;;  %v2507_v58 = vmul.f32 %v7224_v34, %v7139_v18 }
0x12a5   :  { %v2465_v31 = vpop.permute.xlu0 %2464 }
0x12a6   :  { %5984 = vtanh.f32 %v2475_v61  ;;  %v2474_v53 = vadd.f32 %v2465_v31, %v6696_v21  ;;  %v2774_v21 = vld [vmem:[%s7939_s25 + $0x28] sm:$0xff] }
0x12a8   :  { %5986 = vtanh.f32 %v2474_v53 }
0x12af   :  { %v5981_v28 = vpop.eup %5980 }
0x12b0   :  { %2490 = vrot.lane.b32.xlu1 %v5981_v28, %s6143_s2 }
0x12b1   :  { %v5983_v32 = vpop.eup %5982 }
0x12b2   :  { %2488 = vrot.lane.b32.xlu0 %v5983_v32, %s6143_s2 }
0x12b3   :  { %v5985_v12 = vpop.eup %5984 }
0x12b4   :  { %2494 = vrot.lane.b32.xlu1 %v5985_v12, %s6143_s2 }
0x12b5   :  { %v5987_v57 = vpop.eup %5986 }
0x12b6   :  { %2492 = vrot.lane.b32.xlu0 %v5987_v57, %s6143_s2 }
0x12b8   :  { %2787 = vperm.xlu1 %5819, %v2772_v16  }
0x12ba   :  { %2784 = vperm.xlu0 %5818, %v2771_v19  }
0x12bc   :  { %2793 = vperm.xlu1 %5819, %v2774_v21  }
0x12be   :  { %2790 = vperm.xlu0 %5818, %v2773_v54   ;;  %v7356_v54 = vld [vmem:[%s7938_s7] sm:$0xff] }
0x12c0   :  { %2799 = vperm.xlu1 %5819, %v2776_v50  }
0x12c2   :  { %2796 = vperm.xlu0 %5818, %v2775_v2  }
0x1322   :  { %v2491_v49 = vpop.permute.xlu1 %2490 }
0x1323   :  { %v2501_v17 = vmul.f32 %v2491_v49, %v2481_v37 }
0x1324   :  { %v2489_v63 = vpop.permute.xlu0 %2488 }
0x1325   :  { %v7297_v52 = vadd.f32 %v2505_v3, %v2501_v17  ;;  %v2500_v9 = vmul.f32 %v2489_v63, %v2480_v5  ;;  %v2956_v5 = vld [vmem:[%s7897_s8 + $0x10] sm:$0xff]  ;;  %v5563_v63 = vpop.f32.mrf.mxu0 }
0x1326   :  { %v2495_v62 = vpop.permute.xlu1 %2494 }
0x1327   :  { %v7302_v47 = vadd.f32 %v2504_v43, %v2500_v9  ;;  %v2503_v51 = vmul.f32 %v2495_v62, %v2483_v30  ;;  %2522 = vrot.lane.b32.xlu1 %v7297_v52, %s6143_s2 }
0x1328   :  { %v2493_v33 = vpop.permute.xlu0 %2492 }
0x1329   :  { %v7309_v61 = vadd.f32 %v2507_v58, %v2503_v51  ;;  %v2502_v23 = vmul.f32 %v2493_v33, %v2482_v27  ;;  %2520 = vrot.lane.b32.xlu0 %v7302_v47, %s6143_s2  ;;  %v2915_v51 = vpop.f32.mrf.mxu0 }
0x132b   :  { %v7315_v31 = vadd.f32 %v2506_v35, %v2502_v23  ;;  %2526 = vrot.lane.b32.xlu1 %v7309_v61, %s6143_s2 }
0x132d   :  { %2524 = vrot.lane.b32.xlu0 %v7315_v31, %s6143_s2 }
0x1333   :  { %v2788_v18 = vpop.permute.xlu1 %2787 }
0x1334   :  { %vm2804_vm5 = vcmp.eq.s32.totalorder %v6396_v41, %v2788_v18  ;;  %v7408_v18 = vld [vmem:[%s7900_s11] ss:$0 sm:$0xff] }
0x1335   :  { %v2785_v34 = vpop.permute.xlu0 %2784  ;;  %v5024_v53 = vsel %vm2804_vm5, 1.0, %v6141_v44 }
0x1336   :  { %vm2803_vm6 = vcmp.eq.s32.totalorder %v6396_v41, %v2785_v34 }
0x1337   :  { %v5023_v13 = vsel %vm2803_vm6, 1.0, %v6141_v44  ;;  %v2794_v25 = vpop.permute.xlu1 %2793 }
0x1338   :  { %5564 = vmatprep.mubr.msk.f32.mxu0 %vm304_vm0, %v5023_v13  ;;  %vm2806_vm7 = vcmp.eq.s32.totalorder %v6396_v41, %v2794_v25 }
0x1339   :  { %5565 = vmatmul.mubr.msk.f32.gmra.mxu0 %vm304_vm0, %v5024_v53  ;;  %v2791_v28 = vpop.permute.xlu0 %2790  ;;  %v5026_v57 = vsel %vm2806_vm7, 1.0, %v6141_v44 }
0x133a   :  { %vm2805_vm8 = vcmp.eq.s32.totalorder %v6396_v41, %v2791_v28 }
0x133b   :  { %v5025_v32 = vsel %vm2805_vm8, 1.0, %v6141_v44  ;;  %v2800_v12 = vpop.permute.xlu1 %2799 }
0x133c   :  { %5567 = vmatprep.mubr.msk.f32.mxu0 %vm304_vm0, %v5025_v32  ;;  %vm2808_vm9 = vcmp.eq.s32.totalorder %v6396_v41, %v2800_v12 }
0x133d   :  { %5568 = vmatmul.mubr.msk.f32.gmra.mxu0 %vm304_vm0, %v5026_v57  ;;  %v2797_v16 = vpop.permute.xlu0 %2796  ;;  %v5028_v21 = vsel %vm2808_vm9, 1.0, %v6141_v44 }
0x133e   :  { %vm2807_vm10 = vcmp.eq.s32.totalorder %v6396_v41, %v2797_v16  ;;  %v2514_v41 = vsub.s32 6, %v6810_v48  ;;  %v7427_v16 = vld [vmem:[%s7899_s10] ss:$0 sm:$0xff] }
0x133f   :  { %v5027_v19 = vsel %vm2807_vm10, 1.0, %v6141_v44 }
0x1340   :  { %5570 = vmatprep.mubr.msk.f32.mxu0 %vm304_vm0, %v5027_v19  ;;  %v7359_v50 = vrot.slane %v7356_v54, %v2514_v41 }
0x1341   :  { %5571 = vmatmul.mubr.msk.f32.gmra.mxu0 %vm304_vm0, %v5028_v21 }
0x1342   :  { %5601 = vmatprep.mubr.msk.f32.mxu0 %vm6144_vm11, %v6141_v44 }
0x1345   :  { %5602 = vmatmul.mubr.f32.vlgmr.msra.gmra.mxu0 %v6141_v44 }
0x1346   :  { %5616 = vmatpush3.msra.mxu0 %v7262_v4  ;;  %5623 = vmatprep.mubr.msk.f32.mxu0 %vm6144_vm11, %v6141_v44 }
0x1347   :  { %5617 = vmatprep.subr.mxu0 %v6141_v44 }
0x1348   :  { %5618 = vmatpush3.msra.mxu0 %v7267_v24 }
0x1349   :  { %5619 = vmatprep.subr.mxu0 %v6141_v44 }
0x134a   :  { %5620 = vmatpush3.msra.mxu0 %v7274_v7 }
0x134b   :  { %5621 = vmatprep.subr.mxu0 %v6141_v44 }
0x134c   :  { %5622 = vmatpush3.msra.mxu0 %v7281_v59 }
0x134d   :  { %5637 = vmatprep.subr.mxu0 %v6141_v44 }
0x1399   :  { %v2523_v2 = vpop.permute.xlu1 %2522 }
0x139a   :  { %v2533_v37 = vmul.f32 %v2523_v2, %v7359_v50 }
0x139b   :  { %v2521_v49 = vpop.permute.xlu0 %2520 }
0x139c   :  { %v7363_v3 = vadd.f32 %v2533_v37, %v7172_v22  ;;  %v2532_v17 = vmul.f32 %v2521_v49, %v7359_v50  ;;  %5547 = vmatprep.mubr.msk.f32.mxu1 %vm304_vm0, %v2521_v49  ;;  %v2955_v22 = vld [vmem:[%s7897_s8 + $0x8] sm:$0xff] }
0x139d   :  { %v2527_v43 = vpop.permute.xlu1 %2526  ;;  %5548 = vmatmul.mubr.msk.f32.vlgmr.msra.gmra.mxu1 %vm304_vm0, %v2523_v2 }
0x139e   :  { %v7372_v9 = vadd.f32 %v2532_v17, %v7177_v55  ;;  %v2535_v30 = vmul.f32 %v2527_v43, %v7359_v50  ;;  %5574 = vmatpush3.msra.mxu1 %v7290_v40  ;;  %v2954_v55 = vld [vmem:[%s7897_s8] sm:$0xff] }
0x139f   :  { %5575 = vmatprep.subr.mxu1 %v2956_v5  ;;  %v7379_v62 = vpop.permute.xlu0 %2524 }
0x13a0   :  { %v7382_v58 = vadd.f32 %v2535_v30, %v7187_v10  ;;  %5576 = vmatpush3.msra.mxu1 %v2956_v5  ;;  %5550 = vmatprep.mubr.msk.f32.mxu1 %vm304_vm0, %v7379_v62 }
0x13a1   :  { %5577 = vmatprep.subr.mxu1 %v2955_v22  ;;  %5551 = vmatmul.mubr.msk.f32.gmra.mxu1 %vm304_vm0, %v2527_v43 }
0x13a2   :  { %5578 = vmatpush3.msra.mxu1 %v2955_v22  ;;  %5581 = vmatprep.mubr.msk.f32.mxu1 %vm304_vm0, %v2915_v51 }
0x13a3   :  { %5579 = vmatprep.subr.mxu1 %v2954_v55 }
0x13a4   :  { %5580 = vmatpush3.msra.mxu1 %v2954_v55 }
0x13a5   :  { %5582 = vmatmul.mubr.msk.f32.vlgmr.msra.gmra.mxu1 %vm304_vm0, %v5563_v63  ;;  %5604 = vmatprep.subr.mxu1 %v6141_v44 }
0x13a6   :  { %5605 = vmatpush3.msra.mxu1 %v7262_v4 }
0x13a7   :  { %5606 = vmatprep.subr.mxu1 %v6141_v44 }
0x13a8   :  { %5607 = vmatpush3.msra.mxu1 %v7267_v24 }
0x13a9   :  { %5608 = vmatprep.subr.mxu1 %v6141_v44 }
0x13aa   :  { %5609 = vmatpush3.msra.mxu1 %v7274_v7 }
0x13ab   :  { %5610 = vmatprep.subr.mxu1 %v6141_v44 }
0x13ac   :  { %5611 = vmatpush3.msra.mxu1 %v7281_v59 }
0x13ad   :  { %5626 = vmatprep.subr.mxu1 %v6141_v44 }
0x13f9   :  { %v5566_v10 = vpop.f32.mrf.mxu0 }
0x13fb   :  { %v2925_v40 = vpop.f32.mrf.mxu0 }
0x13fc   :  { %5584 = vmatprep.mubr.msk.f32.mxu1 %vm304_vm0, %v2925_v40 }
0x13fd   :  { %v5569_v27 = vpop.f32.mrf.mxu0  ;;  %5585 = vmatmul.mubr.msk.f32.gmra.mxu1 %vm304_vm0, %v5566_v10 }
0x13ff   :  { %v2935_v33 = vpop.f32.mrf.mxu0 }
0x1400   :  { %5587 = vmatprep.mubr.msk.f32.mxu1 %vm304_vm0, %v2935_v33 }
0x1401   :  { %v5572_v35 = vpop.f32.mrf.mxu0  ;;  %5588 = vmatmul.mubr.msk.f32.gmra.mxu1 %vm304_vm0, %v5569_v27 }
0x1403   :  { %v2945_v23 = vpop.f32.mrf.mxu0 }
0x1404   :  { %5590 = vmatprep.mubr.msk.f32.mxu1 %vm304_vm0, %v2945_v23 }
0x1405   :  { %5591 = vmatmul.mubr.msk.f32.gmra.mxu1 %vm304_vm0, %v5572_v35  ;;  %v3171_v34 = vpop.f32.mrf.mxu0 }
0x1406   :  { %v3172_v13 = vadd.f32 %v7408_v18, %v3171_v34  ;;  %5612 = vmatprep.mubr.msk.f32.mxu1 %vm6144_vm11, %v6141_v44 }
0x1407   :  { %v5603_v25 = vpop.f32.mrf.mxu0 }
0x1408   :  { %3183 = vrot.lane.b32.xlu0 %v3172_v13, %s7940_s24 }
0x145d   :  { %v7416_v53 = vpop.f32.mrf.mxu1 }
0x145f   :  { %v7418_v28 = vpop.f32.mrf.mxu1 }
0x1461   :  { %v7420_v32 = vpop.f32.mrf.mxu1 }
0x1463   :  { %v7422_v12 = vpop.f32.mrf.mxu1 }
0x1465   :  { %v5583_v57 = vpop.f32.mrf.mxu1 }
0x1467   :  { %v3055_v19 = vpop.f32.mrf.mxu1 }
0x1468   :  { %v3056_v21 = vadd.f32 %v7427_v16, %v3055_v19 }
0x146a   :  { %v3175_v41 = vadd.f32 %v3172_v13, %v3056_v21 }
0x146c   :  { %v5047_v2 = vmul.f32 -1.442695, %v3175_v41 }
0x146e   :  { %5988 = vpow2.f32 %v5047_v2 }
0x147a   :  { %v3184_v17 = vpop.permute.xlu0 %3183 }
0x147b   :  { %v5989_v37 = vpop.eup %5988 }
0x147c   :  { %v3179_v49 = vadd.f32 1.0, %v5989_v37  ;;  %v3061_v37 = vadd.f32 %v5583_v57, %v7427_v16 }
0x147e   :  { %5990 = vrcp.f32 %v3179_v49 }
0x148b   :  { %v5991_v5 = vpop.eup %5990 }
0x148c   :  { %v3186_v63 = vmul.f32 %v5991_v5, %v3184_v17  ;;  %v3193_v55 = vsub.f32 1.0, %v5991_v5  ;;  %v3199_v10 = vmul.f32 0.0, %v5991_v5 }
0x148e   :  { %3188 = vrot.lane.b32.xlu1 %v3186_v63, %s7940_s24 }
0x14bd   :  { %v7444_v35 = vpop.f32.mrf.mxu1 }
0x14bf   :  { %v3065_v23 = vpop.f32.mrf.mxu1 }
0x14c1   :  { %v7446_v34 = vpop.f32.mrf.mxu1 }
0x14c3   :  { %v7448_v13 = vpop.f32.mrf.mxu1 }
0x14c5   :  { %v7450_v25 = vpop.f32.mrf.mxu1 }
0x14c7   :  { %v7452_v19 = vpop.f32.mrf.mxu1 }
0x1500   :  { %v3189_v43 = vpop.permute.xlu1 %3188 }
0x1501   :  { %v3191_v30 = vadd.f32 %v3189_v43, %v3056_v21 }
0x1503   :  { %5992 = vtanh.f32 %v3191_v30 }
0x1510   :  { %v5993_v22 = vpop.eup %5992 }
0x1511   :  { %3195 = vrot.lane.b32.xlu0 %v5993_v22, %s6143_s2 }
0x1583   :  { %v3196_v51 = vpop.permute.xlu0 %3195 }
0x1584   :  { %v3198_v40 = vmul.f32 %v3196_v51, %v3193_v55 }
0x1586   :  { %v3200_v27 = vadd.f32 %v3199_v10, %v3198_v40 }
0x1588   :  { %3202 = vrot.lane.b32.xlu1 %v3200_v27, %s6143_s2 }
0x15fa   :  { %v3203_v33 = vpop.permute.xlu1 %3202 }
0x15fb   :  { %5613 = vmatmul.mubr.msk.f32.vlgmr.msra.gmra.mxu1 %vm304_vm0, %v3203_v33 }
0x15fc   :  { %5627 = vmatpush3.msra.mxu1 %v7262_v4  ;;  %5634 = vmatprep.mubr.msk.f32.mxu1 %vm6144_vm11, %v6141_v44 }
0x15fd   :  { %5628 = vmatprep.subr.mxu1 %v6141_v44 }
0x15fe   :  { %5629 = vmatpush3.msra.mxu1 %v7267_v24 }
0x15ff   :  { %5630 = vmatprep.subr.mxu1 %v6141_v44 }
0x1600   :  { %5631 = vmatpush3.msra.mxu1 %v7274_v7 }
0x1601   :  { %5632 = vmatprep.subr.mxu1 %v6141_v44 }
0x1602   :  { %5633 = vmatpush3.msra.mxu1 %v7281_v59 }
0x1603   :  { %5648 = vmatprep.subr.mxu1 %v6141_v44 }
0x16bb   :  { %v3272_v21 = vpop.f32.mrf.mxu1 }
0x16bc   :  { %v3273_v41 = vadd.f32 %v7408_v18, %v3272_v21 }
0x16bd   :  { %v5614_v2 = vpop.f32.mrf.mxu1 }
0x16be   :  { %3284 = vrot.lane.b32.xlu0 %v3273_v41, %s7940_s24  ;;  %v3276_v49 = vadd.f32 %v3273_v41, %v3061_v37 }
0x16c0   :  { %v5049_v17 = vmul.f32 -1.442695, %v3276_v49 }
0x16c2   :  { %5994 = vpow2.f32 %v5049_v17  ;;  %v3066_v17 = vadd.f32 %v7427_v16, %v3065_v23 }
0x16cf   :  { %v5995_v5 = vpop.eup %5994 }
0x16d0   :  { %v3280_v63 = vadd.f32 1.0, %v5995_v5 }
0x16d2   :  { %5996 = vrcp.f32 %v3280_v63 }
0x16df   :  { %v5997_v43 = vpop.eup %5996 }
0x16e0   :  { %v3294_v40 = vsub.f32 1.0, %v5997_v43  ;;  %v3300_v57 = vmul.f32 %v5997_v43, %v3200_v27 }
0x1730   :  { %v3285_v30 = vpop.permute.xlu0 %3284 }
0x1731   :  { %v3287_v22 = vmul.f32 %v5997_v43, %v3285_v30 }
0x1733   :  { %3289 = vrot.lane.b32.xlu1 %v3287_v22, %s7940_s24 }
0x17a5   :  { %v3290_v55 = vpop.permute.xlu1 %3289 }
0x17a6   :  { %v3292_v51 = vadd.f32 %v3290_v55, %v3061_v37 }
0x17a8   :  { %5998 = vtanh.f32 %v3292_v51 }
0x17b5   :  { %v5999_v10 = vpop.eup %5998 }
0x17b6   :  { %3296 = vrot.lane.b32.xlu0 %v5999_v10, %s6143_s2 }
0x1828   :  { %v3297_v33 = vpop.permute.xlu0 %3296 }
0x1829   :  { %v3299_v21 = vmul.f32 %v3297_v33, %v3294_v40 }
0x182b   :  { %v3301_v41 = vadd.f32 %v3300_v57, %v3299_v21 }
0x182d   :  { %3303 = vrot.lane.b32.xlu1 %v3301_v41, %s6143_s2 }
0x189f   :  { %v3304_v2 = vpop.permute.xlu1 %3303 }
0x18a0   :  { %5624 = vmatmul.mubr.msk.f32.vlgmr.msra.gmra.mxu0 %vm304_vm0, %v3304_v2 }
0x18a1   :  { %5638 = vmatpush3.msra.mxu0 %v7262_v4  ;;  %5645 = vmatprep.mubr.msk.f32.mxu0 %vm6144_vm11, %v6141_v44 }
0x18a2   :  { %5639 = vmatprep.subr.mxu0 %v6141_v44 }
0x18a3   :  { %5640 = vmatpush3.msra.mxu0 %v7267_v24 }
0x18a4   :  { %5641 = vmatprep.subr.mxu0 %v6141_v44 }
0x18a5   :  { %5642 = vmatpush3.msra.mxu0 %v7274_v7 }
0x18a6   :  { %5643 = vmatprep.subr.mxu0 %v6141_v44 }
0x18a7   :  { %5644 = vmatpush3.msra.mxu0 %v7281_v59 }
0x18a8   :  { %5659 = vmatprep.subr.mxu0 %v6141_v44 }
0x1960   :  { %v3373_v27 = vpop.f32.mrf.mxu0 }
0x1961   :  { %v3374_v37 = vadd.f32 %v7408_v18, %v3373_v27 }
0x1962   :  { %v5625_v49 = vpop.f32.mrf.mxu0 }
0x1963   :  { %3385 = vrot.lane.b32.xlu0 %v3374_v37, %s7940_s24  ;;  %v3377_v5 = vadd.f32 %v3374_v37, %v3066_v17 }
0x1965   :  { %v5051_v63 = vmul.f32 -1.442695, %v3377_v5  ;;  %v3071_v5 = vadd.f32 %v7444_v35, %v7427_v16 }
0x1967   :  { %6000 = vpow2.f32 %v5051_v63 }
0x1974   :  { %v6001_v43 = vpop.eup %6000 }
0x1975   :  { %v3381_v30 = vadd.f32 1.0, %v6001_v43 }
0x1977   :  { %6002 = vrcp.f32 %v3381_v30 }
0x1984   :  { %v6003_v22 = vpop.eup %6002 }
0x1985   :  { %v3395_v57 = vsub.f32 1.0, %v6003_v22  ;;  %v3401_v23 = vmul.f32 %v6003_v22, %v3301_v41 }
0x19d5   :  { %v3386_v55 = vpop.permute.xlu0 %3385 }
0x19d6   :  { %v3388_v51 = vmul.f32 %v6003_v22, %v3386_v55 }
0x19d8   :  { %3390 = vrot.lane.b32.xlu1 %v3388_v51, %s7940_s24 }
0x1a4a   :  { %v3391_v10 = vpop.permute.xlu1 %3390 }
0x1a4b   :  { %v3393_v40 = vadd.f32 %v3391_v10, %v3066_v17 }
0x1a4d   :  { %6004 = vtanh.f32 %v3393_v40 }
0x1a5a   :  { %v6005_v33 = vpop.eup %6004 }
0x1a5b   :  { %3397 = vrot.lane.b32.xlu0 %v6005_v33, %s6143_s2 }
0x1acd   :  { %v3398_v21 = vpop.permute.xlu0 %3397 }
0x1ace   :  { %v3400_v2 = vmul.f32 %v3398_v21, %v3395_v57 }
0x1ad0   :  { %v3402_v27 = vadd.f32 %v3401_v23, %v3400_v2 }
0x1ad2   :  { %3404 = vrot.lane.b32.xlu1 %v3402_v27, %s6143_s2 }
0x1b44   :  { %v3405_v37 = vpop.permute.xlu1 %3404 }
0x1b45   :  { %5635 = vmatmul.mubr.msk.f32.vlgmr.msra.gmra.mxu1 %vm304_vm0, %v3405_v37 }
0x1b46   :  { %5649 = vmatpush3.msra.mxu1 %v7262_v4  ;;  %5656 = vmatprep.mubr.msk.f32.mxu1 %vm6144_vm11, %v6141_v44 }
0x1b47   :  { %5650 = vmatprep.subr.mxu1 %v6141_v44 }
0x1b48   :  { %5651 = vmatpush3.msra.mxu1 %v7267_v24 }
0x1b49   :  { %5652 = vmatprep.subr.mxu1 %v6141_v44 }
0x1b4a   :  { %5653 = vmatpush3.msra.mxu1 %v7274_v7 }
0x1b4b   :  { %5654 = vmatprep.subr.mxu1 %v6141_v44 }
0x1b4c   :  { %5655 = vmatpush3.msra.mxu1 %v7281_v59 }
0x1b4d   :  { %5670 = vmatprep.subr.mxu1 %v6141_v44 }
0x1c05   :  { %v3474_v41 = vpop.f32.mrf.mxu1 }
0x1c06   :  { %v3475_v49 = vadd.f32 %v7408_v18, %v3474_v41 }
0x1c07   :  { %v5636_v17 = vpop.f32.mrf.mxu1 }
0x1c08   :  { %3486 = vrot.lane.b32.xlu0 %v3475_v49, %s7940_s24  ;;  %v3478_v63 = vadd.f32 %v3475_v49, %v3071_v5 }
0x1c0a   :  { %v5053_v43 = vmul.f32 -1.442695, %v3478_v63 }
0x1c0c   :  { %6006 = vpow2.f32 %v5053_v43 }
0x1c19   :  { %v6007_v30 = vpop.eup %6006 }
0x1c1a   :  { %v3482_v22 = vadd.f32 1.0, %v6007_v30 }
0x1c1c   :  { %6008 = vrcp.f32 %v3482_v22 }
0x1c29   :  { %v6009_v55 = vpop.eup %6008 }
0x1c2a   :  { %v3496_v21 = vsub.f32 1.0, %v6009_v55  ;;  %v3502_v35 = vmul.f32 %v6009_v55, %v3402_v27 }
0x1c7a   :  { %v3487_v51 = vpop.permute.xlu0 %3486 }
0x1c7b   :  { %v3489_v10 = vmul.f32 %v6009_v55, %v3487_v51 }
0x1c7d   :  { %3491 = vrot.lane.b32.xlu1 %v3489_v10, %s7940_s24 }
0x1cef   :  { %v3492_v40 = vpop.permute.xlu1 %3491 }
0x1cf0   :  { %v3494_v33 = vadd.f32 %v3492_v40, %v3071_v5  ;;  %v3076_v5 = vadd.f32 %v7427_v16, %v7448_v13 }
0x1cf2   :  { %6010 = vtanh.f32 %v3494_v33 }
0x1cff   :  { %v6011_v57 = vpop.eup %6010 }
0x1d00   :  { %3498 = vrot.lane.b32.xlu0 %v6011_v57, %s6143_s2 }
0x1d72   :  { %v3499_v23 = vpop.permute.xlu0 %3498 }
0x1d73   :  { %v3501_v2 = vmul.f32 %v3499_v23, %v3496_v21 }
0x1d75   :  { %v3503_v37 = vadd.f32 %v3502_v35, %v3501_v2 }
0x1d77   :  { %3505 = vrot.lane.b32.xlu1 %v3503_v37, %s6143_s2 }
0x1de9   :  { %v3506_v41 = vpop.permute.xlu1 %3505 }
0x1dea   :  { %5646 = vmatmul.mubr.msk.f32.vlgmr.msra.gmra.mxu0 %vm304_vm0, %v3506_v41 }
0x1deb   :  { %5660 = vmatpush3.msra.mxu0 %v7262_v4  ;;  %5667 = vmatprep.mubr.msk.f32.mxu0 %vm6144_vm11, %v6141_v44 }
0x1dec   :  { %5661 = vmatprep.subr.mxu0 %v6141_v44 }
0x1ded   :  { %5662 = vmatpush3.msra.mxu0 %v7267_v24 }
0x1dee   :  { %5663 = vmatprep.subr.mxu0 %v6141_v44 }
0x1def   :  { %5664 = vmatpush3.msra.mxu0 %v7274_v7 }
0x1df0   :  { %5665 = vmatprep.subr.mxu0 %v6141_v44 }
0x1df1   :  { %5666 = vmatpush3.msra.mxu0 %v7281_v59 }
0x1df2   :  { %5681 = vmatprep.subr.mxu0 %v6141_v44 }
0x1eaa   :  { %v3575_v27 = vpop.f32.mrf.mxu0 }
0x1eab   :  { %v3576_v49 = vadd.f32 %v7408_v18, %v3575_v27 }
0x1eac   :  { %v5647_v17 = vpop.f32.mrf.mxu0 }
0x1ead   :  { %3587 = vrot.lane.b32.xlu0 %v3576_v49, %s7940_s24  ;;  %v3579_v63 = vadd.f32 %v3576_v49, %v3076_v5 }
0x1eaf   :  { %v5055_v43 = vmul.f32 -1.442695, %v3579_v63 }
0x1eb1   :  { %6012 = vpow2.f32 %v5055_v43 }
0x1ebe   :  { %v6013_v30 = vpop.eup %6012 }
0x1ebf   :  { %v3583_v22 = vadd.f32 1.0, %v6013_v30 }
0x1ec1   :  { %6014 = vrcp.f32 %v3583_v22 }
0x1ece   :  { %v6015_v55 = vpop.eup %6014 }
0x1ecf   :  { %v3597_v21 = vsub.f32 1.0, %v6015_v55  ;;  %v3603_v13 = vmul.f32 %v6015_v55, %v3503_v37 }
0x1f1f   :  { %v3588_v51 = vpop.permute.xlu0 %3587 }
0x1f20   :  { %v3590_v10 = vmul.f32 %v6015_v55, %v3588_v51 }
0x1f22   :  { %3592 = vrot.lane.b32.xlu1 %v3590_v10, %s7940_s24 }
0x1f94   :  { %v3593_v40 = vpop.permute.xlu1 %3592 }
0x1f95   :  { %v3595_v33 = vadd.f32 %v3593_v40, %v3076_v5 }
0x1f97   :  { %6016 = vtanh.f32 %v3595_v33 }
0x1fa4   :  { %v6017_v57 = vpop.eup %6016 }
0x1fa5   :  { %3599 = vrot.lane.b32.xlu0 %v6017_v57, %s6143_s2 }
0x2017   :  { %v3600_v23 = vpop.permute.xlu0 %3599 }
0x2018   :  { %v3602_v35 = vmul.f32 %v3600_v23, %v3597_v21 }
0x201a   :  { %v3604_v2 = vadd.f32 %v3603_v13, %v3602_v35  ;;  %v3086_v35 = vadd.f32 %v7427_v16, %v7452_v19 }
0x201c   :  { %3606 = vrot.lane.b32.xlu1 %v3604_v2, %s6143_s2 }
0x208e   :  { %v3607_v41 = vpop.permute.xlu1 %3606 }
0x208f   :  { %5657 = vmatmul.mubr.msk.f32.vlgmr.msra.gmra.mxu1 %vm304_vm0, %v3607_v41 }
0x2090   :  { %5671 = vmatpush3.msra.mxu1 %v7262_v4  ;;  %5678 = vmatprep.mubr.msk.f32.mxu1 %vm6144_vm11, %v6141_v44  ;;  %v3081_v4 = vadd.f32 %v7446_v34, %v7427_v16 }
0x2091   :  { %5672 = vmatprep.subr.mxu1 %v6141_v44 }
0x2092   :  { %5673 = vmatpush3.msra.mxu1 %v7267_v24 }
0x2093   :  { %5674 = vmatprep.subr.mxu1 %v6141_v44 }
0x2094   :  { %5675 = vmatpush3.msra.mxu1 %v7274_v7 }
0x2095   :  { %5676 = vmatprep.subr.mxu1 %v6141_v44 }
0x2096   :  { %5677 = vmatpush3.msra.mxu1 %v7281_v59 }
0x214f   :  { %v3676_v37 = vpop.f32.mrf.mxu1 }
0x2150   :  { %v3677_v27 = vadd.f32 %v7408_v18, %v3676_v37 }
0x2151   :  { %v5658_v49 = vpop.f32.mrf.mxu1 }
0x2152   :  { %3688 = vrot.lane.b32.xlu0 %v3677_v27, %s7940_s24  ;;  %v3680_v17 = vadd.f32 %v3677_v27, %v3081_v4 }
0x2154   :  { %v5057_v5 = vmul.f32 -1.442695, %v3680_v17 }
0x2156   :  { %6018 = vpow2.f32 %v5057_v5 }
0x2163   :  { %v6019_v24 = vpop.eup %6018 }
0x2164   :  { %v3684_v63 = vadd.f32 1.0, %v6019_v24 }
0x2166   :  { %6020 = vrcp.f32 %v3684_v63 }
0x2173   :  { %v6021_v7 = vpop.eup %6020 }
0x2174   :  { %v3698_v51 = vsub.f32 1.0, %v6021_v7  ;;  %v3704_v34 = vmul.f32 %v6021_v7, %v3604_v2 }
0x21c4   :  { %v3689_v43 = vpop.permute.xlu0 %3688 }
0x21c5   :  { %v3691_v30 = vmul.f32 %v6021_v7, %v3689_v43 }
0x21c7   :  { %3693 = vrot.lane.b32.xlu1 %v3691_v30, %s7940_s24 }
0x2239   :  { %v3694_v59 = vpop.permute.xlu1 %3693 }
0x223a   :  { %v3696_v22 = vadd.f32 %v3694_v59, %v3081_v4 }
0x223c   :  { %6022 = vtanh.f32 %v3696_v22 }
0x2249   :  { %v6023_v55 = vpop.eup %6022 }
0x224a   :  { %3700 = vrot.lane.b32.xlu0 %v6023_v55, %s6143_s2 }
0x22bc   :  { %v3701_v10 = vpop.permute.xlu0 %3700 }
0x22bd   :  { %v3703_v40 = vmul.f32 %v3701_v10, %v3698_v51 }
0x22bf   :  { %v3705_v33 = vadd.f32 %v3704_v34, %v3703_v40  ;;  %v3091_v34 = vadd.f32 %v7450_v25, %v7427_v16 }
0x22c1   :  { %3707 = vrot.lane.b32.xlu1 %v3705_v33, %s6143_s2 }
0x2333   :  { %v3708_v57 = vpop.permute.xlu1 %3707 }
0x2334   :  { %5668 = vmatmul.mubr.msk.f32.vlgmr.msra.gmra.mxu0 %vm304_vm0, %v3708_v57 }
0x2335   :  { %5689 = vmatprep.mubr.msk.f32.mxu0 %vm6144_vm11, %v6141_v44 }
0x23f4   :  { %v3777_v21 = vpop.f32.mrf.mxu0 }
0x23f5   :  { %v3778_v23 = vadd.f32 %v7408_v18, %v3777_v21 }
0x23f6   :  { %v5669_v13 = vpop.f32.mrf.mxu0 }
0x23f7   :  { %3789 = vrot.lane.b32.xlu0 %v3778_v23, %s7940_s24  ;;  %v3781_v2 = vadd.f32 %v3778_v23, %v3086_v35 }
0x23f9   :  { %v5059_v41 = vmul.f32 -1.442695, %v3781_v2 }
0x23fb   :  { %6024 = vpow2.f32 %v5059_v41  ;;  %v6071_v41 = vld [vmem:[%s7937_s5] ss:$0 sm:$0xff] }
0x2408   :  { %v6025_v37 = vpop.eup %6024 }
0x2409   :  { %v3785_v27 = vadd.f32 1.0, %v6025_v37  ;;  %v7564_v37 = vadd.f32 %v6071_v41, %v6763_v0 }
0x240b   :  { %6026 = vrcp.f32 %v3785_v27 }
0x2418   :  { %v6027_v49 = vpop.eup %6026 }
0x2419   :  { %v3799_v7 = vsub.f32 1.0, %v6027_v49  ;;  %v3805_v19 = vmul.f32 %v6027_v49, %v3705_v33 }
0x2469   :  { %v3790_v4 = vpop.permute.xlu0 %3789 }
0x246a   :  { %v3792_v17 = vmul.f32 %v6027_v49, %v3790_v4 }
0x246c   :  { %3794 = vrot.lane.b32.xlu1 %v3792_v17, %s7940_s24 }
0x24de   :  { %v3795_v5 = vpop.permute.xlu1 %3794 }
0x24df   :  { %v3797_v24 = vadd.f32 %v3795_v5, %v3086_v35 }
0x24e1   :  { %6028 = vtanh.f32 %v3797_v24 }
0x24ee   :  { %v6029_v63 = vpop.eup %6028 }
0x24ef   :  { %3801 = vrot.lane.b32.xlu0 %v6029_v63, %s6143_s2 }
0x2561   :  { %v3802_v43 = vpop.permute.xlu0 %3801 }
0x2562   :  { %v3804_v30 = vmul.f32 %v3802_v43, %v3799_v7 }
0x2564   :  { %v7539_v59 = vadd.f32 %v3805_v19, %v3804_v30 }
0x2566   :  { %3808 = vrot.lane.b32.xlu1 %v7539_v59, %s6143_s2 }
0x25d8   :  { %v3809_v22 = vpop.permute.xlu1 %3808 }
0x25d9   :  { %5679 = vmatmul.mubr.msk.f32.vlgmr.msra.gmra.mxu1 %vm304_vm0, %v3809_v22 }
0x2699   :  { %v3878_v55 = vpop.f32.mrf.mxu1 }
0x269a   :  { %v3879_v51 = vadd.f32 %v7408_v18, %v3878_v55  ;;  %v6070_v18 = vld [vmem:[%s7936_s4] ss:$0 sm:$0xff] }
0x269b   :  { %v5680_v10 = vpop.f32.mrf.mxu1  ;;  %v2615_v2 = vadd.f32 %v6070_v18, %v7418_v28  ;;  %v2625_v16 = vadd.f32 %v6070_v18, %v7422_v12  ;;  %v2620_v0 = vadd.f32 %v6070_v18, %v7416_v53  ;;  %v2630_v19 = vadd.f32 %v6070_v18, %v7420_v32  ;;  %v3911_v53 = vld [vmem:[%s7902_s13 + $0x18] sm:$0xff]  ;;  %v3910_v32 = vld [vmem:[%s7902_s13 + $0x10] sm:$0xff] }
0x269c   :  { %3890 = vrot.lane.b32.xlu0 %v3879_v51, %s7940_s24  ;;  %v3882_v40 = vadd.f32 %v3879_v51, %v3091_v34  ;;  %5682 = vmatpush3.msra.mxu0 %v3911_v53 }
0x269d   :  { %v2633_v25 = vadd.f32 %v2615_v2, %v6702_v29  ;;  %v2635_v49 = vadd.f32 %v2625_v16, %v7564_v37  ;;  %5683 = vmatprep.subr.mxu0 %v6141_v44 }
0x269e   :  { %v5061_v33 = vmul.f32 -1.442695, %v3882_v40  ;;  %5684 = vmatpush3.msra.mxu0 %v3910_v32  ;;  %v3908_v40 = vld [vmem:[%s7902_s13] sm:$0xff] }
0x269f   :  { %v5017_v27 = vmul.f32 -1.442695, %v2633_v25  ;;  %v5019_v28 = vmul.f32 -1.442695, %v2635_v49  ;;  %5685 = vmatprep.subr.mxu0 %v6141_v44 }
0x26a0   :  { %6030 = vpow2.f32 %v5061_v33  ;;  %v2634_v33 = vadd.f32 %v2620_v0, %v6699_v26 }
0x26ad   :  { %v6031_v57 = vpop.eup %6030 }
0x26ae   :  { %v3886_v21 = vadd.f32 1.0, %v6031_v57  ;;  %v5018_v57 = vmul.f32 -1.442695, %v2634_v33 }
0x26b0   :  { %6032 = vrcp.f32 %v3886_v21  ;;  %v2636_v21 = vadd.f32 %v2630_v19, %v6705_v36 }
0x26b1   :  { %6034 = vpow2.f32 %v5017_v27 }
0x26b2   :  { %6036 = vpow2.f32 %v5019_v28 }
0x26bd   :  { %v7548_v23 = vpop.eup %6032 }
0x26be   :  { %v6035_v12 = vpop.eup %6034  ;;  %v3900_v25 = vsub.f32 1.0, %v7548_v23  ;;  %v3906_v27 = vmul.f32 %v7548_v23, %v7539_v59 }
0x26bf   :  { %v2649_v5 = vadd.f32 1.0, %v6035_v12  ;;  %v6037_v24 = vpop.eup %6036 }
0x26c0   :  { %v2651_v63 = vadd.f32 1.0, %v6037_v24 }
0x270e   :  { %v3891_v13 = vpop.permute.xlu0 %3890 }
0x270f   :  { %v3893_v35 = vmul.f32 %v7548_v23, %v3891_v13  ;;  %v5020_v13 = vmul.f32 -1.442695, %v2636_v21 }
0x2711   :  { %3895 = vrot.lane.b32.xlu1 %v3893_v35, %s7940_s24 }
0x2715   :  { %2665 = vrot.lane.b32.xlu1 %v2615_v2, %s7940_s24 }
0x2719   :  { %2669 = vrot.lane.b32.xlu1 %v2625_v16, %s7940_s24 }
0x2783   :  { %v3896_v4 = vpop.permute.xlu1 %3895 }
0x2784   :  { %v3898_v17 = vadd.f32 %v3896_v4, %v3091_v34  ;;  %v3909_v34 = vld [vmem:[%s7902_s13 + $0x8] sm:$0xff] }
0x2785   :  { %5686 = vmatpush3.msra.mxu0 %v3909_v34 }
0x2786   :  { %6038 = vtanh.f32 %v3898_v17  ;;  %5687 = vmatprep.subr.mxu0 %v6141_v44 }
0x2787   :  { %6040 = vrcp.f32 %v2649_v5  ;;  %v2666_v43 = vpop.permute.xlu1 %2665  ;;  %5688 = vmatpush3.msra.mxu0 %v3908_v40 }
0x2788   :  { %6042 = vrcp.f32 %v2651_v63 }
0x2789   :  { %6044 = vpow2.f32 %v5018_v57 }
0x278a   :  { %6046 = vpow2.f32 %v5020_v13 }
0x278b   :  { %v2670_v55 = vpop.permute.xlu1 %2669 }
0x2793   :  { %v6039_v7 = vpop.eup %6038 }
0x2794   :  { %3902 = vrot.lane.b32.xlu0 %v6039_v7, %s6143_s2  ;;  %v7572_v30 = vpop.eup %6040 }
0x2795   :  { %v2677_v22 = vmul.f32 %v7572_v30, %v2666_v43  ;;  %v7576_v51 = vpop.eup %6042  ;;  %v2705_v32 = vsub.f32 1.0, %v7572_v30  ;;  %v2729_v33 = vmul.f32 %v7572_v30, %v7302_v47  ;;  %v1184_v30 = vmul.f32 %v6748_v60, %v6822_v20  ;;  %v7643_v60 = vld [vmem:[%s7901_s12 + $0x10] sm:$0xff] }
0x2796   :  { %v2679_v10 = vmul.f32 %v7576_v51, %v2670_v55  ;;  %v6045_v35 = vpop.eup %6044  ;;  %v1859_v20 = vmul.f32 %v7008_v15, %v6995_v46  ;;  %v2309_v15 = vmul.f32 %v7181_v1, %v7166_v45  ;;  %v5062_v45 = vld [vmem:[%s7903_s14] ss:$0 sm:$0xff] }
0x2797   :  { %v2650_v18 = vadd.f32 1.0, %v6045_v35  ;;  %v6047_v2 = vpop.eup %6046 }
0x2798   :  { %2667 = vrot.lane.b32.xlu0 %v2620_v0, %s7940_s24  ;;  %v2652_v16 = vadd.f32 1.0, %v6047_v2  ;;  %v1409_v2 = vmul.f32 %v6846_v11, %v6825_v42  ;;  %v7638_v42 = vld [vmem:[%s7901_s12 + $0x8] sm:$0xff] }
0x2799   :  { %6048 = vrcp.f32 %v2650_v18 }
0x279a   :  { %6050 = vrcp.f32 %v2652_v16 }
0x279c   :  { %2671 = vrot.lane.b32.xlu0 %v2630_v19, %s7940_s24 }
0x27a0   :  { %2685 = vrot.lane.b32.xlu0 %v2677_v22, %s7940_s24 }
0x27a4   :  { %2689 = vrot.lane.b32.xlu0 %v2679_v10, %s7940_s24 }
0x27a6   :  { %v6049_v17 = vpop.eup %6048 }
0x27a7   :  { %v6051_v24 = vpop.eup %6050  ;;  %v2706_v47 = vsub.f32 1.0, %v6049_v17 }
0x2806   :  { %v3903_v41 = vpop.permute.xlu0 %3902 }
0x2807   :  { %v3905_v49 = vmul.f32 %v3903_v41, %v3900_v25  ;;  %v1634_v25 = vmul.f32 %v6924_v8, %v6911_v56  ;;  %v2730_v41 = vmul.f32 %v6049_v17, %v7297_v52  ;;  %v2708_v56 = vsub.f32 1.0, %v6051_v24  ;;  %v7651_v52 = vld [vmem:[%s7901_s12 + $0x18] sm:$0xff] }
0x2808   :  { %v2739_v8 = vsub.s32 7, %v6810_v48 }
0x2809   :  { %v3907_v28 = vadd.f32 %v3906_v27, %v3905_v49  ;;  %v7633_v27 = vld [vmem:[%s7901_s12] sm:$0xff] }
0x280a   :  { %v2668_v4 = vpop.permute.xlu0 %2667 }
0x280b   :  { %3920 = vrot.lane.b32.xlu1 %v3907_v28, %s6143_s2  ;;  %v2678_v12 = vmul.f32 %v6049_v17, %v2668_v4  ;;  %v2084_v4 = vmul.f32 %v7092_v39, %v7079_v38  ;;  %v2732_v17 = vmul.f32 %v6051_v24, %v7309_v61 }
0x280e   :  { %v2672_v5 = vpop.permute.xlu0 %2671 }
0x280f   :  { %2687 = vrot.lane.b32.xlu1 %v2678_v12, %s7940_s24  ;;  %v2680_v63 = vmul.f32 %v6051_v24, %v2672_v5 }
0x2812   :  { %v2686_v7 = vpop.permute.xlu0 %2685 }
0x2813   :  { %v2697_v0 = vadd.f32 %v2686_v7, %v6702_v29  ;;  %2691 = vrot.lane.b32.xlu1 %v2680_v63, %s7940_s24  ;;  %v2740_v63 = vrot.slane %v7356_v54, %v2739_v8 }
0x2815   :  { %6052 = vtanh.f32 %v2697_v0 }
0x2816   :  { %v2690_v43 = vpop.permute.xlu0 %2689 }
0x2817   :  { %v2699_v59 = vadd.f32 %v2690_v43, %v7564_v37  ;;  %v2534_v43 = vmul.f32 %v7379_v62, %v7359_v50 }
0x2819   :  { %6054 = vtanh.f32 %v2699_v59 }
0x2822   :  { %v6053_v23 = vpop.eup %6052 }
0x2823   :  { %2713 = vrot.lane.b32.xlu0 %v6053_v23, %s6143_s2 }
0x2826   :  { %v6055_v19 = vpop.eup %6054 }
0x2827   :  { %2717 = vrot.lane.b32.xlu0 %v6055_v19, %s6143_s2 }
0x287d   :  { %v7607_v22 = vpop.permute.xlu1 %3920  }
0x287e   :  { %5690 = vmatmul.mubr.msk.f32.vlgmr.msra.gmra.mxu0 %vm304_vm0, %v7607_v22 }
0x2881   :  { %v2688_v55 = vpop.permute.xlu1 %2687 }
0x2882   :  { %v2698_v29 = vadd.f32 %v2688_v55, %v6699_v26  ;;  %v2707_v26 = vsub.f32 1.0, %v7576_v51 }
0x2884   :  { %6056 = vtanh.f32 %v2698_v29 }
0x2885   :  { %v2692_v10 = vpop.permute.xlu1 %2691 }
0x2886   :  { %v2700_v53 = vadd.f32 %v2692_v10, %v6705_v36  ;;  %v2731_v36 = vmul.f32 %v7576_v51, %v7315_v31  ;;  %v1413_v51 = vadd.f32 %v1409_v2, %v1184_v30 }
0x2888   :  { %6058 = vtanh.f32 %v2700_v53  ;;  %v1638_v28 = vadd.f32 %v1634_v25, %v1413_v51 }
0x288a   :  { %v1863_v46 = vadd.f32 %v1859_v20, %v1638_v28 }
0x288c   :  { %v2088_v0 = vadd.f32 %v2084_v4, %v1863_v46 }
0x288e   :  { %v2313_v38 = vadd.f32 %v2309_v15, %v2088_v0 }
0x2890   :  { %v2538_v24 = vadd.f32 %v2534_v43, %v2313_v38 }
0x2891   :  { %v6057_v37 = vpop.eup %6056 }
0x2892   :  { %2715 = vrot.lane.b32.xlu1 %v6057_v37, %s6143_s2 }
0x2895   :  { %v6059_v34 = vpop.eup %6058  ;;  %v2714_v40 = vpop.permute.xlu0 %2713 }
0x2896   :  { %v2725_v57 = vmul.f32 %v2714_v40, %v2705_v32  ;;  %2719 = vrot.lane.b32.xlu1 %v6059_v34, %s6143_s2  ;;  %v6132_v34 = vmov %v7607_v22  }
0x2898   :  { %v2733_v21 = vadd.f32 %v2729_v33, %v2725_v57 }
0x2899   :  { %v2718_v13 = vpop.permute.xlu0 %2717 }
0x289a   :  { %v2727_v35 = vmul.f32 %v2718_v13, %v2707_v26  ;;  %2745 = vrot.lane.b32.xlu0 %v2733_v21, %s6143_s2 }
0x289c   :  { %v2735_v18 = vadd.f32 %v2731_v36, %v2727_v35 }
0x289e   :  { %2749 = vrot.lane.b32.xlu0 %v2735_v18, %s6143_s2 }
0x2904   :  { %v2716_v16 = vpop.permute.xlu1 %2715 }
0x2905   :  { %v2726_v31 = vmul.f32 %v2716_v16, %v2706_v47 }
0x2907   :  { %v2734_v11 = vadd.f32 %v2730_v41, %v2726_v31 }
0x2908   :  { %v2720_v49 = vpop.permute.xlu1 %2719 }
0x2909   :  { %v2728_v12 = vmul.f32 %v2720_v49, %v2708_v56  ;;  %2747 = vrot.lane.b32.xlu1 %v2734_v11, %s6143_s2 }
0x290b   :  { %v2736_v5 = vadd.f32 %v2732_v17, %v2728_v12 }
0x290c   :  { %v2746_v7 = vpop.permute.xlu0 %2745 }
0x290d   :  { %2751 = vrot.lane.b32.xlu1 %v2736_v5, %s6143_s2  ;;  %v2757_v39 = vmul.f32 %v2746_v7, %v2740_v63 }
0x290f   :  { %v2761_v23 = vadd.f32 %v2757_v39, %v7372_v9 }
0x2910   :  { %v2750_v61 = vpop.permute.xlu0 %2749 }
0x2911   :  { %v2759_v59 = vmul.f32 %v2750_v61, %v2740_v63 }
0x2913   :  { %v2763_v19 = vadd.f32 %v2759_v59, %v2538_v24 }
0x2915   :  { %v2765_v55 = vadd.f32 %v2763_v19, %v2761_v23 }
0x2917   :  { %2767 = vst.msk [vmem:[#allocation2] sm:$0xff] %vm304_vm0, %v2765_v55 }
0x293e   :  { %v3990_v1 = vpop.f32.mrf.mxu0 }
0x293f   :  { %v3991_v54 = vadd.f32 %v5062_v45, %v3990_v1 }
0x2940   :  { %v5691_v50 = vpop.f32.mrf.mxu0 }
0x297b   :  { %v2748_v62 = vpop.permute.xlu1 %2747 }
0x297c   :  { %v2758_v29 = vmul.f32 %v2748_v62, %v2740_v63 }
0x297e   :  { %v2762_v37 = vadd.f32 %v2758_v29, %v7363_v3 }
0x297f   :  { %v2752_v10 = vpop.permute.xlu1 %2751 }
0x2980   :  { %v2760_v53 = vmul.f32 %v2752_v10, %v2740_v63 }
0x2982   :  { %v2764_v32 = vadd.f32 %v2760_v53, %v7382_v58 }
0x2984   :  { %v2766_v9 = vadd.f32 %v2764_v32, %v2762_v37 }
0x2986   :  { %2768 = vst.msk [vmem:[#allocation2 + $0x8] sm:$0xff] %vm304_vm0, %v2766_v9 }
0x2987 LB: > { %v6145_v40 = vmov 0.0   ;;  %vm6146_vm12 = vmmov 0   ;;  %s4004_s1 = sadd.s32 1, %s6138_s1   ;;  %s6138_s1 = sphi %s6136_s1, %s4004_s1   ;;  %v6134_v34 = vphi %v6132_v34, %v6133_v34  }
0x2988   : > { %5692 = vmatprep.subr.mxu0 %v6145_v40  ;;  %5700 = vmatprep.mubr.msk.f32.mxu0 %vm6146_vm12, %v6145_v40  ;;  %p4001_p0 = scmp.ge.s32.totalorder %s4004_s1, 3  }
0x2989   : > { %5693 = vmatpush3.msra.mxu0 %v7651_v52  ;;  %v4083_v21 = vld [vmem:[%s7904_s15 + $0x18] sm:$0xff] (%p4001_p0)  ;;  %v4082_v26 = vld [vmem:[%s7904_s15 + $0x10] sm:$0xff] (%p4001_p0)  ;;  %5714 = vmatprep.subr.mxu1 (%p4001_p0), %v6141_v44  ;;  %v4081_v35 = vld [vmem:[%s7904_s15 + $0x8] sm:$0xff] (%p4001_p0)  ;;  %v4085_v47 = vrot.slane (%p4001_p0), %v6313_v14, 2  ;;  %s7942_s4 = smov (%p4001_p0), 64   ;;  %s6147_s3 = smov (%p4001_p0), 32  }
0x298a   : > { %5694 = vmatprep.subr.mxu0 %v6145_v40  ;;  %v4161_v13 = vld [vmem:[%s7905_s16 + $0x18] sm:$0xff] (%p4001_p0)  ;;  %v4160_v36 = vld [vmem:[%s7905_s16 + $0x10] sm:$0xff] (%p4001_p0)  ;;  %v4159_v18 = vld [vmem:[%s7905_s16 + $0x8] sm:$0xff] (%p4001_p0)  ;;  %5722 = vmatprep.mubr.msk.f32.mxu1 (%p4001_p0), %vm6144_vm11, %v6141_v44 }
0x298b   : > { %5695 = vmatpush3.msra.mxu0 %v7643_v60  ;;  %5715 = vmatpush3.msra.mxu1 (%p4001_p0), %v4161_v13  ;;  %v4080_v2 = vld [vmem:[%s7904_s15] sm:$0xff] (%p4001_p0)  ;;  %v7714_v30 = vld [vmem:[%s7906_s17 + $0x18] sm:$0xff] (%p4001_p0)  ;;  %v7725_v14 = vld [vmem:[%s7906_s17 + $0x10] sm:$0xff] (%p4001_p0) }
0x298c   : > { %5696 = vmatprep.subr.mxu0 %v6145_v40  ;;  %5716 = vmatprep.subr.mxu1 (%p4001_p0), %v6141_v44  ;;  %v4158_v16 = vld [vmem:[%s7905_s16] sm:$0xff] (%p4001_p0)  ;;  %v7734_v25 = vld [vmem:[%s7906_s17 + $0x8] sm:$0xff] (%p4001_p0)  ;;  %v7786_v63 = vld [vmem:[%s7909_s20 + $0x18] sm:$0xff] (%p4001_p0) }
0x298d   : > { %5697 = vmatpush3.msra.mxu0 %v7638_v42  ;;  %5717 = vmatpush3.msra.mxu1 (%p4001_p0), %v4160_v36  ;;  %v7743_v41 = vld [vmem:[%s7906_s17] sm:$0xff] (%p4001_p0)  ;;  %v7791_v7 = vld [vmem:[%s7909_s20 + $0x10] sm:$0xff] (%p4001_p0)  ;;  %v7798_v0 = vld [vmem:[%s7909_s20 + $0x8] sm:$0xff] (%p4001_p0) }
0x298e   : > { %5698 = vmatprep.subr.mxu0 %v6145_v40  ;;  %5718 = vmatprep.subr.mxu1 (%p4001_p0), %v6141_v44  ;;  %v7771_v20 = vld [vmem:[%s7908_s19] ss:$0 sm:$0xff] (%p4001_p0) }
0x298f   : > { %5699 = vmatpush3.msra.mxu0 %v7633_v27  ;;  %5719 = vmatpush3.msra.mxu1 (%p4001_p0), %v4159_v18  ;;  %v5067_v48 = vld [vmem:[%s7907_s18] ss:$0 sm:$0xff] (%p4001_p0) }
0x2990   : > { %5701 = vmatmul.mubr.msk.f32.vlgmr.msra.gmra.mxu0 %vm304_vm0, %v6134_v34  ;;  %5703 = vmatprep.subr.mxu0 (%p4001_p0), %v6141_v44  ;;  %v7805_v38 = vld [vmem:[%s7909_s20] sm:$0xff] (%p4001_p0) }
0x2991   :  { %5704 = vmatpush3.msra.mxu0 (%p4001_p0), %v4083_v21  ;;  %5711 = vmatprep.mubr.msk.f32.mxu0 (%p4001_p0), %vm6144_vm11, %v6141_v44 }
0x2992   :  { %5705 = vmatprep.subr.mxu0 (%p4001_p0), %v6141_v44  ;;  %5720 = vmatprep.subr.mxu1 (%p4001_p0), %v6141_v44 }
0x2993   :  { %5706 = vmatpush3.msra.mxu0 (%p4001_p0), %v4082_v26  ;;  %5721 = vmatpush3.msra.mxu1 (%p4001_p0), %v4158_v16 }
0x2994   :  { %5707 = vmatprep.subr.mxu0 (%p4001_p0), %v6141_v44  ;;  %5723 = vmatmul.mubr.msk.f32.vlgmr.msra.gmra.mxu1 (%p4001_p0), %vm304_vm0, %v7607_v22 }
0x2995   :  { %5708 = vmatpush3.msra.mxu0 (%p4001_p0), %v4081_v35  ;;  %5736 = vmatprep.subr.mxu1 (%p4001_p0), %v6141_v44 }
0x2996   :  { %5709 = vmatprep.subr.mxu0 (%p4001_p0), %v6141_v44  ;;  %5744 = vmatprep.mubr.msk.f32.mxu1 (%p4001_p0), %vm6144_vm11, %v6141_v44 }
0x2997   :  { %5710 = vmatpush3.msra.mxu0 (%p4001_p0), %v4080_v2  ;;  %5737 = vmatpush3.msra.mxu1 (%p4001_p0), %v7786_v63 }
0x2998   :  { %5712 = vmatmul.mubr.msk.f32.vlgmr.msra.gmra.mxu0 (%p4001_p0), %vm304_vm0, %v4085_v47  ;;  %5725 = vmatprep.subr.mxu0 (%p4001_p0), %v6141_v44 }
0x2999   :  { %5726 = vmatpush3.msra.mxu0 (%p4001_p0), %v7714_v30  ;;  %5733 = vmatprep.mubr.msk.f32.mxu0 (%p4001_p0), %vm6144_vm11, %v6141_v44 }
0x299a   :  { %5727 = vmatprep.subr.mxu0 (%p4001_p0), %v6141_v44  ;;  %5738 = vmatprep.subr.mxu1 (%p4001_p0), %v6141_v44 }
0x299b   :  { %5728 = vmatpush3.msra.mxu0 (%p4001_p0), %v7725_v14  ;;  %5739 = vmatpush3.msra.mxu1 (%p4001_p0), %v7791_v7 }
0x299c   :  { %5729 = vmatprep.subr.mxu0 (%p4001_p0), %v6141_v44  ;;  %5740 = vmatprep.subr.mxu1 (%p4001_p0), %v6141_v44 }
0x299d   :  { %5730 = vmatpush3.msra.mxu0 (%p4001_p0), %v7734_v25  ;;  %5741 = vmatpush3.msra.mxu1 (%p4001_p0), %v7798_v0 }
0x299e   :  { %5731 = vmatprep.subr.mxu0 (%p4001_p0), %v6141_v44  ;;  %5742 = vmatprep.subr.mxu1 (%p4001_p0), %v6141_v44 }
0x299f   :  { %5732 = vmatpush3.msra.mxu0 (%p4001_p0), %v7743_v41  ;;  %5743 = vmatpush3.msra.mxu1 (%p4001_p0), %v7805_v38 }
0x29a0   :  { %5747 = vmatprep.subr.mxu0 (%p4001_p0), %v6141_v44  ;;  %5758 = vmatprep.subr.mxu1 (%p4001_p0), %v6141_v44 }
0x2a50   : > { %v4075_v3 = vpop.f32.mrf.mxu0 }
0x2a51   : > { %v4076_v58 = vadd.f32 %v4075_v3, %v3991_v54 }
0x2a52   : > { %v5702_v33 = vpop.f32.mrf.mxu0  ;;  %4003 = sbr.rel (!%p4001_p0) target bundleno = 10631 (0x2987), region = 123 }
0x2a53   : > { %v7677_v34 = vmax.f32 %v4076_v58, 0.0  }
0x2a54   :  { %v4228_v27 = vpop.f32.mrf.mxu1 (%p4001_p0) }
0x2a55   : > { %v7941_v57 = vmov %v7677_v34 }
0x2a56   : > { %v6133_v34 = vmov %v7941_v57   ;;  %5734 = vmatmul.mubr.msk.f32.vlgmr.msra.gmra.mxu0 (%p4001_p0), %vm304_vm0, %v7941_v57  ;;  %v5724_v60 = vpop.f32.mrf.mxu1 (%p4001_p0) }
0x2a57   :  { %5748 = vmatpush3.msra.mxu0 %v7714_v30  ;;  %5755 = vmatprep.mubr.msk.f32.mxu0 %vm6144_vm11, %v6141_v44  ;;  %v5071_v60 = vld [vmem:[%s7910_s21] ss:$0 sm:$0xff]  ;;  %s6148_s21 = smov [#allocation2]  }
0x2a58   :  { %5749 = vmatprep.subr.mxu0 %v6141_v44  ;;  %v4154_v22 = vpop.f32.mrf.mxu0 }
0x2a59   :  { %5750 = vmatpush3.msra.mxu0 %v7725_v14  ;;  %v4235_v31 = vrot.slane %v4154_v22, %v1164_v6 }
0x2a5a   :  { %5751 = vmatprep.subr.mxu0 %v6141_v44  ;;  %v5713_v51 = vpop.f32.mrf.mxu0 }
0x2a5b   :  { %5752 = vmatpush3.msra.mxu0 %v7734_v25  ;;  %v4236_v42 = vadd.f32 %v4235_v31, %v4228_v27 }
0x2a5c   :  { %5753 = vmatprep.subr.mxu0 %v6141_v44 }
0x2a5d   :  { %5754 = vmatpush3.msra.mxu0 %v7743_v41  ;;  %v7778_v6 = vadd.f32 %v5067_v48, %v4236_v42 }
0x2a5e   :  { %5769 = vmatprep.subr.mxu0 %v6141_v44 }
0x2b16   :  { %v4330_v11 = vpop.f32.mrf.mxu0 }
0x2b17   :  { %v4331_v56 = vadd.f32 %v7771_v20, %v4330_v11 }
0x2b18   :  { %v5735_v8 = vpop.f32.mrf.mxu0 }
0x2b19   :  { %4342 = vrot.lane.b32.xlu0 %v4331_v56, %s7942_s4  ;;  %v4334_v52 = vadd.f32 %v4331_v56, %v7778_v6 }
0x2b1b   :  { %v5070_v49 = vmul.f32 -1.442695, %v4334_v52 }
0x2b1d   :  { %6072 = vpow2.f32 %v5070_v49 }
0x2b2a   :  { %v6073_v28 = vpop.eup %6072 }
0x2b2b   :  { %v4338_v4 = vadd.f32 1.0, %v6073_v28 }
0x2b2d   :  { %6074 = vrcp.f32 %v4338_v4 }
0x2b3a   :  { %v6075_v17 = vpop.eup %6074 }
0x2b3b   :  { %v4352_v61 = vsub.f32 1.0, %v6075_v17 }
0x2b8b   :  { %v4343_v12 = vpop.permute.xlu0 %4342 }
0x2b8c   :  { %v4345_v46 = vmul.f32 %v6075_v17, %v4343_v12 }
0x2b8e   :  { %4347 = vrot.lane.b32.xlu0 %v4345_v46, %s7942_s4 }
0x2c00   :  { %v4348_v15 = vpop.permute.xlu0 %4347 }
0x2c01   :  { %v4350_v5 = vadd.f32 %v4348_v15, %v7778_v6 }
0x2c03   :  { %6076 = vtanh.f32 %v4350_v5 }
0x2c10   :  { %v6077_v43 = vpop.eup %6076 }
0x2c11   :  { %4354 = vrot.lane.b32.xlu1 %v6077_v43, %s6143_s2 }
0x2c15   :  { %4358 = vrot.lane.b32.xlu1 %v7941_v57, %s6147_s3 }
0x2c83   :  { %v4355_v39 = vpop.permute.xlu1 %4354 }
0x2c84   :  { %v4357_v59 = vmul.f32 %v4355_v39, %v4352_v61 }
0x2c87   :  { %v4359_v24 = vpop.permute.xlu1 %4358 }
0x2c88   :  { %v4361_v23 = vmul.f32 %v6075_v17, %v4359_v24 }
0x2c8a   :  { %v4362_v19 = vadd.f32 %v4361_v23, %v4357_v59 }
0x2c8c   :  { %4370 = vrot.lane.b32.xlu0 %v4362_v19, %s6143_s2 }
0x2cfe   :  { %v4371_v55 = vpop.permute.xlu0 %4370 }
0x2cff   :  { %5745 = vmatmul.mubr.msk.f32.vlgmr.msra.gmra.mxu1 %vm304_vm0, %v4371_v55  ;;  %5756 = vmatmul.mubr.msk.f32.vlgmr.msra.gmra.mxu0 %vm304_vm0, %v4371_v55 }
0x2d00   :  { %5759 = vmatpush3.msra.mxu1 %v7786_v63  ;;  %5770 = vmatpush3.msra.mxu0 %v7714_v30 }
0x2d01   :  { %5760 = vmatprep.subr.mxu1 %v6141_v44  ;;  %5771 = vmatprep.subr.mxu0 %v6141_v44 }
0x2d02   :  { %5761 = vmatpush3.msra.mxu1 %v7791_v7  ;;  %5772 = vmatpush3.msra.mxu0 %v7725_v14 }
0x2d03   :  { %5762 = vmatprep.subr.mxu1 %v6141_v44  ;;  %5773 = vmatprep.subr.mxu0 %v6141_v44 }
0x2d04   :  { %5763 = vmatpush3.msra.mxu1 %v7798_v0  ;;  %5774 = vmatpush3.msra.mxu0 %v7734_v25 }
0x2d05   :  { %5764 = vmatprep.subr.mxu1 %v6141_v44  ;;  %5775 = vmatprep.subr.mxu0 %v6141_v44 }
0x2d06   :  { %5765 = vmatpush3.msra.mxu1 %v7805_v38  ;;  %5766 = vmatprep.mubr.msk.f32.mxu1 %vm6144_vm11, %v6141_v44 }
0x2d07   :  { %5776 = vmatpush3.msra.mxu0 %v7743_v41  ;;  %5777 = vmatprep.mubr.msk.f32.mxu0 %vm6144_vm11, %v6141_v44 }
0x2d08   :  { %5780 = vmatprep.subr.mxu1 %v6141_v44 }
0x2dbf   :  { %v7836_v45 = vpop.f32.mrf.mxu1  ;;  %v4523_v1 = vpop.f32.mrf.mxu0 }
0x2dc0   :  { %v4524_v54 = vadd.f32 %v7771_v20, %v4523_v1 }
0x2dc1   :  { %v5746_v50 = vpop.f32.mrf.mxu1  ;;  %v5757_v62 = vpop.f32.mrf.mxu0 }
0x2dc2   :  { %4535 = vrot.lane.b32.xlu1 %v4524_v54, %s7942_s4  ;;  %v4527_v29 = vadd.f32 %v4524_v54, %v7778_v6 }
0x2dc4   :  { %v5074_v10 = vmul.f32 -1.442695, %v4527_v29 }
0x2dc6   :  { %6078 = vpow2.f32 %v5074_v10 }
0x2dd3   :  { %v6079_v53 = vpop.eup %6078 }
0x2dd4   :  { %v4531_v37 = vadd.f32 1.0, %v6079_v53 }
0x2dd6   :  { %6080 = vrcp.f32 %v4531_v37 }
0x2de3   :  { %v6081_v32 = vpop.eup %6080 }
0x2de4   :  { %v4545_v33 = vsub.f32 1.0, %v6081_v32  ;;  %v4551_v26 = vmul.f32 %v6081_v32, %v4362_v19 }
0x2e34   :  { %v4536_v9 = vpop.permute.xlu1 %4535 }
0x2e35   :  { %v4538_v34 = vmul.f32 %v6081_v32, %v4536_v9 }
0x2e37   :  { %4540 = vrot.lane.b32.xlu0 %v4538_v34, %s7942_s4 }
0x2ea9   :  { %v4541_v40 = vpop.permute.xlu0 %4540 }
0x2eaa   :  { %v4543_v3 = vadd.f32 %v4541_v40, %v7778_v6 }
0x2eac   :  { %6082 = vtanh.f32 %v4543_v3 }
0x2eb9   :  { %v6083_v58 = vpop.eup %6082 }
0x2eba   :  { %4547 = vrot.lane.b32.xlu1 %v6083_v58, %s6143_s2 }
0x2f2c   :  { %v4548_v57 = vpop.permute.xlu1 %4547 }
0x2f2d   :  { %v4550_v21 = vmul.f32 %v4548_v57, %v4545_v33 }
0x2f2f   :  { %v4552_v13 = vadd.f32 %v4551_v26, %v4550_v21 }
0x2f31   :  { %4554 = vrot.lane.b32.xlu0 %v4552_v13, %s6143_s2 }
0x2fa3   :  { %v4555_v36 = vpop.permute.xlu0 %4554 }
0x2fa4   :  { %5767 = vmatmul.mubr.msk.f32.vlgmr.msra.gmra.mxu1 %vm304_vm0, %v4555_v36  ;;  %5778 = vmatmul.mubr.msk.f32.vlgmr.msra.gmra.mxu0 %vm304_vm0, %v4555_v36 }
0x2fa5   :  { %5781 = vmatpush3.msra.mxu1 %v7786_v63  ;;  %5788 = vmatprep.mubr.msk.f32.mxu1 %vm6144_vm11, %v6141_v44 }
0x2fa6   :  { %5782 = vmatprep.subr.mxu1 %v6141_v44 }
0x2fa7   :  { %5783 = vmatpush3.msra.mxu1 %v7791_v7  ;;  %v4441_v7 = vadd.f32 %v5071_v60, %v7836_v45 }
0x2fa8   :  { %5784 = vmatprep.subr.mxu1 %v6141_v44 }
0x2fa9   :  { %5785 = vmatpush3.msra.mxu1 %v7798_v0  ;;  %v4444_v43 = vsel %vm304_vm0, %v4441_v7, -inf }
0x2faa   :  { %5786 = vmatprep.subr.mxu1 %v6141_v44 }
0x2fab   :  { %5787 = vmatpush3.msra.mxu1 %v7805_v38 }
0x3064   :  { %v4624_v35 = vpop.f32.mrf.mxu1  ;;  %v4712_v18 = vpop.f32.mrf.mxu0 }
0x3065   :  { %v4713_v2 = vadd.f32 %v7771_v20, %v4712_v18  ;;  %v4625_v20 = vadd.f32 %v5071_v60, %v4624_v35 }
0x3066   :  { %v5768_v47 = vpop.f32.mrf.mxu1  ;;  %v5779_v30 = vpop.f32.mrf.mxu0 }
0x3067   :  { %4724 = vrot.lane.b32.xlu1 %v4713_v2, %s7942_s4  ;;  %v4716_v16 = vadd.f32 %v4713_v2, %v7778_v6  ;;  %v4628_v11 = vsel %vm304_vm0, %v4625_v20, -inf }
0x3069   :  { %v5077_v14 = vmul.f32 -1.442695, %v4716_v16 }
0x306b   :  { %6084 = vpow2.f32 %v5077_v14 }
0x3078   :  { %v6085_v25 = vpop.eup %6084 }
0x3079   :  { %v4720_v41 = vadd.f32 1.0, %v6085_v25 }
0x307b   :  { %6086 = vrcp.f32 %v4720_v41 }
0x3088   :  { %v6087_v22 = vpop.eup %6086 }
0x3089   :  { %v4734_v56 = vsub.f32 1.0, %v6087_v22  ;;  %v4740_v52 = vmul.f32 %v6087_v22, %v4552_v13 }
0x30d9   :  { %v4725_v31 = vpop.permute.xlu1 %4724 }
0x30da   :  { %v4727_v44 = vmul.f32 %v6087_v22, %v4725_v31 }
0x30dc   :  { %4729 = vrot.lane.b32.xlu0 %v4727_v44, %s7942_s4 }
0x314e   :  { %v4730_v51 = vpop.permute.xlu0 %4729 }
0x314f   :  { %v4732_v27 = vadd.f32 %v4730_v51, %v7778_v6 }
0x3151   :  { %6088 = vtanh.f32 %v4732_v27 }
0x315e   :  { %v6089_v42 = vpop.eup %6088 }
0x315f   :  { %4736 = vrot.lane.b32.xlu1 %v6089_v42, %s6143_s2 }
0x3183   :  { %4629 = vmax.xlane.f32.xlu1 %v4628_v11 }
0x31d1   :  { %v4737_v8 = vpop.permute.xlu1 %4736 }
0x31d2   :  { %v4739_v48 = vmul.f32 %v4737_v8, %v4734_v56 }
0x31d4   :  { %v4741_v49 = vadd.f32 %v4740_v52, %v4739_v48 }
0x31d6   :  { %4743 = vrot.lane.b32.xlu0 %v4741_v49, %s6143_s2  ;;  %s4842_s2 = sshll.u32 %s6148_s21, 4  ;;  %s4843_s2 = int_to_ptr.vmem [resolvable:$true] %s4842_s2 }
0x31d7   :  { %s6102_s0 = scalar_lea.vmem %s4843_s2, 256  ;;  %p6107_p2 = scmp.lt.s32.totalorder %s4843_s2, %s4843_s2 }
0x31d8   :  { %p6103_p1 = scmp.ne.s32.totalorder %s4843_s2, %s6102_s0  ;;  %p6108_p3 = scmp.lt.s32.totalorder %s6102_s0, %s6102_s0 }
0x31da   :  { %p6109_p4 = por %p6108_p3, %p6107_p2 }
0x31dc   :  { %p6110_p5 = pnand %p6109_p4, %p6103_p1 }
0x320c   :  { %v4630_v6 = vpop.xlane.xlu1 %4629 }
0x320d   :  { %v4631_v28 = vsub.f32 %v4625_v20, %v4630_v6 }
0x320f   :  { %v4632_v4 = vmul.f32 1.442695, %v4631_v28 }
0x3211   :  { %6090 = vpow2.f32 %v4632_v4 }
0x321e   :  { %v6091_v17 = vpop.eup %6090 }
0x321f   :  { %v4634_v12 = vsel %vm304_vm0, %v6091_v17, 0.0 }
0x3220   :  { %4635 = vadd.xlane.f32.xlu1 %v4634_v12 }
0x3248   :  { %v4744_v46 = vpop.permute.xlu0 %4743 }
0x3249   :  { %5789 = vmatmul.mubr.msk.f32.vlgmr.msra.gmra.mxu1 %vm304_vm0, %v4744_v46 }
0x32a9   :  { %v4636_v19 = vpop.xlane.xlu1 %4635 }
0x3309   :  { %v4813_v15 = vpop.f32.mrf.mxu1 }
0x330a   :  { %v4814_v5 = vadd.f32 %v5071_v60, %v4813_v15 }
0x330b   :  { %v5790_v63 = vpop.f32.mrf.mxu1 }
0x330c   :  { %v4817_v0 = vsel %vm304_vm0, %v4814_v5, -inf }
0x330d   :  { %4818 = vmax.xlane.f32.xlu0 %v4817_v0 }
0x3311   :  { %4445 = vmax.xlane.f32.xlu0 %v4444_v43 }
0x3396   :  { %v4819_v38 = vpop.xlane.xlu0 %4818 }
0x3397   :  { %v4820_v39 = vsub.f32 %v4814_v5, %v4819_v38 }
0x3399   :  { %v4821_v61 = vmul.f32 1.442695, %v4820_v39 }
0x339a   :  { %v4446_v24 = vpop.xlane.xlu0 %4445 }
0x339b   :  { %6092 = vpow2.f32 %v4821_v61  ;;  %v4447_v59 = vsub.f32 %v4441_v7, %v4446_v24 }
0x339d   :  { %v4448_v23 = vmul.f32 1.442695, %v4447_v59 }
0x339f   :  { %6094 = vpow2.f32 %v4448_v23 }
0x33a0   :  { %6096 = vlog2.f32 %v4636_v19 }
0x33a8   :  { %v6093_v55 = vpop.eup %6092 }
0x33a9   :  { %v4823_v1 = vsel %vm304_vm0, %v6093_v55, 0.0 }
0x33aa   :  { %4824 = vadd.xlane.f32.xlu0 %v4823_v1 }
0x33ac   :  { %v6095_v45 = vpop.eup %6094 }
0x33ad   :  { %v4450_v54 = vsel %vm304_vm0, %v6095_v45, 0.0  ;;  %v6097_v50 = vpop.eup %6096 }
0x33ae   :  { %4451 = vadd.xlane.f32.xlu1 %v4450_v54  ;;  %v4638_v62 = vmul.f32 0.6931472, %v6097_v50 }
0x33b0   :  { %v4639_v29 = vsub.f32 %v4631_v28, %v4638_v62 }
0x33c0   :  { %4641 = vrot.lane.b32.xlu0 %v4639_v29, %s6147_s3 }
0x3433   :  { %v4825_v10 = vpop.xlane.xlu0 %4824 }
0x3434   :  { %6098 = vlog2.f32 %v4825_v10 }
0x3437   :  { %v4452_v53 = vpop.xlane.xlu1 %4451 }
0x3438   :  { %6100 = vlog2.f32 %v4452_v53 }
0x3439   :  { %6113 = shalt.err (!%p6110_p5)
}
0x343a   :  { %s6149_s24 = smov 128   ;;  %s6150_s11 = smov 8   ;;  %vm4644_vm13 = vcmask 523520   ;;  %v4642_v58 = vpop.permute.xlu0 %4641  ;;  %vm4833_vm14 = vcmask 785920  }
0x343b   :  { %4848 = dma.vmem_to_hbm [thread:$0]  %s4843_s2, 256, %s7912_s23, [#allocation3], %s6149_s24, %s6149_s24, %s6150_s11  }
0x3441   :  { %v6099_v37 = vpop.eup %6098 }
0x3442   :  { %v4827_v32 = vmul.f32 0.6931472, %v6099_v37 }
0x3444   :  { %v4828_v9 = vsub.f32 %v4820_v39, %v4827_v32 }
0x3445   :  { %v6101_v34 = vpop.eup %6100 }
0x3446   :  { %v4454_v40 = vmul.f32 0.6931472, %v6101_v34  ;;  %4830 = vrot.lane.b32.xlu1 %v4828_v9, %s7942_s4 }
0x3448   :  { %v4455_v3 = vsub.f32 %v4447_v59, %v4454_v40 }
0x344a   :  { %4456 = vst.msk [vmem:[%s7911_s22] sm:$0xff] %vm304_vm0, %v4455_v3 }
0x344b   :  { %4645 = vst.msk [vmem:[%s7911_s22] sm:$0xff] %vm4644_vm13, %v4642_v58 }
0x34b8   :  { %v4831_v33 = vpop.permute.xlu1 %4830 }
0x34b9   :  { %4834 = vst.msk [vmem:[%s7911_s22] sm:$0xff] %vm4833_vm14, %v4831_v33 }
0x34ba   :  { %6130 = dma.done.wait [#allocation3], 256  }
0x34bb   :  { %6131 = vsyncadd [#allocation3], 4294967040 }
0x34bc   :  { %4854 = vsyncpa [#allocation3], 1 }

</bundles_post_ra>
